<compile_context>
chip_gen: v5e
topology: v5e:2x2
jax: 0.10.0
libtpu: 0.0.40
codegen_flags: <defaults>
</compile_context>

<pallas_src>
import jax
import jax.numpy as jnp
from jax.experimental import pallas as pl
from jax.experimental.pallas import tpu as pltpu

HIDDEN = 32      # stand-in for hubert hidden_size (768 for hubert-base)
VOCAB = 9001     # final_linear out_features (exact, per module)
KSIZE = 5        # ConvTranspose1d kernel_size
STRIDE = 2
PADDING = 1
NEG_INF = -1e30  # padding value for the padded vocab lanes of the (folded) linear bias

# Hubert feature-extractor conv geometry (hubert-base default config)
_CONV_KERNEL = (10, 3, 3, 3, 3, 2, 2)
_CONV_STRIDE = (5, 2, 2, 2, 2, 2, 2)


def feat_extract_output_lengths(input_lengths):
    """Exact replica of HubertModel._get_feat_extract_output_lengths."""
    lengths = input_lengths
    for k, s in zip(_CONV_KERNEL, _CONV_STRIDE):
        lengths = (lengths - k) // s + 1
    return lengths   # int32 (torch casts to int64; x64 is disabled in JAX by default)


def _head_kernel(x_ref, wup_ref, wlin_ref, beff_ref, perm_ref, logp_ref, lse_ref):
    x = x_ref[0]                                   # [T, H] f32
    T, H = x.shape

    # ---- ConvTranspose1d taps: ONE fused MXU pass over all 5 taps (bf16 in, f32 acc) ----
    # wup_ref is [H, 5H] = [W0 | W1 | W2 | W3 | W4], each W_k: [H_in, H_out].
    y_all = jnp.dot(x.astype(jnp.bfloat16), wup_ref[...],
                    preferred_element_type=jnp.float32)        # [T, 5H]
    y0 = y_all[:, 0 * H:1 * H]
    y1 = y_all[:, 1 * H:2 * H]
    y2 = y_all[:, 2 * H:3 * H]
    y3 = y_all[:, 3 * H:4 * H]
    y4 = y_all[:, 4 * H:5 * H]

    zrow = jnp.zeros((1, H), jnp.float32)
    shift_down = lambda a: jnp.concatenate([zrow, a[:-1, :]], axis=0)   # row m -> a[m-1]
    shift_up = lambda a: jnp.concatenate([a[1:, :], zrow], axis=0)      # row m -> a[m+1]

    # ConvTranspose1d (k=5, stride=2, padding=1), after cropping the padding
    # (conv bias is folded into the final-linear bias host-side; dropout is identity in eval):
    #   out[2n]   = x[n]   @ W1 + x[n-1] @ W3                   (even time rows)
    #   out[2n+1] = x[n+1] @ W0 + x[n]   @ W2 + x[n-1] @ W4     (odd time rows)
    even_rows = y1 + shift_down(y3)                                  # [T, H]
    odd_rows = shift_up(y0) + y2 + shift_down(y4)                    # [T, H]

    # ---- interleave even/odd rows into final time order: rows[2n]=even[n], rows[2n+1]=odd[n]
    # done at H width via a small precomputed [2T,2T] 0/1 permutation matmul on the MXU.
    stacked = jnp.concatenate([even_rows, odd_rows], axis=0).astype(jnp.bfloat16)   # [2T, H]
    rows = jnp.dot(perm_ref[...], stacked,
                   preferred_element_type=jnp.float32).astype(jnp.bfloat16)         # [2T, H]

    # ---- final Linear + log_softmax: SINGLE [2T,H] @ [H,Vpad] matmul (bf16 in, f32 acc) ----
    # padded w_lin cols are 0 and padded bias lanes are -1e30, so padded lanes never
    # influence the max / sum below. beff = b_up @ W_lin + b_lin (folded conv bias).
    logits = jnp.dot(rows, wlin_ref[...],
                     preferred_element_type=jnp.float32) + beff_ref[...]   # [2T, Vpad]

    m = jnp.max(logits, axis=-1, keepdims=True)
    lse = m + jnp.log(jnp.sum(jnp.exp(logits - m), axis=-1, keepdims=True))
    logp_ref[0] = logits - lse      # log_probs, final time order, lane-dense Vpad
    lse_ref[0] = lse                # per-row log-sum-exp (logits = log_probs + lse)


def hubert_head_forward(encoder_output, w_up, b_up, w_lin, b_lin, t_up):
    """encoder_output: [B, T, H] f32. Returns (log_probs [B, t_up, V], logits_ce [B, V, t_up])."""
    B, T, H = encoder_output.shape
    V = w_lin.shape[1]
    v_pad = ((V + 127) // 128) * 128     # lane-dense padded vocab: 9001 -> 9088

    # Weight prep (pure layout / tiny math, outside the kernel):
    #   - 5 conv-transpose taps side by side -> [H, 5H] for one fused MXU pass
    #   - fold the conv-transpose bias through the final linear: beff = b_up @ W_lin + b_lin
    #   - zero-pad w_lin columns, -1e30-pad beff tail (log_softmax unaffected)
    #   - bf16 matmul operands (kernel accumulates in f32)
    w_up_cat = jnp.concatenate([w_up[k] for k in range(KSIZE)], axis=1).astype(jnp.bfloat16)
    b_up_f32 = b_up.astype(jnp.float32).reshape(1, H)
    b_eff = b_up_f32 @ w_lin.astype(jnp.float32) + b_lin.astype(jnp.float32).reshape(1, V)
    b_eff_p = jnp.pad(b_eff, ((0, 0), (0, v_pad - V)), constant_values=NEG_INF)
    w_lin_p = jnp.pad(w_lin, ((0, 0), (0, v_pad - V))).astype(jnp.bfloat16)

    # Precomputed even/odd -> time-order permutation matrix (constant across the grid).
    rr = jnp.arange(2 * T, dtype=jnp.int32)
    src = jnp.where(rr % 2 == 0, rr // 2, T + rr // 2)
    perm = jax.nn.one_hot(src, 2 * T, dtype=jnp.bfloat16)          # [2T, 2T]

    grid_spec = pltpu.PrefetchScalarGridSpec(
        num_scalar_prefetch=0,
        grid=(B,),                                                 # megacore-parallel batch axis
        in_specs=[
            pl.BlockSpec((1, T, H), lambda b: (b, 0, 0)),          # encoder output block
            pl.BlockSpec((H, KSIZE * H), lambda b: (0, 0)),        # fused conv-transpose taps
            pl.BlockSpec((H, v_pad), lambda b: (0, 0)),            # final linear weight (padded)
            pl.BlockSpec((1, v_pad), lambda b: (0, 0)),            # folded bias (padded)
            pl.BlockSpec((2 * T, 2 * T), lambda b: (0, 0)),        # interleave permutation
        ],
        out_specs=[
            pl.BlockSpec((1, 2 * T, v_pad), lambda b: (b, 0, 0)),  # log_probs (time-ordered)
            pl.BlockSpec((1, 2 * T, 1), lambda b: (b, 0, 0)),      # per-row lse
        ],
    )
    logp_pad, lse = pl.pallas_call(
        _head_kernel,
        out_shape=(jax.ShapeDtypeStruct((B, 2 * T, v_pad), jnp.float32),
                   jax.ShapeDtypeStruct((B, 2 * T, 1), jnp.float32)),
        grid_spec=grid_spec,
        compiler_params=pltpu.CompilerParams(dimension_semantics=("parallel",)),
    )(encoder_output, w_up_cat, w_lin_p, b_eff_p, perm)

    # Crop to the valid upsampled length and real vocab; reconstruct logits from
    # log_probs + per-row lse (they differ only by that scalar). CE-order permute stays
    # outside the kernel (pure layout).
    log_probs = logp_pad[:, :t_up, :V]
    logits = log_probs + lse[:, :t_up, :]
    logits_ce_order = jnp.transpose(logits, (0, 2, 1))
    return log_probs, logits_ce_order


def _reference_head(encoder_output, w_up, b_up, w_lin, b_lin, t_up):
    """Pure-JAX f32 reference of the same head (conv-transpose taps / linear / log_softmax)."""
    B, T, H = encoder_output.shape
    zrow = jnp.zeros((B, 1, H), jnp.float32)
    shift_down = lambda a: jnp.concatenate([zrow, a[:, :-1, :]], axis=1)
    shift_up = lambda a: jnp.concatenate([a[:, 1:, :], zrow], axis=1)
    taps = [encoder_output @ w_up[k] for k in range(KSIZE)]
    even = taps[1] + shift_down(taps[3])
    odd = shift_up(taps[0]) + taps[2] + shift_down(taps[4])
    up = jnp.stack([even, odd], axis=2).reshape(B, 2 * T, H) + b_up.reshape(1, 1, H)
    up = up[:, :t_up, :]
    logits = up @ w_lin + b_lin.reshape(1, 1, -1)
    log_probs = jax.nn.log_softmax(logits, axis=-1)
    return log_probs, jnp.transpose(logits, (0, 2, 1))


if __name__ == "__main__":
    B = 2
    T_AUDIO = 2640   # feature-extractor output length = 8 for this raw-audio length

    key = jax.random.PRNGKey(0)
    k_audio, k_enc, k_wup, k_bup, k_wlin, k_blin = jax.random.split(key, 6)

    raw_audio = jax.random.normal(k_audio, (B, T_AUDIO, 1), dtype=jnp.float32)
    raw_audio_len = jnp.array([T_AUDIO, T_AUDIO - 320], dtype=jnp.int32)

    # squeeze(raw_audio, -1) would feed Hubert; only its shape/length matters here.
    audio_features_size = feat_extract_output_lengths(raw_audio_len)          # [B]
    T_feat = int(feat_extract_output_lengths(jnp.array(T_AUDIO, jnp.int32)))  # padded length
    t_up = int(jnp.max(audio_features_size)) * 2

    # Synthetic stand-in for hubert(...).last_hidden_state  (see TODO(synk) above).
    encoder_output = jax.random.normal(k_enc, (B, T_feat, HIDDEN), dtype=jnp.float32)

    # ConvTranspose1d weight stored as [K, H_in, H_out] (torch layout is [H_in, H_out, K]).
    w_up = 0.05 * jax.random.normal(k_wup, (KSIZE, HIDDEN, HIDDEN), jnp.float32)
    b_up = 0.01 * jax.random.normal(k_bup, (1, HIDDEN), jnp.float32)
    # Linear weight stored as [H, V] (torch weight is [V, H]).
    w_lin = 0.05 * jax.random.normal(k_wlin, (HIDDEN, VOCAB), jnp.float32)
    b_lin = 0.01 * jax.random.normal(k_blin, (1, VOCAB), jnp.float32)

    log_probs, logits_ce_order = hubert_head_forward(
        encoder_output, w_up, b_up, w_lin, b_lin, t_up)
    out_sizes = audio_features_size * 2   # third forward output

    jax.block_until_ready((log_probs, logits_ce_order, out_sizes))
    assert log_probs.shape == (B, t_up, VOCAB)
    assert logits_ce_order.shape == (B, VOCAB, t_up)

    # Numerical sanity check against a pure-JAX f32 reference (bf16 matmul tolerance).
    ref_lp, ref_lce = _reference_head(encoder_output, w_up, b_up, w_lin, b_lin, t_up)
    assert float(jnp.max(jnp.abs(log_probs - ref_lp))) < 5e-2
    assert float(jnp.max(jnp.abs(logits_ce_order - ref_lce))) < 5e-2

    print("KERNEL_OK")
</pallas_src>

<mosaic_0001>
module attributes {stable_mosaic.version = 11 : i64} {
  func.func @_head_kernel(%arg0: i32, %arg1: memref<1x8x32xf32, #tpu.memory_space<vmem>>, %arg2: memref<32x160xbf16, #tpu.memory_space<vmem>>, %arg3: memref<32x9088xbf16, #tpu.memory_space<vmem>>, %arg4: memref<1x9088xf32, #tpu.memory_space<vmem>>, %arg5: memref<16x16xbf16, #tpu.memory_space<vmem>>, %arg6: memref<1x16x9088xf32, #tpu.memory_space<vmem>>, %arg7: memref<1x16x1xf32, #tpu.memory_space<vmem>>) attributes {dimension_semantics = [#tpu.dimension_semantics<parallel>], iteration_bounds = array<i64: 2>, scalar_prefetch = 0 : i64, scratch_operands = 0 : i64, tpu.core_type = #tpu.core_type<tc>, window_params = [{transform_indices = @transform_0, window_bounds = array<i64: 1, 8, 32>}, {pipeline_mode = #tpu.pipeline_mode<synchronous>, transform_indices = @transform_1, window_bounds = array<i64: 32, 160>}, {pipeline_mode = #tpu.pipeline_mode<synchronous>, transform_indices = @transform_2, window_bounds = array<i64: 32, 9088>}, {pipeline_mode = #tpu.pipeline_mode<synchronous>, transform_indices = @transform_3, window_bounds = array<i64: 1, 9088>}, {pipeline_mode = #tpu.pipeline_mode<synchronous>, transform_indices = @transform_4, window_bounds = array<i64: 16, 16>}, {transform_indices = @transform_5, window_bounds = array<i64: 1, 16, 9088>}, {transform_indices = @transform_6, window_bounds = array<i64: 1, 16, 1>}]} {
    %c0 = arith.constant 0 : index
    %c0_0 = arith.constant 0 : index
    %c0_1 = arith.constant 0 : index
    %0 = vector.load %arg1[%c0, %c0_0, %c0_1] : memref<1x8x32xf32, #tpu.memory_space<vmem>>, vector<1x8x32xf32>
    %1 = vector.shape_cast %0 : vector<1x8x32xf32> to vector<8x32xf32>
    %2 = arith.truncf %1 : vector<8x32xf32> to vector<8x32xbf16>
    %c0_2 = arith.constant 0 : index
    %c0_3 = arith.constant 0 : index
    %3 = vector.load %arg2[%c0_2, %c0_3] : memref<32x160xbf16, #tpu.memory_space<vmem>>, vector<32x160xbf16>
    %cst = arith.constant dense<0.000000e+00> : vector<8x160xf32>
    %4 = tpu.matmul %2, %3, %cst {dimension_numbers = #tpu.dot_dimension_numbers<[1], [0], [0], [1], [0, 0, 1, 1], [], []>} : vector<8x32xbf16>, vector<32x160xbf16>, vector<8x160xf32> -> vector<8x160xf32>
    %5 = vector.extract_strided_slice %4 {offsets = [0, 0], sizes = [8, 32], strides = [1, 1]} : vector<8x160xf32> to vector<8x32xf32>
    %6 = vector.extract_strided_slice %4 {offsets = [0, 32], sizes = [8, 32], strides = [1, 1]} : vector<8x160xf32> to vector<8x32xf32>
    %7 = vector.extract_strided_slice %4 {offsets = [0, 64], sizes = [8, 32], strides = [1, 1]} : vector<8x160xf32> to vector<8x32xf32>
    %8 = vector.extract_strided_slice %4 {offsets = [0, 96], sizes = [8, 32], strides = [1, 1]} : vector<8x160xf32> to vector<8x32xf32>
    %9 = vector.extract_strided_slice %4 {offsets = [0, 128], sizes = [8, 32], strides = [1, 1]} : vector<8x160xf32> to vector<8x32xf32>
    %cst_4 = arith.constant 0.000000e+00 : f32
    %10 = vector.broadcast %cst_4 : f32 to vector<1x32xf32>
    %11 = vector.extract_strided_slice %8 {offsets = [0, 0], sizes = [7, 32], strides = [1, 1]} : vector<8x32xf32> to vector<7x32xf32>
    %12 = tpu.concatenate %10, %11 in 0 : vector<1x32xf32>, vector<7x32xf32> -> vector<8x32xf32>
    %13 = arith.addf %6, %12 : vector<8x32xf32>
    %14 = vector.extract_strided_slice %5 {offsets = [1, 0], sizes = [7, 32], strides = [1, 1]} : vector<8x32xf32> to vector<7x32xf32>
    %15 = tpu.concatenate %14, %10 in 0 : vector<7x32xf32>, vector<1x32xf32> -> vector<8x32xf32>
    %16 = arith.addf %15, %7 : vector<8x32xf32>
    %17 = vector.extract_strided_slice %9 {offsets = [0, 0], sizes = [7, 32], strides = [1, 1]} : vector<8x32xf32> to vector<7x32xf32>
    %18 = tpu.concatenate %10, %17 in 0 : vector<1x32xf32>, vector<7x32xf32> -> vector<8x32xf32>
    %19 = arith.addf %16, %18 : vector<8x32xf32>
    %20 = tpu.concatenate %13, %19 in 0 : vector<8x32xf32>, vector<8x32xf32> -> vector<16x32xf32>
    %21 = arith.truncf %20 : vector<16x32xf32> to vector<16x32xbf16>
    %c0_5 = arith.constant 0 : index
    %c0_6 = arith.constant 0 : index
    %22 = vector.load %arg5[%c0_5, %c0_6] : memref<16x16xbf16, #tpu.memory_space<vmem>>, vector<16x16xbf16>
    %cst_7 = arith.constant dense<0.000000e+00> : vector<16x32xf32>
    %23 = tpu.matmul %22, %21, %cst_7 {dimension_numbers = #tpu.dot_dimension_numbers<[1], [0], [0], [1], [0, 0, 1, 1], [], []>} : vector<16x16xbf16>, vector<16x32xbf16>, vector<16x32xf32> -> vector<16x32xf32>
    %24 = arith.truncf %23 : vector<16x32xf32> to vector<16x32xbf16>
    %c0_8 = arith.constant 0 : index
    %c0_9 = arith.constant 0 : index
    %25 = vector.load %arg3[%c0_8, %c0_9] : memref<32x9088xbf16, #tpu.memory_space<vmem>>, vector<32x9088xbf16>
    %cst_10 = arith.constant dense<0.000000e+00> : vector<16x9088xf32>
    %26 = tpu.matmul %24, %25, %cst_10 {dimension_numbers = #tpu.dot_dimension_numbers<[1], [0], [0], [1], [0, 0, 1, 1], [], []>} : vector<16x32xbf16>, vector<32x9088xbf16>, vector<16x9088xf32> -> vector<16x9088xf32>
    %c0_11 = arith.constant 0 : index
    %c0_12 = arith.constant 0 : index
    %27 = vector.load %arg4[%c0_11, %c0_12] : memref<1x9088xf32, #tpu.memory_space<vmem>>, vector<1x9088xf32>
    %28 = vector.broadcast %27 : vector<1x9088xf32> to vector<16x9088xf32>
    %29 = arith.addf %26, %28 : vector<16x9088xf32>
    %cst_13 = arith.constant dense<0xFF800000> : vector<16xf32>
    %30 = vector.multi_reduction <maximumf>, %29, %cst_13 [1] : vector<16x9088xf32> to vector<16xf32>
    %31 = vector.shape_cast %30 : vector<16xf32> to vector<16x1xf32>
    %32 = vector.broadcast %31 : vector<16x1xf32> to vector<16x9088xf32>
    %33 = arith.subf %29, %32 : vector<16x9088xf32>
    %34 = math.exp %33 : vector<16x9088xf32>
    %cst_14 = arith.constant dense<0.000000e+00> : vector<16xf32>
    %35 = vector.multi_reduction <add>, %34, %cst_14 [1] : vector<16x9088xf32> to vector<16xf32>
    %36 = vector.shape_cast %35 : vector<16xf32> to vector<16x1xf32>
    %37 = math.log %36 : vector<16x1xf32>
    %38 = arith.addf %31, %37 : vector<16x1xf32>
    %39 = vector.broadcast %38 : vector<16x1xf32> to vector<16x9088xf32>
    %40 = arith.subf %29, %39 : vector<16x9088xf32>
    %c0_15 = arith.constant 0 : index
    %c0_16 = arith.constant 0 : index
    %c0_17 = arith.constant 0 : index
    %41 = vector.load %arg6[%c0_15, %c0_16, %c0_17] : memref<1x16x9088xf32, #tpu.memory_space<vmem>>, vector<1x16x9088xf32>
    %42 = vector.shape_cast %41 : vector<1x16x9088xf32> to vector<16x9088xf32>
    %43 = vector.shape_cast %40 : vector<16x9088xf32> to vector<1x16x9088xf32>
    tpu.vector_store %arg6[%c0_15, %c0_16, %c0_17], %43 {strides = array<i32>} : memref<1x16x9088xf32, #tpu.memory_space<vmem>>, vector<1x16x9088xf32>,
    %c0_18 = arith.constant 0 : index
    %c0_19 = arith.constant 0 : index
    %c0_20 = arith.constant 0 : index
    %44 = vector.load %arg7[%c0_18, %c0_19, %c0_20] : memref<1x16x1xf32, #tpu.memory_space<vmem>>, vector<1x16x1xf32>
    %45 = vector.shape_cast %44 : vector<1x16x1xf32> to vector<16x1xf32>
    %46 = vector.shape_cast %38 : vector<16x1xf32> to vector<1x16x1xf32>
    tpu.vector_store %arg7[%c0_18, %c0_19, %c0_20], %46 {strides = array<i32>} : memref<1x16x1xf32, #tpu.memory_space<vmem>>, vector<1x16x1xf32>,
    return
  }
  func.func @transform_0(%arg0: i32) -> (i32, i32, i32) {
    %c0_i32 = arith.constant 0 : i32
    %c0_i32_0 = arith.constant 0 : i32
    %c0_i32_1 = arith.constant 0 : i32
    return %arg0, %c0_i32, %c0_i32_0 : i32, i32, i32
  }
  func.func @transform_1(%arg0: i32) -> (i32, i32) {
    %c0_i32 = arith.constant 0 : i32
    %c0_i32_0 = arith.constant 0 : i32
    %c0_i32_1 = arith.constant 0 : i32
    return %c0_i32, %c0_i32_0 : i32, i32
  }
  func.func @transform_2(%arg0: i32) -> (i32, i32) {
    %c0_i32 = arith.constant 0 : i32
    %c0_i32_0 = arith.constant 0 : i32
    %c0_i32_1 = arith.constant 0 : i32
    return %c0_i32, %c0_i32_0 : i32, i32
  }
  func.func @transform_3(%arg0: i32) -> (i32, i32) {
    %c0_i32 = arith.constant 0 : i32
    %c0_i32_0 = arith.constant 0 : i32
    %c0_i32_1 = arith.constant 0 : i32
    return %c0_i32, %c0_i32_0 : i32, i32
  }
  func.func @transform_4(%arg0: i32) -> (i32, i32) {
    %c0_i32 = arith.constant 0 : i32
    %c0_i32_0 = arith.constant 0 : i32
    %c0_i32_1 = arith.constant 0 : i32
    return %c0_i32, %c0_i32_0 : i32, i32
  }
  func.func @transform_5(%arg0: i32) -> (i32, i32, i32) {
    %c0_i32 = arith.constant 0 : i32
    %c0_i32_0 = arith.constant 0 : i32
    %c0_i32_1 = arith.constant 0 : i32
    return %arg0, %c0_i32, %c0_i32_0 : i32, i32, i32
  }
  func.func @transform_6(%arg0: i32) -> (i32, i32, i32) {
    %c0_i32 = arith.constant 0 : i32
    %c0_i32_0 = arith.constant 0 : i32
    %c0_i32_1 = arith.constant 0 : i32
    return %arg0, %c0_i32, %c0_i32_0 : i32, i32, i32
  }
}

</mosaic_0001>

<bundles_post_ra>
// kernel: tpu_custom_call.1
= control target key start
LH: loop header
LB: loop body
LE: loop exit
PB: predicated region body
PF: predicated region fallthrough
CT: control target
= control target key end

     0   :  { %s7089_s0 = inlined_call_operand.hbm [shape: f32[2,8,32], index: 0, kind: input, shape index: {}]   ;;  %s7090_s1 = inlined_call_operand.hbm [shape: bf16[32,160], index: 1, kind: input, shape index: {}]   ;;  %s7091_s2 = inlined_call_operand.hbm [shape: bf16[32,9088], index: 2, kind: input, shape index: {}]   ;;  %s7092_s3 = inlined_call_operand.hbm [shape: f32[1,9088], index: 3, kind: input, shape index: {}]   ;;  %s7093_s4 = inlined_call_operand.hbm [shape: bf16[16,16], index: 4, kind: input, shape index: {}]   ;;  %s7094_s5 = inlined_call_operand.hbm [shape: f32[2,16,9088], index: 5, kind: output, shape index: {0}]   ;;  %s7095_s6 = inlined_call_operand.vmem [shape: f32[2,16,1], index: 6, kind: output, shape index: {1}]  }
   0x1   :  { %7311 = sst [smem:[#allocation131_spill]] %s7090_s1 }
   0x2   :  { %12 = vsyncpa [#allocation3], 0 }
   0x3   :  { %14 = vsyncpa [#allocation3 + $0x1], 0 }
   0x4   :  { %15 = vsyncpa [#allocation6], 0 }
   0x5   :  { %16 = vsyncpa [#allocation9], 0 }
   0x6   :  { %17 = vsyncpa [#allocation4], 0 }
   0x7   :  { %19 = vsyncpa [#allocation4 + $0x1], 0  ;;  %s5137_s21 = smov 0   ;;  %s5139_s22 = smov 0  }
   0x8   :  { %s5141_s23 = smov 0   ;;  %s5143_s24 = smov 0  }
   0x9 LB: > { %s7312_s1 = sld [smem:[#allocation131_spill]]  ;;  %s5161_s28 = sadd.s32 4294967295, %s5085_s24   ;;  %s5085_s24 = sphi %s5143_s24, %s7731_s24   ;;  %s5081_s23 = sphi %s5141_s23, %s7730_s23   ;;  %s5077_s22 = sphi %s5139_s22, %s7729_s22   ;;  %s5073_s21 = sphi %s5137_s21, %s7728_s21  }
   0xa   : > { %p3644_p0 = scmp.ge.s32.totalorder %s5085_s24, 1  ;;  %p46_p1 = scmp.eq.s32.totalorder %s5161_s28, 0 }
   0xb   : > { %p192_p2 = scmp.lt.s32.totalorder %s5085_s24, 3  ;;  %s5087_s30 = smov [#allocation5]  }
   0xc   : > { %s205_s7 = sshll.u32 %s5087_s30, 4  ;;  %s232_s10 = sshll.u32 %s7092_s3, 4  ;;  %s206_s7 = int_to_ptr.vmem [resolvable:$true] %s205_s7  ;;  %s233_s10 = int_to_ptr.hbm [resolvable:$true] %s232_s10 }
   0xd   : > { %p5166_p3 = pnand %p3644_p0, %p192_p2  ;;  %s217_s14 = sshll.u32 %s7091_s2, 4  ;;  %s218_s14 = int_to_ptr.hbm [resolvable:$true] %s217_s14 }
   0xe   : > { %s5088_s15 = smov [#allocation8]   ;;  %s5089_s17 = smov 128  }
   0xf   : > { %s203_s27 = sshll.u32 %s7312_s1, 4  ;;  %p4495_p4 = pneg %p5166_p3  ;;  %s204_s27 = int_to_ptr.hbm [resolvable:$true] %s203_s27 }
  0x10   : > { %s234_s16 = sshll.u32 %s5088_s15, 4  ;;  %s5090_s18 = smov 8   ;;  %s235_s16 = int_to_ptr.vmem [resolvable:$true] %s234_s16 }
  0x11   : > { %p5178_p6 = pnand %p4495_p4, %p46_p1  ;;  %s5091_s19 = smov [#allocation7]  }
  0x12   : > { %s219_s20 = sshll.u32 %s5091_s19, 4  ;;  %s243_s30 = sshll.u32 %s7093_s4, 4  ;;  %s220_s20 = int_to_ptr.vmem [resolvable:$true] %s219_s20  ;;  %s244_s30 = int_to_ptr.hbm [resolvable:$true] %s243_s30 }
  0x13   : > { %4498 = dma.hbm_to_vmem [thread:$0]  (!%p5178_p6), %s204_s27, 512, %s206_s7, [#allocation6], %s5089_s17, %s5089_s17, %s5090_s18  }
  0x14   : > { %4504 = dma.hbm_to_vmem [thread:$0]  (!%p5178_p6), %s233_s10, 1136, %s235_s16, [#allocation9]  }
  0x15   : > { %s5092_s8 = smov 4544   ;;  %s5093_s27 = smov 284  }
  0x16   : > { %4501 = dma.hbm_to_vmem [thread:$0]  (!%p5178_p6), %s218_s14, 18176, %s220_s20, [#allocation6], %s5092_s8, %s5092_s8, %s5093_s27  }
  0x17   : > { %s5094_s7 = smov [#allocation10]   ;;  %s5095_s10 = smov 64  }
  0x18   : > { %s245_s9 = sshll.u32 %s5094_s7, 4  ;;  %s5096_s12 = smov 4   ;;  %s246_s9 = int_to_ptr.vmem [resolvable:$true] %s245_s9 }
  0x19   : > { %4507 = dma.hbm_to_vmem [thread:$0]  (!%p5178_p6), %s244_s30, 128, %s246_s9, [#allocation9], %s5095_s10, %s5095_s10, %s5096_s12  }
  0x1a   : > { %s3643_s13 = sadd.s32 4294967294, %s5085_s24   ;;  %s5198_s15 = sadd.s32 1, %s5085_s24  }
  0x1b   : > { %s29_s16 = ssub.s32 %s5085_s24, %s5198_s15  ;;  %s32_s14 = sadd.s32 1, %s5081_s23 }
  0x1c   : > { %p30_p7 = scmp.eq.s32.totalorder %s29_s16, 0  ;;  %p39_p8 = scmp.ne.s32.totalorder %s5081_s23, %s5077_s22 }
  0x1d   : > { %p40_p9 = scmp.eq.s32.totalorder %s5085_s24, 0  ;;  %p45_p10 = scmp.ne.s32.totalorder %s5077_s22, %s5073_s21 }
  0x1e   : > { %s5209_s17 = scalar_select %p30_p7, %s5081_s23, %s32_s14  }
  0x1f   : > { %p5211_p11 = por %p40_p9, %p39_p8  ;;  %p5217_p12 = por %p46_p1, %p45_p10 }
  0x20   : > { %p153_p13 = scmp.eq.s32.totalorder %s5161_s28, 1  ;;  %p159_p0 = scmp.eq.s32.totalorder %s3643_s13, 1 }
  0x21   : > { %p4520_p2 = scmp.lt.s32.totalorder %s5085_s24, 2  ;;  %s259_s19 = sand.u32 1, %s5081_s23  }
  0x22   : > { %p5224_p4 = por %p153_p13, %p39_p8  ;;  %p5228_p6 = por %p159_p0, %p45_p10 }
  0x23   : > { %s3650_s26 = sshll.u32 %s259_s19, 3  ;;  %s3651_s30 = sshll.u32 %s5085_s24, 3 }
  0x24   : > { %s267_s7 = scalar_lea.hbm %s7089_s0, %s3651_s30  ;;  %s263_s9 = scalar_lea.vmem [#allocation2], %s3650_s26 }
  0x25   : > { %s271_s10 = sshll.u32 %s263_s9, 4  ;;  %s269_s12 = sshll.u32 %s267_s7, 4  ;;  %s272_s10 = int_to_ptr.vmem [resolvable:$true] %s271_s10  ;;  %s270_s12 = int_to_ptr.hbm [resolvable:$true] %s269_s12 }
  0x26   : > { %p5238_p7 = pnand %p4520_p2, %p5211_p11  ;;  %s260_s16 = scalar_lea.sflag [#allocation3], %s259_s19 }
  0x27   : > { %s4981_s14 = sshra.s32 %s270_s12, 4  ;;  %s4988_s8 = scalar_lea.hbm %s7089_s0, 16  ;;  %s4982_s14 = int_to_ptr.hbm [resolvable:$true] %s4981_s14 }
  0x28   : > { %s4983_s1 = scalar_lea.hbm %s4982_s14, 8  ;;  %p4985_p9 = pneg %p5238_p7 }
  0x29   : > { %p4984_p8 = scmp.ne.s32.totalorder %s4982_s14, %s4983_s1  ;;  %p4989_p11 = scmp.lt.s32.totalorder %s4982_s14, %s7089_s0 }
  0x2a   : > { %p4990_p0 = scmp.lt.s32.totalorder %s4988_s8, %s4983_s1 }
  0x2b   : > { %p4986_p10 = pnand %p4985_p9, %p4984_p8 }
  0x2c   : > { %p4991_p2 = por %p4990_p0, %p4989_p11 }
  0x2d   : > { %p4987_p13 = pneg %p4986_p10 }
  0x2f   : > { %p4992_p5 = pnand %p4991_p2, %p4987_p13 }
  0x31   : > { %4995 = shalt.err (!%p4992_p5)
}
  0x32   : > { %4511 = dma.hbm_to_vmem [thread:$0]  (!%p5238_p7), %s270_s12, 128, %s272_s10, %s260_s16  }
  0x33   : > { %280 = sbr.rel (%p5166_p3) target bundleno = 1656 (0x678), region = 40 }
  0x38   : > { %s5255_s19 = sand.u32 1, %s5077_s22  }
  0x39   : > { %s3653_s7 = sshll.u32 %s5255_s19, 3  ;;  %s283_s9 = scalar_lea.sflag [#allocation3], %s5255_s19 }
  0x3a   : > { %s286_s26 = scalar_lea.vmem [#allocation2], %s3653_s7 }
  0x3b   : > { %5056 = dma.done.wait (%p5217_p12), %s283_s9, 128  }
  0x3c   : > { %5058 = vsyncadd (%p5217_p12), %s283_s9, 4294967168 }
  0x3d   : > { %5060 = dma.done.wait (%p46_p1), [#allocation6], 18688  }
  0x3e   : > { %5062 = vsyncadd (%p46_p1), [#allocation6], 4294948608 }
  0x3f   : > { %5064 = dma.done.wait (%p46_p1), [#allocation9], 1264  }
  0x40   : > { %5066 = vsyncadd (%p46_p1), [#allocation9], 4294966032  ;;  %v3670_v0 = vld [vmem:[#allocation5 + $0x10] sm:$0xf]  ;;  %v4329_v1 = vld [vmem:[#allocation5 + $0x14] sm:$0xf0] }
  0x41   : > { %v3662_v2 = vld [vmem:[#allocation5] sm:$0xf]  ;;  %v3671_v3 = vor.u32 %v4329_v1, %v3670_v0  ;;  %v4327_v4 = vld [vmem:[#allocation5 + $0x4] sm:$0xf0]  ;;  %v4328_v5 = vld [vmem:[#allocation5 + $0x14] sm:$0xf] }
  0x42   : > { %v3672_v6 = vld [vmem:[#allocation5 + $0x18] sm:$0xf0]  ;;  %v4326_v7 = vld [vmem:[#allocation5 + $0x4] sm:$0xf]  ;;  %v3664_v8 = vld [vmem:[#allocation5 + $0x8] sm:$0xf0]  ;;  %v3663_v9 = vor.u32 %v4327_v4, %v3662_v2 }
  0x43   : > { %383 = vmatpush.bf16.msra.mxu0 %v3671_v3  ;;  %v347_v10 = vld [vmem:[%s286_s26] sm:$0xff]  ;;  %v3675_v11 = vor.u32 %v4328_v5, %v3672_v6  ;;  %v3667_v12 = vor.u32 %v4326_v7, %v3664_v8  ;;  %vm373_vm0 = vcmask 261120   ;;  %s5097_s1 = smov 64   ;;  %s5098_s29 = smov 32   ;;  %vm417_vm1 = vcmask 1046528  }
  0x44   : > { %v348_v13 = vpack.c.bf16 %v347_v10, %v347_v10  ;;  %vm408_vm2 = vcmask 1040384   ;;  %s5099_s11 = smov 96   ;;  %v4402_v32 = vld [vmem:[#allocation7 + $0x23c] sm:$0xf]  ;;  %v3971_v33 = vld [vmem:[#allocation7 + $0x354] sm:$0xf0] }
  0x45   : > { %396 = vmatpush.bf16.msra.mxu1 %v3675_v11  ;;  %v3974_v34 = vor.u32 %v4402_v32, %v3971_v33  ;;  %v4330_v36 = vld [vmem:[#allocation10] sm:$0xff]  ;;  %vm444_vm3 = vcmask 130048   ;;  %v3977_v37 = vld [vmem:[#allocation7 + $0x240] sm:$0xf]  ;;  %v4437_v41 = vld [vmem:[#allocation7 + $0x350] sm:$0xf0] }
  0x46   : > { %v4438_v38 = vld [vmem:[#allocation7 + $0x358] sm:$0xf0]  ;;  %v3969_v39 = vld [vmem:[#allocation7 + $0x238] sm:$0xf]  ;;  %v4403_v42 = vld [vmem:[#allocation7 + $0x244] sm:$0xf] }
  0x47   : > { %384 = vmatpush.bf16.msra.mxu0 %v3663_v9  ;;  %v3978_v40 = vor.u32 %v4438_v38, %v3977_v37  ;;  %v3979_v43 = vld [vmem:[#allocation7 + $0x35c] sm:$0xf0]  ;;  %v3970_v44 = vor.u32 %v4437_v41, %v3969_v39  ;;  %v4331_v46 = vld [vmem:[#allocation7 + $0x4] sm:$0xf]  ;;  %v4366_v50 = vld [vmem:[#allocation7 + $0x118] sm:$0xf0] }
  0x48   : > { %v3982_v45 = vor.u32 %v4403_v42, %v3979_v43  ;;  %v3687_v47 = vld [vmem:[#allocation7 + $0x11c] sm:$0xf0]  ;;  %v3693_v51 = vld [vmem:[#allocation7 + $0x8] sm:$0xf]  ;;  %v4367_v53 = vld [vmem:[#allocation7 + $0x120] sm:$0xf0] }
  0x49   : > { %397 = vmatpush.bf16.msra.mxu1 %v3667_v12  ;;  %v3690_v48 = vor.u32 %v4331_v46, %v3687_v47  ;;  %1488 = vmatpush.bf16.msra.mxu3 %v3970_v44  ;;  %v3685_v49 = vld [vmem:[#allocation7] sm:$0xf]  ;;  %v4332_v54 = vld [vmem:[#allocation7 + $0xc] sm:$0xf]  ;;  %v3695_v55 = vld [vmem:[#allocation7 + $0x124] sm:$0xf0]  ;;  %v3694_v56 = vor.u32 %v4367_v53, %v3693_v51 }
  0x4a   : > { %3676 = vmatmul.msk.bf16.vlgmr.msra.gmra.mxu0 %vm373_vm0, %v348_v13  ;;  %v3686_v52 = vor.u32 %v4366_v50, %v3685_v49  ;;  %v3698_v57 = vor.u32 %v4332_v54, %v3695_v55  ;;  %v3985_v58 = vld [vmem:[#allocation7 + $0x248] sm:$0xf]  ;;  %v4439_v59 = vld [vmem:[#allocation7 + $0x360] sm:$0xf0]  ;;  %v4404_v60 = vld [vmem:[#allocation7 + $0x24c] sm:$0xf] }
  0x4b   : > { %1516 = vmatpush.bf16.msrb.mxu0 %v3978_v40  ;;  %v3986_v61 = vor.u32 %v4439_v59, %v3985_v58  ;;  %v3987_v62 = vld [vmem:[#allocation7 + $0x364] sm:$0xf0]  ;;  %v3701_v63 = vld [vmem:[#allocation7 + $0x10] sm:$0xf]  ;;  %v4368_v0 = vld [vmem:[#allocation7 + $0x128] sm:$0xf0] }
  0x4c   : > { %3677 = vmatmul.msk.bf16.vlgmr.msra.gmra.mxu1 %vm373_vm0, %v348_v13  ;;  %v3990_v1 = vor.u32 %v4404_v60, %v3987_v62  ;;  %v3993_v2 = vld [vmem:[#allocation7 + $0x250] sm:$0xf]  ;;  %v4440_v3 = vld [vmem:[#allocation7 + $0x368] sm:$0xf0]  ;;  %v4405_v4 = vld [vmem:[#allocation7 + $0x254] sm:$0xf]  ;;  %v3702_v5 = vor.u32 %v4368_v0, %v3701_v63 }
  0x4d   : > { %1530 = vmatpush.bf16.msrb.mxu1 %v3982_v45  ;;  %1489 = vmatpush.bf16.msra.mxu3 %v3686_v52  ;;  %v3994_v6 = vor.u32 %v4440_v3, %v3993_v2  ;;  %v3995_v7 = vld [vmem:[#allocation7 + $0x36c] sm:$0xf0]  ;;  %v4333_v8 = vld [vmem:[#allocation7 + $0x14] sm:$0xf]  ;;  %v3709_v12 = vld [vmem:[#allocation7 + $0x18] sm:$0xf] }
  0x4e   : > { %v3703_v9 = vld [vmem:[#allocation7 + $0x12c] sm:$0xf0]  ;;  %v3998_v10 = vor.u32 %v4405_v4, %v3995_v7  ;;  %v4369_v13 = vld [vmem:[#allocation7 + $0x130] sm:$0xf0]  ;;  %v4370_v32 = vld [vmem:[#allocation7 + $0x138] sm:$0xf0] }
  0x4f   : > { %1517 = vmatpush.bf16.msrb.mxu0 %v3694_v56  ;;  %v3706_v11 = vor.u32 %v4333_v8, %v3703_v9  ;;  %v3725_v37 = vld [vmem:[#allocation7 + $0x28] sm:$0xf]  ;;  %v4371_v38 = vld [vmem:[#allocation7 + $0x140] sm:$0xf0]  ;;  %v4336_v39 = vld [vmem:[#allocation7 + $0x2c] sm:$0xf] }
  0x50   : > { %v3727_v40 = vld [vmem:[#allocation7 + $0x144] sm:$0xf0]  ;;  %v3726_v43 = vor.u32 %v4371_v38, %v3725_v37  ;;  %v4443_v46 = vld [vmem:[#allocation7 + $0x380] sm:$0xf0]  ;;  %v4408_v47 = vld [vmem:[#allocation7 + $0x26c] sm:$0xf] }
  0x51   : > { %1531 = vmatpush.bf16.msrb.mxu1 %v3698_v57  ;;  %1544 = vmatpush.bf16.msrb.mxu3 %v3986_v61  ;;  %v3730_v44 = vor.u32 %v4336_v39, %v3727_v40  ;;  %v4017_v45 = vld [vmem:[#allocation7 + $0x268] sm:$0xf]  ;;  %v4025_v49 = vld [vmem:[#allocation7 + $0x270] sm:$0xf]  ;;  %v4444_v50 = vld [vmem:[#allocation7 + $0x388] sm:$0xf0] }
  0x52   : > { %v4409_v51 = vld [vmem:[#allocation7 + $0x274] sm:$0xf]  ;;  %v4027_v52 = vld [vmem:[#allocation7 + $0x38c] sm:$0xf0]  ;;  %v4018_v53 = vor.u32 %v4443_v46, %v4017_v45  ;;  %v4372_v56 = vld [vmem:[#allocation7 + $0x148] sm:$0xf0]  ;;  %v4026_v57 = vor.u32 %v4444_v50, %v4025_v49 }
  0x53   : > { %1572 = vmatpush.bf16.msra.mxu0 %v3994_v6  ;;  %v3733_v55 = vld [vmem:[#allocation7 + $0x30] sm:$0xf]  ;;  %v4030_v58 = vor.u32 %v4409_v51, %v4027_v52  ;;  %v4337_v59 = vld [vmem:[#allocation7 + $0x34] sm:$0xf]  ;;  %v3741_v61 = vld [vmem:[#allocation7 + $0x38] sm:$0xf] }
  0x54   : > { %v3735_v60 = vld [vmem:[#allocation7 + $0x14c] sm:$0xf0]  ;;  %v4373_v62 = vld [vmem:[#allocation7 + $0x150] sm:$0xf0]  ;;  %v4338_v63 = vld [vmem:[#allocation7 + $0x3c] sm:$0xf] }
  0x55   : > { %1586 = vmatpush.bf16.msra.mxu1 %v3998_v10  ;;  %1545 = vmatpush.bf16.msrb.mxu3 %v3702_v5  ;;  %v3743_v0 = vld [vmem:[#allocation7 + $0x154] sm:$0xf0]  ;;  %v3738_v2 = vor.u32 %v4337_v59, %v3735_v60  ;;  %v3742_v3 = vor.u32 %v4373_v62, %v3741_v61  ;;  %v4445_v6 = vld [vmem:[#allocation7 + $0x390] sm:$0xf0]  ;;  %v4410_v7 = vld [vmem:[#allocation7 + $0x27c] sm:$0xf] }
  0x56   : > { %v3746_v4 = vor.u32 %v4338_v63, %v3743_v0  ;;  %v4033_v5 = vld [vmem:[#allocation7 + $0x278] sm:$0xf]  ;;  %v4041_v9 = vld [vmem:[#allocation7 + $0x280] sm:$0xf]  ;;  %v4446_v10 = vld [vmem:[#allocation7 + $0x398] sm:$0xf0] }
  0x57   : > { %v4035_v8 = vld [vmem:[#allocation7 + $0x394] sm:$0xf0]  ;;  %v4059_v37 = vld [vmem:[#allocation7 + $0x3ac] sm:$0xf0]  ;;  %v4450_v59 = vld [vmem:[#allocation7 + $0x3b8] sm:$0xf0] }
  0x58   : > { %v3765_v40 = vld [vmem:[#allocation7 + $0x50] sm:$0xf]  ;;  %v3773_v46 = vld [vmem:[#allocation7 + $0x58] sm:$0xf]  ;;  %v4415_v60 = vld [vmem:[#allocation7 + $0x2a4] sm:$0xf] }
  0x59   : > { %v3767_v45 = vld [vmem:[#allocation7 + $0x16c] sm:$0xf0]  ;;  %v3775_v49 = vld [vmem:[#allocation7 + $0x174] sm:$0xf0]  ;;  %v4075_v61 = vld [vmem:[#allocation7 + $0x3bc] sm:$0xf0] }
  0x5a   : > { %v3781_v0 = vld [vmem:[#allocation7 + $0x60] sm:$0xf]  ;;  %p341_p1 = scmp.lt.s32.totalorder %s5161_s28, 1  ;;  %s4473_s13 = smul.u32 1136, %s5255_s19  ;;  %vm3480_vm4 = vcmask 7168  }
  0x5b   : > { %s4474_s27 = smul.u32 1136, %s5161_s28 }
  0x5c   : > { %s342_s10 = scalar_select %p341_p1, %s5161_s28, 1 }
  0x5d   : > { %s6631_s8 = scalar_lea.vmem [#allocation11], %s4473_s13  ;;  %s3500_s7 = scalar_lea.hbm %s7094_s5, %s4474_s27 }
  0x5e   : > { %s4325_s12 = sshll.u32 %s342_s10, 4  ;;  %s3501_s9 = sshll.u32 %s6631_s8, 4  ;;  %s3502_s9 = int_to_ptr.vmem [resolvable:$true] %s3501_s9 }
  0x5f   : > { %s6613_s30 = scalar_lea.vmem %s7095_s6, %s4325_s12  ;;  %s3503_s26 = sshll.u32 %s3500_s7, 4  ;;  %s3504_s26 = int_to_ptr.hbm [resolvable:$true] %s3503_s26 }
  0x60   : > { %s5031_s13 = scalar_lea.hbm %s7094_s5, 2272 }
  0xc7   : > { %v386_v14 = vpop.f32.mrf.mxu0 }
  0xc8   : > { %419 = vrot.lane.b32.xlu0 %v386_v14, %s5097_s1  ;;  %v404_v16 = vrot.slane %v386_v14, 7  ;;  %v415_v20 = vrot.slane %v386_v14, 1  ;;  %s3484_s1 = scalar_lea.sflag [#allocation4], %s5255_s19 }
  0xc9   : > { %v399_v15 = vpop.f32.mrf.mxu1 }
  0xca   : > { %v424_v22 = vrot.slane %v399_v15, 7  ;;  %v418_v24 = vsel %vm417_vm1, %v415_v20, 0.0  ;;  %v3710_v15 = vor.u32 %v4369_v13, %v3709_v12  ;;  %v4441_v20 = vld [vmem:[#allocation7 + $0x370] sm:$0xf0]  ;;  %v4043_v12 = vld [vmem:[#allocation7 + $0x39c] sm:$0xf0]  ;;  %v4034_v13 = vor.u32 %v4445_v6, %v4033_v5 }
  0xcb   : > { %v3783_v5 = vld [vmem:[#allocation7 + $0x17c] sm:$0xf0]  ;;  %v3789_v6 = vld [vmem:[#allocation7 + $0x68] sm:$0xf] }
  0xcc   : > { %v426_v26 = vsel %vm408_vm2, 0.0, %v424_v22  ;;  %1573 = vmatpush.bf16.msra.mxu0 %v3710_v15  ;;  %v4003_v22 = vld [vmem:[#allocation7 + $0x374] sm:$0xf0]  ;;  %v3749_v15 = vld [vmem:[#allocation7 + $0x40] sm:$0xf] }
  0xcf   : > { %v388_v17 = vpop.f32.mrf.mxu0 }
  0xd0   : > { %405 = vrot.lane.b32.xlu0 %v404_v16, %s5098_s29  ;;  %v3711_v16 = vld [vmem:[#allocation7 + $0x134] sm:$0xf0] }
  0xd1   : > { %v401_v18 = vpop.f32.mrf.mxu1 }
 0x13a   : > { %v420_v19 = vpop.permute.xlu0 %419 }
 0x13b   : > { %v422_v25 = vadd.f32 %v420_v19, %v418_v24  ;;  %v4001_v19 = vld [vmem:[#allocation7 + $0x258] sm:$0xf]  ;;  %v4442_v24 = vld [vmem:[#allocation7 + $0x378] sm:$0xf0] }
 0x13d   : > { %v427_v27 = vadd.f32 %v426_v26, %v422_v25  ;;  %v4407_v25 = vld [vmem:[#allocation7 + $0x264] sm:$0xf]  ;;  %v4011_v26 = vld [vmem:[#allocation7 + $0x37c] sm:$0xf0] }
 0x142   : > { %v406_v21 = vpop.permute.xlu0 %405 }
 0x143   : > { %v409_v23 = vsel %vm408_vm2, 0.0, %v406_v21  ;;  %v4406_v21 = vld [vmem:[#allocation7 + $0x25c] sm:$0xf] }
 0x144   : > { %411 = vrot.lane.b32.xlu1 %v409_v23, %s5098_s29  ;;  %v4009_v23 = vld [vmem:[#allocation7 + $0x260] sm:$0xf] }
 0x145   : > { %v4010_v33 = vor.u32 %v4442_v24, %v4009_v23  ;;  %v4340_v23 = vld [vmem:[#allocation7 + $0x4c] sm:$0xf]  ;;  %v3759_v24 = vld [vmem:[#allocation7 + $0x164] sm:$0xf0] }
 0x14c   : > { %429 = vrot.lane.b32.xlu1 %v427_v27, %s5098_s29  ;;  %s5025_s29 = sshra.s32 %s3504_s26, 4  ;;  %s5026_s29 = int_to_ptr.hbm [resolvable:$true] %s5025_s29 }
 0x14d   : > { %p5032_p7 = scmp.lt.s32.totalorder %s5026_s29, %s7094_s5 }
 0x1b6   : > { %v412_v28 = vpop.permute.xlu1 %411 }
 0x1b7   : > { %v414_v29 = vadd.f32 %v412_v28, %v386_v14  ;;  %v4334_v14 = vld [vmem:[#allocation7 + $0x1c] sm:$0xf] }
 0x1b8   : > { %v3714_v17 = vor.u32 %v4334_v14, %v3711_v16  ;;  %v4038_v14 = vor.u32 %v4410_v7, %v4035_v8  ;;  %v4374_v16 = vld [vmem:[#allocation7 + $0x158] sm:$0xf0]  ;;  %v4379_v7 = vld [vmem:[#allocation7 + $0x180] sm:$0xf0]  ;;  %v4344_v8 = vld [vmem:[#allocation7 + $0x6c] sm:$0xf] }
 0x1ba   : > { %1587 = vmatpush.bf16.msra.mxu1 %v3714_v17  ;;  %v4042_v17 = vor.u32 %v4446_v10, %v4041_v9  ;;  %v3791_v9 = vld [vmem:[#allocation7 + $0x184] sm:$0xf0] }
 0x1be   : > { %v430_v30 = vpop.permute.xlu1 %429 }
 0x1bf   : > { %v432_v31 = vpack.c.bf16 %v430_v30, %v414_v29  ;;  %v4002_v29 = vor.u32 %v4441_v20, %v4001_v19  ;;  %v4006_v30 = vor.u32 %v4406_v21, %v4003_v22  ;;  %v4339_v19 = vld [vmem:[#allocation7 + $0x44] sm:$0xf]  ;;  %v3751_v20 = vld [vmem:[#allocation7 + $0x15c] sm:$0xf0]  ;;  %v3757_v21 = vld [vmem:[#allocation7 + $0x48] sm:$0xf] }
 0x1c0   : > { %v4375_v22 = vld [vmem:[#allocation7 + $0x160] sm:$0xf0] }
 0x1c1   : > { %441 = vrot.lane.b32.xlu2 %v432_v31, %s5099_s11  ;;  %v3717_v31 = vld [vmem:[#allocation7 + $0x20] sm:$0xf]  ;;  %s5027_s11 = scalar_lea.hbm %s5026_s29, 1136 }
 0x1c2   : > { %v3718_v41 = vor.u32 %v4370_v32, %v3717_v31  ;;  %v4447_v31 = vld [vmem:[#allocation7 + $0x3a0] sm:$0xf0]  ;;  %v4412_v32 = vld [vmem:[#allocation7 + $0x28c] sm:$0xf]  ;;  %p5028_p3 = scmp.ne.s32.totalorder %s5026_s29, %s5027_s11  ;;  %p5033_p8 = scmp.lt.s32.totalorder %s5031_s13, %s5027_s11 }
 0x1c4   : > { %p5029_p5 = pnand %p5028_p3, %p5224_p4  ;;  %p5034_p9 = por %p5033_p8, %p5032_p7 }
 0x1c6   : > { %p5030_p12 = pneg %p5029_p5 }
 0x1c8   : > { %p5035_p10 = pnand %p5034_p9, %p5030_p12 }
 0x21b   : > { %v442_v35 = vpop.permute.xlu2 %441 }
 0x21c   : > { %455 = vmatpush.bf16.msra.mxu2 %v442_v35  ;;  %v4335_v35 = vld [vmem:[#allocation7 + $0x24] sm:$0xf] }
 0x21f   : > { %3682 = vmatmul.msk.bf16.vlgmr.msra.gmra.mxu2 %vm444_vm3, %v4330_v36  ;;  %v3719_v36 = vld [vmem:[#allocation7 + $0x13c] sm:$0xf0] }
 0x220   : > { %1502 = vmatpush.bf16.msrb.mxu2 %v3974_v34  ;;  %v4014_v34 = vor.u32 %v4407_v25, %v4011_v26  ;;  %v3722_v42 = vor.u32 %v4335_v35, %v3719_v36  ;;  %v3750_v25 = vor.u32 %v4374_v16, %v3749_v15  ;;  %v3754_v26 = vor.u32 %v4339_v19, %v3751_v20  ;;  %v4448_v35 = vld [vmem:[#allocation7 + $0x3a8] sm:$0xf0]  ;;  %v4413_v36 = vld [vmem:[#allocation7 + $0x294] sm:$0xf]  ;;  %v4451_v15 = vld [vmem:[#allocation7 + $0x3c0] sm:$0xf0] }
 0x221   : > { %v4416_v16 = vld [vmem:[#allocation7 + $0x2ac] sm:$0xf]  ;;  %v4417_v20 = vld [vmem:[#allocation7 + $0x2b4] sm:$0xf] }
 0x222   : > { %v4452_v19 = vld [vmem:[#allocation7 + $0x3c8] sm:$0xf0] }
 0x224   : > { %1503 = vmatpush.bf16.msrb.mxu2 %v3690_v48  ;;  %v4019_v48 = vld [vmem:[#allocation7 + $0x384] sm:$0xf0] }
 0x225   : > { %v4022_v54 = vor.u32 %v4408_v47, %v4019_v48  ;;  %v4377_v47 = vld [vmem:[#allocation7 + $0x170] sm:$0xf0]  ;;  %v4342_v48 = vld [vmem:[#allocation7 + $0x5c] sm:$0xf] }
 0x226   : > { %v3774_v52 = vor.u32 %v4377_v47, %v3773_v46  ;;  %v4107_v46 = vld [vmem:[#allocation7 + $0x3dc] sm:$0xf0] }
 0x228   : > { %1558 = vmatpush.bf16.msra.mxu2 %v3990_v1  ;;  %v3734_v1 = vor.u32 %v4372_v56, %v3733_v55  ;;  %v4449_v55 = vld [vmem:[#allocation7 + $0x3b0] sm:$0xf0]  ;;  %v4414_v56 = vld [vmem:[#allocation7 + $0x29c] sm:$0xf] }
 0x22c   : > { %1559 = vmatpush.bf16.msra.mxu2 %v3706_v11  ;;  %v4411_v11 = vld [vmem:[#allocation7 + $0x284] sm:$0xf] }
 0x2a2   : > { %v457_v18 = vpop.f32.mrf.mxu2 }
 0x2aa   : > { %v459_v27 = vpop.f32.mrf.mxu2 }
 0x2ab   : > { %v5273_v28 = vpack.c.bf16 %v459_v27, %v457_v18  ;;  %v4046_v18 = vor.u32 %v4411_v11, %v4043_v12  ;;  %v3758_v27 = vor.u32 %v4375_v22, %v3757_v21  ;;  %v3790_v12 = vor.u32 %v4379_v7, %v3789_v6  ;;  %v4091_v21 = vld [vmem:[#allocation7 + $0x3cc] sm:$0xf0] }
 0x2ac   : > { %v4123_v6 = vld [vmem:[#allocation7 + $0x3ec] sm:$0xf0] }
 0x2ad   : > { %4251 = vmatmul.msk.bf16.vlgmr.msra.gmra.mxu3 %vm373_vm0, %v5273_v28  ;;  %4252 = vmatmul.msk.bf16.vlgmr.msrb.gmra.mxu2 %vm373_vm0, %v5273_v28 }
 0x2ae   : > { %4253 = vmatmul.msk.bf16.vlgmr.msrb.gmra.mxu0 %vm373_vm0, %v5273_v28  ;;  %4254 = vmatmul.msk.bf16.vlgmr.msrb.gmra.mxu1 %vm373_vm0, %v5273_v28 }
 0x2af   : > { %1600 = vmatpush.bf16.msra.mxu3 %v4002_v29  ;;  %1614 = vmatpush.bf16.msrb.mxu2 %v4006_v30  ;;  %v3762_v29 = vor.u32 %v4340_v23, %v3759_v24  ;;  %v4049_v30 = vld [vmem:[#allocation7 + $0x288] sm:$0xf]  ;;  %v3797_v24 = vld [vmem:[#allocation7 + $0x70] sm:$0xf] }
 0x2b0   : > { %1628 = vmatpush.bf16.msrb.mxu0 %v4010_v33  ;;  %1642 = vmatpush.bf16.msrb.mxu1 %v4014_v34  ;;  %v4051_v33 = vld [vmem:[#allocation7 + $0x3a4] sm:$0xf0]  ;;  %v4057_v34 = vld [vmem:[#allocation7 + $0x290] sm:$0xf]  ;;  %v4050_v38 = vor.u32 %v4447_v31, %v4049_v30  ;;  %v3805_v31 = vld [vmem:[#allocation7 + $0x78] sm:$0xf] }
 0x2b1   : > { %v4054_v39 = vor.u32 %v4412_v32, %v4051_v33  ;;  %v3799_v30 = vld [vmem:[#allocation7 + $0x18c] sm:$0xf0]  ;;  %v4381_v32 = vld [vmem:[#allocation7 + $0x190] sm:$0xf0]  ;;  %v4346_v33 = vld [vmem:[#allocation7 + $0x7c] sm:$0xf] }
 0x2b3   : > { %1601 = vmatpush.bf16.msra.mxu3 %v3718_v41  ;;  %1615 = vmatpush.bf16.msrb.mxu2 %v3722_v42  ;;  %v4376_v41 = vld [vmem:[#allocation7 + $0x168] sm:$0xf0]  ;;  %v4058_v42 = vor.u32 %v4448_v35, %v4057_v34  ;;  %v3807_v34 = vld [vmem:[#allocation7 + $0x194] sm:$0xf0] }
 0x2b4   : > { %1629 = vmatpush.bf16.msrb.mxu0 %v3726_v43  ;;  %1643 = vmatpush.bf16.msrb.mxu1 %v3730_v44  ;;  %v4062_v43 = vor.u32 %v4413_v36, %v4059_v37  ;;  %v4341_v44 = vld [vmem:[#allocation7 + $0x54] sm:$0xf]  ;;  %v3766_v50 = vor.u32 %v4376_v41, %v3765_v40  ;;  %v3806_v37 = vor.u32 %v4381_v32, %v3805_v31  ;;  %v4418_v41 = vld [vmem:[#allocation7 + $0x2bc] sm:$0xf]  ;;  %v4139_v31 = vld [vmem:[#allocation7 + $0x3fc] sm:$0xf0] }
 0x2b5   : > { %v3770_v51 = vor.u32 %v4341_v44, %v3767_v45  ;;  %v4453_v40 = vld [vmem:[#allocation7 + $0x3d0] sm:$0xf0]  ;;  %v4454_v44 = vld [vmem:[#allocation7 + $0x3d8] sm:$0xf0]  ;;  %v4419_v45 = vld [vmem:[#allocation7 + $0x2c4] sm:$0xf] }
 0x2bd   : > { %4255 = vmatmul.msk.bf16.vlgmr.msrb.gmra.mxu3 %vm373_vm0, %v5273_v28  ;;  %4256 = vmatmul.msk.bf16.vlgmr.msra.gmra.mxu2 %vm373_vm0, %v5273_v28 }
 0x2be   : > { %4257 = vmatmul.msk.bf16.vlgmr.msra.gmra.mxu0 %vm373_vm0, %v5273_v28  ;;  %4258 = vmatmul.msk.bf16.vlgmr.msra.gmra.mxu1 %vm373_vm0, %v5273_v28 }
 0x2bf   : > { %1656 = vmatpush.bf16.msrb.mxu3 %v4018_v53  ;;  %1670 = vmatpush.bf16.msra.mxu2 %v4022_v54  ;;  %v3778_v53 = vor.u32 %v4342_v48, %v3775_v49  ;;  %v4065_v54 = vld [vmem:[#allocation7 + $0x298] sm:$0xf]  ;;  %v3813_v49 = vld [vmem:[#allocation7 + $0x80] sm:$0xf] }
 0x2c0   : > { %1684 = vmatpush.bf16.msra.mxu0 %v4026_v57  ;;  %1698 = vmatpush.bf16.msra.mxu1 %v4030_v58  ;;  %v4067_v57 = vld [vmem:[#allocation7 + $0x3b4] sm:$0xf0]  ;;  %v4073_v58 = vld [vmem:[#allocation7 + $0x2a0] sm:$0xf]  ;;  %v4066_v62 = vor.u32 %v4449_v55, %v4065_v54  ;;  %v3821_v55 = vld [vmem:[#allocation7 + $0x88] sm:$0xf] }
 0x2c1   : > { %v4070_v63 = vor.u32 %v4414_v56, %v4067_v57  ;;  %v3815_v54 = vld [vmem:[#allocation7 + $0x19c] sm:$0xf0]  ;;  %v4383_v56 = vld [vmem:[#allocation7 + $0x1a0] sm:$0xf0]  ;;  %v4348_v57 = vld [vmem:[#allocation7 + $0x8c] sm:$0xf] }
 0x2c3   : > { %1657 = vmatpush.bf16.msrb.mxu3 %v3734_v1  ;;  %1671 = vmatpush.bf16.msra.mxu2 %v3738_v2  ;;  %v4378_v1 = vld [vmem:[#allocation7 + $0x178] sm:$0xf0]  ;;  %v4074_v2 = vor.u32 %v4450_v59, %v4073_v58  ;;  %v3823_v58 = vld [vmem:[#allocation7 + $0x1a4] sm:$0xf0] }
 0x2c4   : > { %1685 = vmatpush.bf16.msra.mxu0 %v3742_v3  ;;  %1699 = vmatpush.bf16.msra.mxu1 %v3746_v4  ;;  %v4078_v3 = vor.u32 %v4415_v60, %v4075_v61  ;;  %v4343_v4 = vld [vmem:[#allocation7 + $0x64] sm:$0xf]  ;;  %v3782_v10 = vor.u32 %v4378_v1, %v3781_v0  ;;  %v3822_v61 = vor.u32 %v4383_v56, %v3821_v55  ;;  %v4420_v1 = vld [vmem:[#allocation7 + $0x2cc] sm:$0xf] }
 0x2c5   : > { %v3786_v11 = vor.u32 %v4343_v4, %v3783_v5  ;;  %v4455_v0 = vld [vmem:[#allocation7 + $0x3e0] sm:$0xf0]  ;;  %v4456_v4 = vld [vmem:[#allocation7 + $0x3e8] sm:$0xf0]  ;;  %v4421_v5 = vld [vmem:[#allocation7 + $0x2d4] sm:$0xf] }
 0x2c6   : > { %v4459_v55 = vld [vmem:[#allocation7 + $0x400] sm:$0xf0] }
 0x2cd   : > { %4259 = vmatmul.msk.bf16.vlgmr.msra.gmra.mxu3 %vm373_vm0, %v5273_v28  ;;  %4260 = vmatmul.msk.bf16.vlgmr.msrb.gmra.mxu2 %vm373_vm0, %v5273_v28 }
 0x2ce   : > { %4261 = vmatmul.msk.bf16.vlgmr.msrb.gmra.mxu0 %vm373_vm0, %v5273_v28  ;;  %4262 = vmatmul.msk.bf16.vlgmr.msrb.gmra.mxu1 %vm373_vm0, %v5273_v28 }
 0x2cf   : > { %1712 = vmatpush.bf16.msra.mxu3 %v4034_v13  ;;  %1726 = vmatpush.bf16.msrb.mxu2 %v4038_v14  ;;  %v3794_v13 = vor.u32 %v4344_v8, %v3791_v9  ;;  %v4081_v14 = vld [vmem:[#allocation7 + $0x2a8] sm:$0xf]  ;;  %v3829_v9 = vld [vmem:[#allocation7 + $0x90] sm:$0xf] }
 0x2d0   : > { %1740 = vmatpush.bf16.msrb.mxu0 %v4042_v17  ;;  %1754 = vmatpush.bf16.msrb.mxu1 %v4046_v18  ;;  %v4083_v17 = vld [vmem:[#allocation7 + $0x3c4] sm:$0xf0]  ;;  %v4089_v18 = vld [vmem:[#allocation7 + $0x2b0] sm:$0xf]  ;;  %v4082_v22 = vor.u32 %v4451_v15, %v4081_v14  ;;  %v3837_v15 = vld [vmem:[#allocation7 + $0x98] sm:$0xf] }
 0x2d1   : > { %v4086_v23 = vor.u32 %v4416_v16, %v4083_v17  ;;  %v3831_v14 = vld [vmem:[#allocation7 + $0x1ac] sm:$0xf0]  ;;  %v4385_v16 = vld [vmem:[#allocation7 + $0x1b0] sm:$0xf0]  ;;  %v4350_v17 = vld [vmem:[#allocation7 + $0x9c] sm:$0xf] }
 0x2d3   : > { %1713 = vmatpush.bf16.msra.mxu3 %v3750_v25  ;;  %1727 = vmatpush.bf16.msrb.mxu2 %v3754_v26  ;;  %v4380_v25 = vld [vmem:[#allocation7 + $0x188] sm:$0xf0]  ;;  %v4090_v26 = vor.u32 %v4452_v19, %v4089_v18  ;;  %v3839_v18 = vld [vmem:[#allocation7 + $0x1b4] sm:$0xf0] }
 0x2d4   : > { %1741 = vmatpush.bf16.msrb.mxu0 %v3758_v27  ;;  %1755 = vmatpush.bf16.msrb.mxu1 %v3762_v29  ;;  %v4094_v27 = vor.u32 %v4417_v20, %v4091_v21  ;;  %v4345_v29 = vld [vmem:[#allocation7 + $0x74] sm:$0xf]  ;;  %v3798_v35 = vor.u32 %v4380_v25, %v3797_v24  ;;  %v3838_v21 = vor.u32 %v4385_v16, %v3837_v15  ;;  %v4422_v25 = vld [vmem:[#allocation7 + $0x2dc] sm:$0xf] }
 0x2d5   : > { %v3802_v36 = vor.u32 %v4345_v29, %v3799_v30  ;;  %v4457_v24 = vld [vmem:[#allocation7 + $0x3f0] sm:$0xf0]  ;;  %v4458_v29 = vld [vmem:[#allocation7 + $0x3f8] sm:$0xf0]  ;;  %v4423_v30 = vld [vmem:[#allocation7 + $0x2e4] sm:$0xf] }
 0x2dd   : > { %4263 = vmatmul.msk.bf16.vlgmr.msrb.gmra.mxu3 %vm373_vm0, %v5273_v28  ;;  %4264 = vmatmul.msk.bf16.vlgmr.msra.gmra.mxu2 %vm373_vm0, %v5273_v28 }
 0x2de   : > { %4265 = vmatmul.msk.bf16.vlgmr.msra.gmra.mxu0 %vm373_vm0, %v5273_v28  ;;  %4266 = vmatmul.msk.bf16.vlgmr.msra.gmra.mxu1 %vm373_vm0, %v5273_v28 }
 0x2df   : > { %1768 = vmatpush.bf16.msrb.mxu3 %v4050_v38  ;;  %1782 = vmatpush.bf16.msra.mxu2 %v4054_v39  ;;  %v3810_v38 = vor.u32 %v4346_v33, %v3807_v34  ;;  %v4097_v39 = vld [vmem:[#allocation7 + $0x2b8] sm:$0xf] }
 0x2e0   : > { %1796 = vmatpush.bf16.msra.mxu0 %v4058_v42  ;;  %1810 = vmatpush.bf16.msra.mxu1 %v4062_v43  ;;  %v4099_v42 = vld [vmem:[#allocation7 + $0x3d4] sm:$0xf0]  ;;  %v4105_v43 = vld [vmem:[#allocation7 + $0x2c0] sm:$0xf]  ;;  %v4098_v47 = vor.u32 %v4453_v40, %v4097_v39  ;;  %v4142_v39 = vor.u32 %v4423_v30, %v4139_v31  ;;  %v4351_v40 = vld [vmem:[#allocation7 + $0xa4] sm:$0xf] }
 0x2e1   : > { %v4102_v48 = vor.u32 %v4418_v41, %v4099_v42  ;;  %v3847_v41 = vld [vmem:[#allocation7 + $0x1bc] sm:$0xf0]  ;;  %v3853_v42 = vld [vmem:[#allocation7 + $0xa8] sm:$0xf]  ;;  %v4462_v30 = vld [vmem:[#allocation7 + $0x418] sm:$0xf0] }
 0x2e2   : > { %v4427_v31 = vld [vmem:[#allocation7 + $0x304] sm:$0xf] }
 0x2e3   : > { %1769 = vmatpush.bf16.msrb.mxu3 %v3766_v50  ;;  %1783 = vmatpush.bf16.msra.mxu2 %v3770_v51  ;;  %v4382_v50 = vld [vmem:[#allocation7 + $0x198] sm:$0xf0]  ;;  %v4106_v51 = vor.u32 %v4454_v44, %v4105_v43  ;;  %v4387_v43 = vld [vmem:[#allocation7 + $0x1c0] sm:$0xf0]  ;;  %v4352_v44 = vld [vmem:[#allocation7 + $0xac] sm:$0xf] }
 0x2e4   : > { %1797 = vmatpush.bf16.msra.mxu0 %v3774_v52  ;;  %1811 = vmatpush.bf16.msra.mxu1 %v3778_v53  ;;  %v4110_v52 = vor.u32 %v4419_v45, %v4107_v46  ;;  %v4347_v53 = vld [vmem:[#allocation7 + $0x84] sm:$0xf]  ;;  %v3814_v59 = vor.u32 %v4382_v50, %v3813_v49  ;;  %v3855_v45 = vld [vmem:[#allocation7 + $0x1c4] sm:$0xf0]  ;;  %v3854_v50 = vor.u32 %v4387_v43, %v3853_v42 }
 0x2e5   : > { %v3818_v60 = vor.u32 %v4347_v53, %v3815_v54  ;;  %v4145_v54 = vld [vmem:[#allocation7 + $0x2e8] sm:$0xf]  ;;  %v4355_v43 = vld [vmem:[#allocation7 + $0xc4] sm:$0xf] }
 0x2ed   : > { %4267 = vmatmul.msk.bf16.vlgmr.msra.gmra.mxu3 %vm373_vm0, %v5273_v28  ;;  %4268 = vmatmul.msk.bf16.vlgmr.msrb.gmra.mxu2 %vm373_vm0, %v5273_v28 }
 0x2ee   : > { %4269 = vmatmul.msk.bf16.vlgmr.msrb.gmra.mxu0 %vm373_vm0, %v5273_v28  ;;  %4270 = vmatmul.msk.bf16.vlgmr.msrb.gmra.mxu1 %vm373_vm0, %v5273_v28 }
 0x2ef   : > { %1824 = vmatpush.bf16.msra.mxu3 %v4066_v62  ;;  %1838 = vmatpush.bf16.msrb.mxu2 %v4070_v63  ;;  %v3826_v62 = vor.u32 %v4348_v57, %v3823_v58  ;;  %v4113_v63 = vld [vmem:[#allocation7 + $0x2c8] sm:$0xf]  ;;  %v4424_v58 = vld [vmem:[#allocation7 + $0x2ec] sm:$0xf] }
 0x2f0   : > { %1852 = vmatpush.bf16.msrb.mxu0 %v4074_v2  ;;  %1866 = vmatpush.bf16.msrb.mxu1 %v4078_v3  ;;  %v4115_v2 = vld [vmem:[#allocation7 + $0x3e4] sm:$0xf0]  ;;  %v4121_v3 = vld [vmem:[#allocation7 + $0x2d0] sm:$0xf]  ;;  %v4114_v7 = vor.u32 %v4455_v0, %v4113_v63 }
 0x2f1   : > { %v4118_v8 = vor.u32 %v4420_v1, %v4115_v2  ;;  %v4155_v63 = vld [vmem:[#allocation7 + $0x40c] sm:$0xf0]  ;;  %v4146_v2 = vor.u32 %v4459_v55, %v4145_v54 }
 0x2f3   : > { %1825 = vmatpush.bf16.msra.mxu3 %v3782_v10  ;;  %1839 = vmatpush.bf16.msrb.mxu2 %v3786_v11  ;;  %v4384_v10 = vld [vmem:[#allocation7 + $0x1a8] sm:$0xf0]  ;;  %v4122_v11 = vor.u32 %v4456_v4, %v4121_v3  ;;  %v3861_v4 = vld [vmem:[#allocation7 + $0xb0] sm:$0xf] }
 0x2f4   : > { %1853 = vmatpush.bf16.msrb.mxu0 %v3790_v12  ;;  %1867 = vmatpush.bf16.msrb.mxu1 %v3794_v13  ;;  %v4126_v12 = vor.u32 %v4421_v5, %v4123_v6  ;;  %v4349_v13 = vld [vmem:[#allocation7 + $0x94] sm:$0xf]  ;;  %v3830_v19 = vor.u32 %v4384_v10, %v3829_v9  ;;  %v4388_v5 = vld [vmem:[#allocation7 + $0x1c8] sm:$0xf0]  ;;  %v3863_v9 = vld [vmem:[#allocation7 + $0x1cc] sm:$0xf0] }
 0x2f5   : > { %v3834_v20 = vor.u32 %v4349_v13, %v3831_v14  ;;  %v3869_v10 = vld [vmem:[#allocation7 + $0xb8] sm:$0xf]  ;;  %v3862_v14 = vor.u32 %v4388_v5, %v3861_v4  ;;  %v4428_v5 = vld [vmem:[#allocation7 + $0x30c] sm:$0xf] }
 0x2f6   : > { %v3871_v13 = vld [vmem:[#allocation7 + $0x1d4] sm:$0xf0] }
 0x2fd   : > { %4271 = vmatmul.msk.bf16.vlgmr.msrb.gmra.mxu3 %vm373_vm0, %v5273_v28  ;;  %4272 = vmatmul.msk.bf16.vlgmr.msra.gmra.mxu2 %vm373_vm0, %v5273_v28 }
 0x2fe   : > { %4273 = vmatmul.msk.bf16.vlgmr.msra.gmra.mxu0 %vm373_vm0, %v5273_v28  ;;  %4274 = vmatmul.msk.bf16.vlgmr.msra.gmra.mxu1 %vm373_vm0, %v5273_v28 }
 0x2ff   : > { %1880 = vmatpush.bf16.msrb.mxu3 %v4082_v22  ;;  %1894 = vmatpush.bf16.msra.mxu2 %v4086_v23  ;;  %v3842_v22 = vor.u32 %v4350_v17, %v3839_v18  ;;  %v4129_v23 = vld [vmem:[#allocation7 + $0x2d8] sm:$0xf] }
 0x300   : > { %1908 = vmatpush.bf16.msra.mxu0 %v4090_v26  ;;  %1922 = vmatpush.bf16.msra.mxu1 %v4094_v27  ;;  %v4131_v26 = vld [vmem:[#allocation7 + $0x3f4] sm:$0xf0]  ;;  %v4137_v27 = vld [vmem:[#allocation7 + $0x2e0] sm:$0xf]  ;;  %v4130_v34 = vor.u32 %v4457_v24, %v4129_v23  ;;  %v4461_v23 = vld [vmem:[#allocation7 + $0x410] sm:$0xf0] }
 0x303   : > { %1881 = vmatpush.bf16.msrb.mxu3 %v3798_v35  ;;  %1895 = vmatpush.bf16.msra.mxu2 %v3802_v36  ;;  %v4134_v35 = vor.u32 %v4422_v25, %v4131_v26  ;;  %v3845_v36 = vld [vmem:[#allocation7 + $0xa0] sm:$0xf]  ;;  %v4426_v26 = vld [vmem:[#allocation7 + $0x2fc] sm:$0xf] }
 0x304   : > { %1909 = vmatpush.bf16.msra.mxu0 %v3806_v37  ;;  %1923 = vmatpush.bf16.msra.mxu1 %v3810_v38  ;;  %v4386_v37 = vld [vmem:[#allocation7 + $0x1b8] sm:$0xf0]  ;;  %v4138_v38 = vor.u32 %v4458_v29, %v4137_v27  ;;  %v4163_v27 = vld [vmem:[#allocation7 + $0x414] sm:$0xf0]  ;;  %v4169_v29 = vld [vmem:[#allocation7 + $0x300] sm:$0xf] }
 0x305   : > { %v3846_v46 = vor.u32 %v4386_v37, %v3845_v36 }
 0x30d   : > { %4275 = vmatmul.msk.bf16.vlgmr.msra.gmra.mxu3 %vm373_vm0, %v5273_v28  ;;  %4276 = vmatmul.msk.bf16.vlgmr.msrb.gmra.mxu2 %vm373_vm0, %v5273_v28 }
 0x30e   : > { %4277 = vmatmul.msk.bf16.vlgmr.msrb.gmra.mxu0 %vm373_vm0, %v5273_v28  ;;  %4278 = vmatmul.msk.bf16.vlgmr.msrb.gmra.mxu1 %vm373_vm0, %v5273_v28 }
 0x30f   : > { %1936 = vmatpush.bf16.msra.mxu3 %v4098_v47  ;;  %1950 = vmatpush.bf16.msrb.mxu2 %v4102_v48  ;;  %v3850_v47 = vor.u32 %v4351_v40, %v3847_v41  ;;  %v4390_v40 = vld [vmem:[#allocation7 + $0x1d8] sm:$0xf0]  ;;  %v4170_v41 = vor.u32 %v4462_v30, %v4169_v29  ;;  %v4393_v29 = vld [vmem:[#allocation7 + $0x1f0] sm:$0xf0] }
 0x310   : > { %1964 = vmatpush.bf16.msrb.mxu0 %v4106_v51  ;;  %1978 = vmatpush.bf16.msrb.mxu1 %v4110_v52  ;;  %v3858_v51 = vor.u32 %v4352_v44, %v3855_v45  ;;  %v3879_v44 = vld [vmem:[#allocation7 + $0x1dc] sm:$0xf0]  ;;  %v3885_v45 = vld [vmem:[#allocation7 + $0xc8] sm:$0xf]  ;;  %v4358_v30 = vld [vmem:[#allocation7 + $0xdc] sm:$0xf] }
 0x311   : > { %v3882_v54 = vor.u32 %v4355_v43, %v3879_v44  ;;  %v4193_v44 = vld [vmem:[#allocation7 + $0x318] sm:$0xf] }
 0x313   : > { %1937 = vmatpush.bf16.msra.mxu3 %v3814_v59  ;;  %1951 = vmatpush.bf16.msrb.mxu2 %v3818_v60  ;;  %v4147_v59 = vld [vmem:[#allocation7 + $0x404] sm:$0xf0]  ;;  %v4153_v60 = vld [vmem:[#allocation7 + $0x2f0] sm:$0xf] }
 0x314   : > { %1965 = vmatpush.bf16.msrb.mxu0 %v3822_v61  ;;  %1979 = vmatpush.bf16.msrb.mxu1 %v3826_v62  ;;  %v4460_v61 = vld [vmem:[#allocation7 + $0x408] sm:$0xf0]  ;;  %v4425_v62 = vld [vmem:[#allocation7 + $0x2f4] sm:$0xf]  ;;  %v4150_v3 = vor.u32 %v4424_v58, %v4147_v59 }
 0x315   : > { %v4154_v6 = vor.u32 %v4460_v61, %v4153_v60 }
 0x31d   : > { %4279 = vmatmul.msk.bf16.vlgmr.msrb.gmra.mxu3 %vm373_vm0, %v5273_v28  ;;  %4280 = vmatmul.msk.bf16.vlgmr.msra.gmra.mxu2 %vm373_vm0, %v5273_v28 }
 0x31e   : > { %4281 = vmatmul.msk.bf16.vlgmr.msra.gmra.mxu0 %vm373_vm0, %v5273_v28  ;;  %4282 = vmatmul.msk.bf16.vlgmr.msra.gmra.mxu1 %vm373_vm0, %v5273_v28 }
 0x31f   : > { %1992 = vmatpush.bf16.msrb.mxu3 %v4114_v7  ;;  %2006 = vmatpush.bf16.msra.mxu2 %v4118_v8  ;;  %v4158_v7 = vor.u32 %v4425_v62, %v4155_v63  ;;  %v4353_v8 = vld [vmem:[#allocation7 + $0xb4] sm:$0xf]  ;;  %v4177_v63 = vld [vmem:[#allocation7 + $0x308] sm:$0xf] }
 0x320   : > { %2020 = vmatpush.bf16.msra.mxu0 %v4122_v11  ;;  %2034 = vmatpush.bf16.msra.mxu1 %v4126_v12  ;;  %v4389_v11 = vld [vmem:[#allocation7 + $0x1d0] sm:$0xf0]  ;;  %v4354_v12 = vld [vmem:[#allocation7 + $0xbc] sm:$0xf]  ;;  %v3866_v15 = vor.u32 %v4353_v8, %v3863_v9  ;;  %v4464_v8 = vld [vmem:[#allocation7 + $0x428] sm:$0xf0] }
 0x321   : > { %v3870_v18 = vor.u32 %v4389_v11, %v3869_v10  ;;  %v4429_v9 = vld [vmem:[#allocation7 + $0x314] sm:$0xf]  ;;  %v4187_v10 = vld [vmem:[#allocation7 + $0x42c] sm:$0xf0] }
 0x323   : > { %1993 = vmatpush.bf16.msrb.mxu3 %v3830_v19  ;;  %2007 = vmatpush.bf16.msra.mxu2 %v3834_v20  ;;  %v3874_v19 = vor.u32 %v4354_v12, %v3871_v13 }
 0x324   : > { %2021 = vmatpush.bf16.msra.mxu0 %v3838_v21  ;;  %2035 = vmatpush.bf16.msra.mxu1 %v3842_v22  ;;  %v4161_v22 = vld [vmem:[#allocation7 + $0x2f8] sm:$0xf] }
 0x325   : > { %v4162_v37 = vor.u32 %v4461_v23, %v4161_v22  ;;  %v4190_v22 = vor.u32 %v4429_v9, %v4187_v10  ;;  %v4357_v23 = vld [vmem:[#allocation7 + $0xd4] sm:$0xf]  ;;  %v4394_v9 = vld [vmem:[#allocation7 + $0x1f8] sm:$0xf0] }
 0x32b   : > { %v5339_v32 = vpop.f32.mrf.mxu0  ;;  %v5341_v33 = vpop.f32.mrf.mxu1 }
 0x32d   : > { %4283 = vmatmul.msk.bf16.vlgmr.msra.gmra.mxu3 %vm373_vm0, %v5273_v28  ;;  %4284 = vmatmul.msk.bf16.vlgmr.msrb.gmra.mxu2 %vm373_vm0, %v5273_v28 }
 0x32e   : > { %4285 = vmatmul.msk.bf16.vlgmr.msrb.gmra.mxu0 %vm373_vm0, %v5273_v28  ;;  %4286 = vmatmul.msk.bf16.vlgmr.msrb.gmra.mxu1 %vm373_vm0, %v5273_v28 }
 0x32f   : > { %2048 = vmatpush.bf16.msra.mxu3 %v4130_v34  ;;  %2062 = vmatpush.bf16.msrb.mxu2 %v4134_v35  ;;  %v4171_v34 = vld [vmem:[#allocation7 + $0x41c] sm:$0xf0] }
 0x330   : > { %v5351_v48 = vpop.f32.mrf.mxu3  ;;  %v5353_v49 = vpop.f32.mrf.mxu2  ;;  %2076 = vmatpush.bf16.msrb.mxu0 %v4138_v38  ;;  %2090 = vmatpush.bf16.msrb.mxu1 %v4142_v39  ;;  %v4166_v38 = vor.u32 %v4426_v26, %v4163_v27  ;;  %v3877_v39 = vld [vmem:[#allocation7 + $0xc0] sm:$0xf]  ;;  %v4174_v42 = vor.u32 %v4427_v31, %v4171_v34  ;;  %v3895_v26 = vld [vmem:[#allocation7 + $0x1ec] sm:$0xf0]  ;;  %v3901_v27 = vld [vmem:[#allocation7 + $0xd8] sm:$0xf] }
 0x331   : > { %v3903_v31 = vld [vmem:[#allocation7 + $0x1f4] sm:$0xf0] }
 0x333   : > { %v5355_v52 = vpop.f32.mrf.mxu0  ;;  %v5357_v53 = vpop.f32.mrf.mxu1  ;;  %2049 = vmatpush.bf16.msra.mxu3 %v3846_v46  ;;  %2063 = vmatpush.bf16.msrb.mxu2 %v3850_v47  ;;  %v4391_v46 = vld [vmem:[#allocation7 + $0x1e0] sm:$0xf0]  ;;  %v4356_v47 = vld [vmem:[#allocation7 + $0xcc] sm:$0xf] }
 0x334   : > { %2077 = vmatpush.bf16.msrb.mxu0 %v3854_v50  ;;  %2091 = vmatpush.bf16.msrb.mxu1 %v3858_v51  ;;  %v3887_v50 = vld [vmem:[#allocation7 + $0x1e4] sm:$0xf0]  ;;  %v3878_v51 = vor.u32 %v4390_v40, %v3877_v39  ;;  %v3886_v59 = vor.u32 %v4391_v46, %v3885_v45  ;;  %v3902_v40 = vor.u32 %v4393_v29, %v3901_v27  ;;  %v4465_v45 = vld [vmem:[#allocation7 + $0x430] sm:$0xf0] }
 0x335   : > { %v3890_v60 = vor.u32 %v4356_v47, %v3887_v50  ;;  %v4430_v50 = vld [vmem:[#allocation7 + $0x31c] sm:$0xf] }
 0x338   : > { %v5359_v56 = vpop.f32.mrf.mxu3  ;;  %v5361_v57 = vpop.f32.mrf.mxu2 }
 0x33b   : > { %v5363_v0 = vpop.f32.mrf.mxu0  ;;  %v5365_v1 = vpop.f32.mrf.mxu1 }
 0x33d   : > { %4287 = vmatmul.msk.bf16.vlgmr.msrb.gmra.mxu3 %vm373_vm0, %v5273_v28  ;;  %4288 = vmatmul.msk.bf16.vlgmr.msra.gmra.mxu2 %vm373_vm0, %v5273_v28 }
 0x33e   : > { %4289 = vmatmul.msk.bf16.vlgmr.msra.gmra.mxu0 %vm373_vm0, %v5273_v28  ;;  %4290 = vmatmul.msk.bf16.vlgmr.msra.gmra.mxu1 %vm373_vm0, %v5273_v28 }
 0x33f   : > { %2104 = vmatpush.bf16.msrb.mxu3 %v4146_v2  ;;  %2118 = vmatpush.bf16.msra.mxu2 %v4150_v3  ;;  %v4463_v2 = vld [vmem:[#allocation7 + $0x420] sm:$0xf0] }
 0x340   : > { %v5375_v16 = vpop.f32.mrf.mxu3  ;;  %v5377_v17 = vpop.f32.mrf.mxu2  ;;  %2132 = vmatpush.bf16.msra.mxu0 %v4154_v6  ;;  %2146 = vmatpush.bf16.msra.mxu1 %v4158_v7  ;;  %v4179_v6 = vld [vmem:[#allocation7 + $0x424] sm:$0xf0]  ;;  %v4185_v7 = vld [vmem:[#allocation7 + $0x310] sm:$0xf]  ;;  %v4178_v13 = vor.u32 %v4463_v2, %v4177_v63  ;;  %v4203_v63 = vld [vmem:[#allocation7 + $0x43c] sm:$0xf0] }
 0x343   : > { %v5379_v20 = vpop.f32.mrf.mxu0  ;;  %v5381_v21 = vpop.f32.mrf.mxu1  ;;  %2105 = vmatpush.bf16.msrb.mxu3 %v3862_v14  ;;  %2119 = vmatpush.bf16.msra.mxu2 %v3866_v15  ;;  %v4182_v14 = vor.u32 %v4428_v5, %v4179_v6  ;;  %v3893_v15 = vld [vmem:[#allocation7 + $0xd0] sm:$0xf]  ;;  %v4194_v6 = vor.u32 %v4465_v45, %v4193_v44  ;;  %v4467_v44 = vld [vmem:[#allocation7 + $0x440] sm:$0xf0] }
 0x344   : > { %2133 = vmatpush.bf16.msra.mxu0 %v3870_v18  ;;  %2147 = vmatpush.bf16.msra.mxu1 %v3874_v19  ;;  %v4392_v18 = vld [vmem:[#allocation7 + $0x1e8] sm:$0xf0]  ;;  %v4186_v19 = vor.u32 %v4464_v8, %v4185_v7  ;;  %v3909_v8 = vld [vmem:[#allocation7 + $0xe0] sm:$0xf] }
 0x345   : > { %v3894_v34 = vor.u32 %v4392_v18, %v3893_v15  ;;  %v3911_v15 = vld [vmem:[#allocation7 + $0x1fc] sm:$0xf0]  ;;  %v3917_v18 = vld [vmem:[#allocation7 + $0xe8] sm:$0xf] }
 0x348   : > { %v5383_v24 = vpop.f32.mrf.mxu3  ;;  %v5385_v25 = vpop.f32.mrf.mxu2 }
 0x34b   : > { %v5387_v35 = vpop.f32.mrf.mxu0  ;;  %v5389_v36 = vpop.f32.mrf.mxu1 }
 0x34d   : > { %4291 = vmatmul.msk.bf16.vlgmr.msra.gmra.mxu3 %vm373_vm0, %v5273_v28  ;;  %4292 = vmatmul.msk.bf16.vlgmr.msrb.gmra.mxu2 %vm373_vm0, %v5273_v28 }
 0x34e   : > { %4293 = vmatmul.msk.bf16.vlgmr.msrb.gmra.mxu0 %vm373_vm0, %v5273_v28  ;;  %4294 = vmatmul.msk.bf16.vlgmr.msrb.gmra.mxu1 %vm373_vm0, %v5273_v28 }
 0x34f   : > { %2160 = vmatpush.bf16.msra.mxu3 %v4162_v37  ;;  %2174 = vmatpush.bf16.msrb.mxu2 %v4166_v38  ;;  %v3898_v37 = vor.u32 %v4357_v23, %v3895_v26  ;;  %v3919_v23 = vld [vmem:[#allocation7 + $0x204] sm:$0xf0]  ;;  %v3910_v26 = vor.u32 %v4394_v9, %v3909_v8 }
 0x350   : > { %v5399_v55 = vpop.f32.mrf.mxu3  ;;  %v5401_v58 = vpop.f32.mrf.mxu2  ;;  %2188 = vmatpush.bf16.msrb.mxu0 %v4170_v41  ;;  %2202 = vmatpush.bf16.msrb.mxu1 %v4174_v42  ;;  %v3906_v41 = vor.u32 %v4358_v30, %v3903_v31 }
 0x353   : > { %v5403_v61 = vpop.f32.mrf.mxu0  ;;  %v5405_v62 = vpop.f32.mrf.mxu1  ;;  %2161 = vmatpush.bf16.msra.mxu3 %v3878_v51  ;;  %2175 = vmatpush.bf16.msrb.mxu2 %v3882_v54  ;;  %v4195_v51 = vld [vmem:[#allocation7 + $0x434] sm:$0xf0]  ;;  %v4201_v54 = vld [vmem:[#allocation7 + $0x320] sm:$0xf] }
 0x354   : > { %2189 = vmatpush.bf16.msrb.mxu0 %v3886_v59  ;;  %2203 = vmatpush.bf16.msrb.mxu1 %v3890_v60  ;;  %v4466_v59 = vld [vmem:[#allocation7 + $0x438] sm:$0xf0]  ;;  %v4431_v60 = vld [vmem:[#allocation7 + $0x324] sm:$0xf]  ;;  %v4198_v7 = vor.u32 %v4430_v50, %v4195_v51  ;;  %v4432_v51 = vld [vmem:[#allocation7 + $0x32c] sm:$0xf] }
 0x355   : > { %v4202_v10 = vor.u32 %v4466_v59, %v4201_v54  ;;  %v4211_v54 = vld [vmem:[#allocation7 + $0x444] sm:$0xf0]  ;;  %v4217_v59 = vld [vmem:[#allocation7 + $0x330] sm:$0xf] }
 0x358   : > { %v5407_v3 = vpop.f32.mrf.mxu3  ;;  %v5409_v4 = vpop.f32.mrf.mxu2 }
 0x35b   : > { %v5411_v11 = vpop.f32.mrf.mxu0  ;;  %v5413_v12 = vpop.f32.mrf.mxu1 }
 0x35d   : > { %4295 = vmatmul.msk.bf16.vlgmr.msrb.gmra.mxu3 %vm373_vm0, %v5273_v28  ;;  %4296 = vmatmul.msk.bf16.vlgmr.msra.gmra.mxu2 %vm373_vm0, %v5273_v28 }
 0x35e   : > { %4297 = vmatmul.msk.bf16.vlgmr.msra.gmra.mxu0 %vm373_vm0, %v5273_v28  ;;  %4298 = vmatmul.msk.bf16.vlgmr.msra.gmra.mxu1 %vm373_vm0, %v5273_v28 }
 0x35f   : > { %2216 = vmatpush.bf16.msrb.mxu3 %v4178_v13  ;;  %2230 = vmatpush.bf16.msra.mxu2 %v4182_v14  ;;  %v4206_v13 = vor.u32 %v4431_v60, %v4203_v63  ;;  %v4359_v14 = vld [vmem:[#allocation7 + $0xe4] sm:$0xf]  ;;  %v4468_v60 = vld [vmem:[#allocation7 + $0x448] sm:$0xf0]  ;;  %v4433_v63 = vld [vmem:[#allocation7 + $0x334] sm:$0xf] }
 0x360   : > { %v5423_v38 = vpop.f32.mrf.mxu3  ;;  %v5425_v39 = vpop.f32.mrf.mxu2  ;;  %2244 = vmatpush.bf16.msra.mxu0 %v4186_v19  ;;  %2258 = vmatpush.bf16.msra.mxu1 %v4190_v22  ;;  %v4395_v19 = vld [vmem:[#allocation7 + $0x200] sm:$0xf0]  ;;  %v4360_v22 = vld [vmem:[#allocation7 + $0xec] sm:$0xf]  ;;  %v3914_v27 = vor.u32 %v4359_v14, %v3911_v15  ;;  %v4218_v15 = vor.u32 %v4468_v60, %v4217_v59 }
 0x361   : > { %v3918_v31 = vor.u32 %v4395_v19, %v3917_v18  ;;  %v4396_v14 = vld [vmem:[#allocation7 + $0x208] sm:$0xf0]  ;;  %v4361_v19 = vld [vmem:[#allocation7 + $0xf4] sm:$0xf] }
 0x363   : > { %v5427_v42 = vpop.f32.mrf.mxu0  ;;  %v5429_v43 = vpop.f32.mrf.mxu1  ;;  %2217 = vmatpush.bf16.msrb.mxu3 %v3894_v34  ;;  %2231 = vmatpush.bf16.msra.mxu2 %v3898_v37  ;;  %v3922_v34 = vor.u32 %v4360_v22, %v3919_v23  ;;  %v3927_v22 = vld [vmem:[#allocation7 + $0x20c] sm:$0xf0]  ;;  %v3933_v23 = vld [vmem:[#allocation7 + $0xf8] sm:$0xf] }
 0x364   : > { %2245 = vmatpush.bf16.msra.mxu0 %v3902_v40  ;;  %2259 = vmatpush.bf16.msra.mxu1 %v3906_v41  ;;  %v4209_v41 = vld [vmem:[#allocation7 + $0x328] sm:$0xf] }
 0x365   : > { %v4210_v9 = vor.u32 %v4467_v44, %v4209_v41  ;;  %v3930_v41 = vor.u32 %v4361_v19, %v3927_v22  ;;  %v4227_v19 = vld [vmem:[#allocation7 + $0x454] sm:$0xf0]  ;;  %v4435_v22 = vld [vmem:[#allocation7 + $0x344] sm:$0xf] }
 0x368   : > { %v5431_v46 = vpop.f32.mrf.mxu3  ;;  %v5433_v47 = vpop.f32.mrf.mxu2 }
 0x36b   : > { %v5435_v2 = vpop.f32.mrf.mxu0  ;;  %v5437_v5 = vpop.f32.mrf.mxu1 }
 0x36d   : > { %4299 = vmatmul.msk.bf16.vlgmr.msra.gmra.mxu3 %vm373_vm0, %v5273_v28  ;;  %4300 = vmatmul.msk.bf16.vlgmr.msrb.gmra.mxu2 %vm373_vm0, %v5273_v28 }
 0x36e   : > { %4301 = vmatmul.msk.bf16.vlgmr.msrb.gmra.mxu0 %vm373_vm0, %v5273_v28  ;;  %4302 = vmatmul.msk.bf16.vlgmr.msrb.gmra.mxu1 %vm373_vm0, %v5273_v28 }
 0x36f   : > { %2272 = vmatpush.bf16.msra.mxu3 %v4194_v6  ;;  %2286 = vmatpush.bf16.msrb.mxu2 %v4198_v7  ;;  %v4219_v6 = vld [vmem:[#allocation7 + $0x44c] sm:$0xf0] }
 0x370   : > { %v5447_v29 = vpop.f32.mrf.mxu3  ;;  %v5449_v30 = vpop.f32.mrf.mxu2  ;;  %2300 = vmatpush.bf16.msrb.mxu0 %v4202_v10  ;;  %2314 = vmatpush.bf16.msrb.mxu1 %v4206_v13  ;;  %v4214_v10 = vor.u32 %v4432_v51, %v4211_v54  ;;  %v3925_v13 = vld [vmem:[#allocation7 + $0xf0] sm:$0xf]  ;;  %v4222_v18 = vor.u32 %v4433_v63, %v4219_v6  ;;  %v4225_v6 = vld [vmem:[#allocation7 + $0x338] sm:$0xf] }
 0x373   : > { %v5451_v37 = vpop.f32.mrf.mxu0  ;;  %v5453_v40 = vpop.f32.mrf.mxu1  ;;  %2273 = vmatpush.bf16.msra.mxu3 %v3910_v26  ;;  %2287 = vmatpush.bf16.msrb.mxu2 %v3914_v27  ;;  %v4397_v26 = vld [vmem:[#allocation7 + $0x210] sm:$0xf0]  ;;  %v4362_v27 = vld [vmem:[#allocation7 + $0xfc] sm:$0xf] }
 0x374   : > { %7320 = vst [vmem:[#allocation16_spill] sm:$0xff] %v5453_v40  ;;  %2301 = vmatpush.bf16.msrb.mxu0 %v3918_v31  ;;  %2315 = vmatpush.bf16.msrb.mxu1 %v3922_v34  ;;  %v3935_v31 = vld [vmem:[#allocation7 + $0x214] sm:$0xf0]  ;;  %v3926_v34 = vor.u32 %v4396_v14, %v3925_v13  ;;  %v3934_v54 = vor.u32 %v4397_v26, %v3933_v23  ;;  %v4434_v14 = vld [vmem:[#allocation7 + $0x33c] sm:$0xf] }
 0x375   : > { %v3938_v59 = vor.u32 %v4362_v27, %v3935_v31  ;;  %v4235_v23 = vld [vmem:[#allocation7 + $0x45c] sm:$0xf0] }
 0x376   : > { %v3943_v40 = vld [vmem:[#allocation7 + $0x21c] sm:$0xf0] }
 0x378   : > { %v5455_v45 = vpop.f32.mrf.mxu3  ;;  %v5457_v50 = vpop.f32.mrf.mxu2 }
 0x37b   : > { %v5459_v7 = vpop.f32.mrf.mxu0  ;;  %v5461_v8 = vpop.f32.mrf.mxu1 }
 0x37c   : > { %7321 = vst [vmem:[#allocation17_spill] sm:$0xff] %v5461_v8  ;;  %v3949_v8 = vld [vmem:[#allocation7 + $0x108] sm:$0xf] }
 0x37d   : > { %4303 = vmatmul.msk.bf16.vlgmr.msrb.gmra.mxu3 %vm373_vm0, %v5273_v28  ;;  %4304 = vmatmul.msk.bf16.vlgmr.msra.gmra.mxu2 %vm373_vm0, %v5273_v28 }
 0x37e   : > { %4305 = vmatmul.msk.bf16.vlgmr.msra.gmra.mxu0 %vm373_vm0, %v5273_v28  ;;  %4306 = vmatmul.msk.bf16.vlgmr.msra.gmra.mxu1 %vm373_vm0, %v5273_v28 }
 0x37f   : > { %2328 = vmatpush.bf16.msrb.mxu3 %v4210_v9  ;;  %2342 = vmatpush.bf16.msra.mxu2 %v4214_v10  ;;  %v4469_v9 = vld [vmem:[#allocation7 + $0x450] sm:$0xf0] }
 0x380   : > { %v5471_v44 = vpop.f32.mrf.mxu3  ;;  %v5473_v51 = vpop.f32.mrf.mxu2  ;;  %2356 = vmatpush.bf16.msra.mxu0 %v4218_v15  ;;  %2370 = vmatpush.bf16.msra.mxu1 %v4222_v18  ;;  %v4233_v15 = vld [vmem:[#allocation7 + $0x340] sm:$0xf]  ;;  %v4470_v18 = vld [vmem:[#allocation7 + $0x458] sm:$0xf0]  ;;  %v4226_v31 = vor.u32 %v4469_v9, %v4225_v6 }
 0x383   : > { %v5475_v60 = vpop.f32.mrf.mxu0  ;;  %v5477_v63 = vpop.f32.mrf.mxu1  ;;  %2329 = vmatpush.bf16.msrb.mxu3 %v3926_v34  ;;  %2343 = vmatpush.bf16.msra.mxu2 %v3930_v41  ;;  %v4230_v34 = vor.u32 %v4434_v14, %v4227_v19  ;;  %v3941_v41 = vld [vmem:[#allocation7 + $0x100] sm:$0xf] }
 0x384   : > { %7322 = vst [vmem:[#allocation18_spill] sm:$0xff] %v5475_v60  ;;  %2357 = vmatpush.bf16.msra.mxu0 %v3934_v54  ;;  %2371 = vmatpush.bf16.msra.mxu1 %v3938_v59  ;;  %v4398_v54 = vld [vmem:[#allocation7 + $0x218] sm:$0xf0]  ;;  %v4234_v59 = vor.u32 %v4470_v18, %v4233_v15  ;;  %v4363_v60 = vld [vmem:[#allocation7 + $0x104] sm:$0xf] }
 0x385   : > { %7323 = vst [vmem:[#allocation19_spill] sm:$0xff] %v5477_v63  ;;  %v4238_v63 = vor.u32 %v4435_v22, %v4235_v23  ;;  %v3942_v6 = vor.u32 %v4398_v54, %v3941_v41  ;;  %v3946_v9 = vor.u32 %v4363_v60, %v3943_v40  ;;  %v4471_v60 = vld [vmem:[#allocation7 + $0x460] sm:$0xf0]  ;;  %v4436_v41 = vld [vmem:[#allocation7 + $0x34c] sm:$0xf] }
 0x386   : > { %v4243_v54 = vld [vmem:[#allocation7 + $0x464] sm:$0xf0] }
 0x388   : > { %v5479_v10 = vpop.f32.mrf.mxu3  ;;  %v5481_v13 = vpop.f32.mrf.mxu2 }
 0x389   : > { %7324 = vst [vmem:[#allocation20_spill] sm:$0xff] %v5479_v10  ;;  %v4364_v10 = vld [vmem:[#allocation7 + $0x10c] sm:$0xf] }
 0x38a   : > { %7325 = vst [vmem:[#allocation21_spill] sm:$0xff] %v5481_v13  ;;  %v4399_v13 = vld [vmem:[#allocation7 + $0x220] sm:$0xf0] }
 0x38b   : > { %v5483_v26 = vpop.f32.mrf.mxu0  ;;  %v5485_v27 = vpop.f32.mrf.mxu1  ;;  %v3950_v15 = vor.u32 %v4399_v13, %v3949_v8 }
 0x38c   : > { %7326 = vst [vmem:[#allocation22_spill] sm:$0xff] %v5483_v26  ;;  %v3951_v26 = vld [vmem:[#allocation7 + $0x224] sm:$0xf0] }
 0x38d   : > { %7327 = vst [vmem:[#allocation23_spill] sm:$0xff] %v5485_v27  ;;  %4307 = vmatmul.msk.bf16.vlgmr.msra.gmra.mxu3 %vm373_vm0, %v5273_v28  ;;  %4308 = vmatmul.msk.bf16.vlgmr.msrb.gmra.mxu2 %vm373_vm0, %v5273_v28  ;;  %v3954_v18 = vor.u32 %v4364_v10, %v3951_v26  ;;  %v4246_v26 = vor.u32 %v4436_v41, %v4243_v54 }
 0x38e   : > { %4309 = vmatmul.msk.bf16.vlgmr.msrb.gmra.mxu0 %vm373_vm0, %v5273_v28  ;;  %4310 = vmatmul.msk.bf16.vlgmr.msrb.gmra.mxu1 %vm373_vm0, %v5273_v28 }
 0x38f   : > { %2384 = vmatpush.bf16.msra.mxu3 %v4226_v31  ;;  %2398 = vmatpush.bf16.msrb.mxu2 %v4230_v34  ;;  %v4241_v31 = vld [vmem:[#allocation7 + $0x348] sm:$0xf] }
 0x390   : > { %v5495_v14 = vpop.f32.mrf.mxu3  ;;  %v5497_v19 = vpop.f32.mrf.mxu2  ;;  %2412 = vmatpush.bf16.msrb.mxu0 %v4234_v59  ;;  %2426 = vmatpush.bf16.msrb.mxu1 %v4238_v63  ;;  %v4249_v59 = vld [vmem:[#allocation7 + $0x350] sm:$0xf]  ;;  %v4472_v63 = vld [vmem:[#allocation7 + $0x468] sm:$0xf0]  ;;  %v4242_v13 = vor.u32 %v4471_v60, %v4241_v31 }
 0x393   : > { %v5499_v22 = vpop.f32.mrf.mxu0  ;;  %v5501_v23 = vpop.f32.mrf.mxu1  ;;  %2385 = vmatpush.bf16.msra.mxu3 %v3942_v6  ;;  %2399 = vmatpush.bf16.msrb.mxu2 %v3946_v9  ;;  %v3957_v6 = vld [vmem:[#allocation7 + $0x110] sm:$0xf]  ;;  %v4400_v9 = vld [vmem:[#allocation7 + $0x228] sm:$0xf0] }
 0x394   : > { %7328 = vst [vmem:[#allocation24_spill] sm:$0xff] %v5499_v22  ;;  %2413 = vmatpush.bf16.msrb.mxu0 %v3950_v15  ;;  %2427 = vmatpush.bf16.msrb.mxu1 %v3954_v18  ;;  %v4250_v15 = vor.u32 %v4472_v63, %v4249_v59  ;;  %v4365_v18 = vld [vmem:[#allocation7 + $0x114] sm:$0xf]  ;;  %v3965_v22 = vld [vmem:[#allocation7 + $0x118] sm:$0xf]  ;;  %v3958_v31 = vor.u32 %v4400_v9, %v3957_v6 }
 0x395   : > { %7329 = vst [vmem:[#allocation25_spill] sm:$0xff] %v5501_v23  ;;  %v3959_v23 = vld [vmem:[#allocation7 + $0x22c] sm:$0xf0] }
 0x396   : > { %v3962_v60 = vor.u32 %v4365_v18, %v3959_v23 }
 0x398   : > { %v5503_v34 = vpop.f32.mrf.mxu3  ;;  %v5505_v40 = vpop.f32.mrf.mxu2 }
 0x399   : > { %7330 = vst [vmem:[#allocation26_spill] sm:$0xff] %v5505_v40  ;;  %v4401_v40 = vld [vmem:[#allocation7 + $0x230] sm:$0xf0] }
 0x39a   : > { %v3966_v59 = vor.u32 %v4401_v40, %v3965_v22 }
 0x39b   : > { %v5507_v8 = vpop.f32.mrf.mxu0  ;;  %v5509_v10 = vpop.f32.mrf.mxu1 }
 0x39c   : > { %7331 = vst [vmem:[#allocation27_spill] sm:$0xff] %v5507_v8 }
 0x39d   : > { %7332 = vst [vmem:[#allocation28_spill] sm:$0xff] %v5509_v10  ;;  %4311 = vmatmul.msk.bf16.vlgmr.msrb.gmra.mxu3 %vm373_vm0, %v5273_v28  ;;  %4312 = vmatmul.msk.bf16.vlgmr.msra.gmra.mxu2 %vm373_vm0, %v5273_v28 }
 0x39e   : > { %4313 = vmatmul.msk.bf16.vlgmr.msra.gmra.mxu0 %vm373_vm0, %v5273_v28  ;;  %4314 = vmatmul.msk.bf16.vlgmr.msra.gmra.mxu1 %vm373_vm0, %v5273_v28 }
 0x39f   : > { %2440 = vmatpush.bf16.msrb.mxu3 %v4242_v13  ;;  %2454 = vmatpush.bf16.msra.mxu2 %v4246_v26 }
 0x3a0   : > { %v5519_v41 = vpop.f32.mrf.mxu3  ;;  %v5521_v54 = vpop.f32.mrf.mxu2  ;;  %2468 = vmatpush.bf16.msra.mxu0 %v4250_v15 }
 0x3a1   : > { %7333 = vst [vmem:[#allocation29_spill] sm:$0xff] %v5521_v54 }
 0x3a3   : > { %v5523_v63 = vpop.f32.mrf.mxu0  ;;  %v5525_v10 = vpop.f32.mrf.mxu1  ;;  %2441 = vmatpush.bf16.msrb.mxu3 %v3958_v31  ;;  %2455 = vmatpush.bf16.msra.mxu2 %v3962_v60 }
 0x3a4   : > { %7334 = vst [vmem:[#allocation30_spill] sm:$0xff] %v5523_v63  ;;  %2469 = vmatpush.bf16.msra.mxu0 %v3966_v59 }
 0x3a5   : > { %7335 = vst [vmem:[#allocation31_spill] sm:$0xff] %v5525_v10 }
 0x3a8   : > { %v5527_v8 = vpop.f32.mrf.mxu3  ;;  %v5529_v27 = vpop.f32.mrf.mxu2 }
 0x3a9   : > { %7336 = vst [vmem:[#allocation32_spill] sm:$0xff] %v5527_v8 }
 0x3aa   : > { %7337 = vst [vmem:[#allocation33_spill] sm:$0xff] %v5529_v27  ;;  %v5618_v27 = vld [vmem:[#allocation8 + $0x8] sm:$0xff] }
 0x3ab   : > { %v5531_v13 = vpop.f32.mrf.mxu0  ;;  %v5533_v23 = vpop.f32.mrf.mxu1 }
 0x3ac   : > { %7338 = vst [vmem:[#allocation34_spill] sm:$0xff] %v5531_v13 }
 0x3ad   : > { %7339 = vst [vmem:[#allocation35_spill] sm:$0xff] %v5533_v23  ;;  %4315 = vmatmul.msk.bf16.vlgmr.msra.gmra.mxu3 %vm373_vm0, %v5273_v28  ;;  %4316 = vmatmul.msk.bf16.vlgmr.msrb.gmra.mxu2 %vm373_vm0, %v5273_v28 }
 0x3ae   : > { %4317 = vmatmul.msk.bf16.vlgmr.msrb.gmra.mxu0 %vm373_vm0, %v5273_v28  ;;  %4318 = vmatmul.msk.bf16.vlgmr.msrb.gmra.mxu1 %vm373_vm0, %v5273_v28 }
 0x3b0   : > { %v5543_v22 = vpop.f32.mrf.mxu3  ;;  %v5545_v40 = vpop.f32.mrf.mxu2 }
 0x3b1   : > { %7340 = vst [vmem:[#allocation36_spill] sm:$0xff] %v5543_v22 }
 0x3b2   : > { %7341 = vst [vmem:[#allocation37_spill] sm:$0xff] %v5545_v40 }
 0x3b3   : > { %v5547_v26 = vpop.f32.mrf.mxu0  ;;  %v5549_v6 = vpop.f32.mrf.mxu1 }
 0x3b4   : > { %7342 = vst [vmem:[#allocation38_spill] sm:$0xff] %v5547_v26 }
 0x3b5   : > { %7343 = vst [vmem:[#allocation39_spill] sm:$0xff] %v5549_v6 }
 0x3b8   : > { %v5551_v9 = vpop.f32.mrf.mxu3  ;;  %v5553_v15 = vpop.f32.mrf.mxu2 }
 0x3b9   : > { %7344 = vst [vmem:[#allocation40_spill] sm:$0xff] %v5551_v9 }
 0x3ba   : > { %7345 = vst [vmem:[#allocation41_spill] sm:$0xff] %v5553_v15 }
 0x3bb   : > { %v5555_v18 = vpop.f32.mrf.mxu0  ;;  %v5557_v31 = vpop.f32.mrf.mxu1 }
 0x3bc   : > { %7346 = vst [vmem:[#allocation42_spill] sm:$0xff] %v5555_v18 }
 0x3bd   : > { %7347 = vst [vmem:[#allocation43_spill] sm:$0xff] %v5557_v31  ;;  %4319 = vmatmul.msk.bf16.vlgmr.msrb.gmra.mxu3 %vm373_vm0, %v5273_v28  ;;  %4320 = vmatmul.msk.bf16.vlgmr.msra.gmra.mxu2 %vm373_vm0, %v5273_v28 }
 0x3be   : > { %4321 = vmatmul.msk.bf16.vlgmr.msra.gmra.mxu0 %vm373_vm0, %v5273_v28 }
 0x3c0   : > { %v5565_v60 = vpop.f32.mrf.mxu3  ;;  %v5567_v59 = vpop.f32.mrf.mxu2 }
 0x3c1   : > { %7348 = vst [vmem:[#allocation44_spill] sm:$0xff] %v5565_v60 }
 0x3c2   : > { %7349 = vst [vmem:[#allocation45_spill] sm:$0xff] %v5567_v59  ;;  %v5589_v59 = vld [vmem:[#allocation8] sm:$0xff] }
 0x3c3   : > { %v5569_v6 = vpop.f32.mrf.mxu0  ;;  %v5571_v26 = vpop.f32.mrf.mxu1  ;;  %v632_v22 = vperm.slane %v5589_v59, 7 }
 0x3c4   : > { %7350 = vst [vmem:[#allocation46_spill] sm:$0xff] %v5569_v6 }
 0x3c5   : > { %7351 = vst [vmem:[#allocation47_spill] sm:$0xff] %v5571_v26 }
 0x3c8   : > { %v5573_v18 = vpop.f32.mrf.mxu3  ;;  %v5575_v31 = vpop.f32.mrf.mxu2 }
 0x3c9   : > { %7352 = vst [vmem:[#allocation48_spill] sm:$0xff] %v5573_v18  ;;  %v629_v18 = vperm.slane %v5589_v59, 4 }
 0x3ca   : > { %7353 = vst [vmem:[#allocation49_spill] sm:$0xff] %v5575_v31  ;;  %v625_v31 = vperm.slane %v5589_v59, 0 }
 0x3cb   : > { %v5577_v15 = vpop.f32.mrf.mxu0  ;;  %v5579_v10 = vpop.f32.mrf.mxu1  ;;  %v5615_v13 = vadd.f32 %v5375_v16, %v629_v18  ;;  %v633_v16 = vperm.slane %v5618_v27, 0 }
 0x3cc   : > { %7354 = vst [vmem:[#allocation50_spill] sm:$0xff] %v5577_v15  ;;  %v627_v15 = vperm.slane %v5589_v59, 2 }
 0x3cd   : > { %7355 = vst [vmem:[#allocation51_spill] sm:$0xff] %v5579_v10  ;;  %v626_v10 = vperm.slane %v5589_v59, 1 }
 0x3ce   : > { %7367 = vst [vmem:[#allocation63_spill] sm:$0xff] %v5615_v13 }
 0x3cf   : > { %v5612_v60 = vadd.f32 %v5353_v49, %v626_v10 }
 0x3d0   : > { %v5581_v23 = vpop.f32.mrf.mxu3  ;;  %v5583_v9 = vpop.f32.mrf.mxu2 }
 0x3d1   : > { %7356 = vst [vmem:[#allocation52_spill] sm:$0xff] %v5581_v23 }
 0x3d2   : > { %7357 = vst [vmem:[#allocation53_spill] sm:$0xff] %v5583_v9 }
 0x3d3   : > { %v5585_v28 = vpop.f32.mrf.mxu0  ;;  %v5587_v63 = vpop.f32.mrf.mxu1  ;;  %7366 = vst [vmem:[#allocation62_spill] sm:$0xff] %v5612_v60 }
 0x3d4   : > { %7358 = vst [vmem:[#allocation54_spill] sm:$0xff] %v5585_v28  ;;  %v5605_v28 = vadd.f32 %v5351_v48, %v625_v31 }
 0x3d5   : > { %7359 = vst [vmem:[#allocation55_spill] sm:$0xff] %v5587_v63  ;;  %v628_v63 = vperm.slane %v5589_v59, 3 }
 0x3d6   : > { %7364 = vst [vmem:[#allocation60_spill] sm:$0xff] %v5605_v28 }
 0x3d7   : > { %v5625_v48 = vadd.f32 %v5341_v33, %v628_v63 }
 0x3d8   : > { %v5591_v6 = vpop.f32.mrf.mxu3  ;;  %v5593_v26 = vpop.f32.mrf.mxu2 }
 0x3d9   : > { %7360 = vst [vmem:[#allocation56_spill] sm:$0xff] %v5591_v6  ;;  %v630_v6 = vperm.slane %v5589_v59, 5  ;;  %v2477_v8 = vmax.f32 %v5612_v60, %v5625_v48 }
 0x3da   : > { %7361 = vst [vmem:[#allocation57_spill] sm:$0xff] %v5593_v26  ;;  %v5609_v26 = vadd.f32 %v5339_v32, %v627_v15 }
 0x3db   : > { %v5599_v23 = vpop.f32.mrf.mxu0  ;;  %v5601_v9 = vpop.f32.mrf.mxu1  ;;  %7370 = vst [vmem:[#allocation66_spill] sm:$0xff] %v5625_v48  ;;  %v5630_v49 = vadd.f32 %v5377_v17, %v630_v6  ;;  %v5650_v48 = vadd.f32 %v5399_v55, %v633_v16  ;;  %v637_v55 = vperm.slane %v5618_v27, 4 }
 0x3dc   : > { %7362 = vst [vmem:[#allocation58_spill] sm:$0xff] %v5599_v23  ;;  %v631_v23 = vperm.slane %v5589_v59, 6  ;;  %v2476_v32 = vmax.f32 %v5605_v28, %v5609_v26  ;;  %v5653_v59 = vadd.f32 %v5355_v52, %v627_v15  ;;  %v5671_v52 = vadd.f32 %v5357_v53, %v628_v63 }
 0x3dd   : > { %7363 = vst [vmem:[#allocation59_spill] sm:$0xff] %v5601_v9  ;;  %v2479_v28 = vmax.f32 %v2477_v8, %v5630_v49 }
 0x3de   : > { %7365 = vst [vmem:[#allocation61_spill] sm:$0xff] %v5609_v26  ;;  %v5643_v26 = vadd.f32 %v5359_v56, %v625_v31  ;;  %v5646_v17 = vadd.f32 %v5363_v0, %v631_v23  ;;  %v635_v56 = vperm.slane %v5618_v27, 2  ;;  %v5663_v31 = vadd.f32 %v5365_v1, %v632_v22 }
 0x3df   : > { %7371 = vst [vmem:[#allocation67_spill] sm:$0xff] %v5630_v49 }
 0x3e0   : > { %v5620_v9 = vpop.f32.mrf.mxu3  ;;  %v5622_v40 = vpop.f32.mrf.mxu2  ;;  %7372 = vst [vmem:[#allocation68_spill] sm:$0xff] %v5643_v26  ;;  %v2481_v15 = vmax.f32 %v2479_v28, %v5663_v31  ;;  %v5701_v28 = vadd.f32 %v5379_v20, %v631_v23  ;;  %v5719_v23 = vadd.f32 %v5381_v21, %v632_v22 }
 0x3e1   : > { %7368 = vst [vmem:[#allocation64_spill] sm:$0xff] %v5620_v9  ;;  %v2478_v9 = vmax.f32 %v2476_v32, %v5615_v13  ;;  %v5656_v32 = vadd.f32 %v5361_v57, %v626_v10  ;;  %v5659_v13 = vadd.f32 %v5383_v24, %v629_v18  ;;  %v2548_v57 = vmax.f32 %v5643_v26, %v5653_v59 }
 0x3e2   : > { %7369 = vst [vmem:[#allocation65_spill] sm:$0xff] %v5622_v40  ;;  %v634_v40 = vperm.slane %v5618_v27, 1  ;;  %v5676_v24 = vadd.f32 %v5385_v25, %v630_v6  ;;  %v638_v18 = vperm.slane %v5618_v27, 5  ;;  %v5690_v25 = vadd.f32 %v5387_v35, %v635_v56 }
 0x3e3   : > { %v5638_v54 = vpop.f32.mrf.mxu0  ;;  %v5640_v33 = vpop.f32.mrf.mxu1  ;;  %7373 = vst [vmem:[#allocation69_spill] sm:$0xff] %v5646_v17  ;;  %v2480_v0 = vmax.f32 %v2478_v9, %v5646_v17  ;;  %v636_v9 = vperm.slane %v5618_v27, 3  ;;  %v2549_v53 = vmax.f32 %v5656_v32, %v5671_v52  ;;  %v2550_v63 = vmax.f32 %v2548_v57, %v5659_v13  ;;  %v5708_v57 = vld [vmem:[#allocation8 + $0x10] sm:$0xff] }
 0x3e4   : > { %7374 = vst [vmem:[#allocation70_spill] sm:$0xff] %v5650_v48  ;;  %v5667_v8 = vadd.f32 %v5401_v58, %v634_v40  ;;  %v639_v35 = vperm.slane %v5618_v27, 6  ;;  %v641_v20 = vperm.slane %v5708_v57, 0 }
 0x3e5   : > { %7375 = vst [vmem:[#allocation71_spill] sm:$0xff] %v5653_v59  ;;  %v2482_v58 = vmax.f32 %v2480_v0, %v5650_v48  ;;  %v5694_v59 = vadd.f32 %v5423_v38, %v637_v55  ;;  %v2551_v48 = vmax.f32 %v2549_v53, %v5676_v24  ;;  %v640_v53 = vperm.slane %v5618_v27, 7 }
 0x3e6   : > { %7376 = vst [vmem:[#allocation72_spill] sm:$0xff] %v5656_v32  ;;  %v2483_v6 = vmax.f32 %v2481_v15, %v5667_v8  ;;  %v5711_v15 = vadd.f32 %v5389_v36, %v636_v9  ;;  %v5736_v22 = vadd.f32 %v5411_v11, %v639_v35  ;;  %v5740_v27 = vadd.f32 %v5447_v29, %v641_v20 }
 0x3e7   : > { %7377 = vst [vmem:[#allocation73_spill] sm:$0xff] %v5659_v13  ;;  %v2484_v38 = vmax.f32 %v2482_v58, %v5690_v25  ;;  %v5715_v13 = vadd.f32 %v5425_v39, %v638_v18  ;;  %v642_v58 = vperm.slane %v5708_v57, 1  ;;  %v2553_v32 = vmax.f32 %v2551_v48, %v5719_v23 }
 0x3e8   : > { %7378 = vst [vmem:[#allocation74_spill] sm:$0xff] %v5663_v31  ;;  %v5678_v10 = vpop.f32.mrf.mxu3  ;;  %v5680_v1 = vpop.f32.mrf.mxu2  ;;  %v643_v48 = vperm.slane %v5708_v57, 2  ;;  %v645_v29 = vperm.slane %v5708_v57, 4 }
 0x3e9   : > { %7379 = vst [vmem:[#allocation75_spill] sm:$0xff] %v5667_v8  ;;  %v2486_v36 = vmax.f32 %v2484_v38, %v5694_v59  ;;  %v5751_v38 = vadd.f32 %v5413_v12, %v640_v53  ;;  %v644_v12 = vperm.slane %v5708_v57, 3 }
 0x3ea   : > { %7380 = vst [vmem:[#allocation76_spill] sm:$0xff] %v5671_v52  ;;  %v5705_v52 = vadd.f32 %v5407_v3, %v633_v16  ;;  %v2552_v3 = vmax.f32 %v2550_v63, %v5701_v28  ;;  %v5723_v16 = vadd.f32 %v5409_v4, %v634_v40  ;;  %v5743_v40 = vadd.f32 %v5403_v61, %v635_v56 }
 0x3eb   : > { %7381 = vst [vmem:[#allocation77_spill] sm:$0xff] %v5676_v24  ;;  %v5696_v26 = vpop.f32.mrf.mxu0  ;;  %v5698_v0 = vpop.f32.mrf.mxu1  ;;  %v2485_v24 = vmax.f32 %v2483_v6, %v5711_v15  ;;  %v5747_v6 = vadd.f32 %v5431_v46, %v637_v55  ;;  %v2488_v11 = vmax.f32 %v2486_v36, %v5736_v22  ;;  %v5761_v61 = vadd.f32 %v5405_v62, %v636_v9 }
 0x3ec   : > { %7382 = vst [vmem:[#allocation78_spill] sm:$0xff] %v5690_v25  ;;  %v2554_v39 = vmax.f32 %v2552_v3, %v5705_v52  ;;  %v2555_v63 = vmax.f32 %v2553_v32, %v5723_v16  ;;  %v5765_v32 = vadd.f32 %v5433_v47, %v638_v18  ;;  %v5776_v9 = vadd.f32 %v5435_v2, %v643_v48 }
 0x3ed   : > { %7383 = vst [vmem:[#allocation79_spill] sm:$0xff] %v5694_v59  ;;  %v2487_v4 = vmax.f32 %v2485_v24, %v5715_v13  ;;  %v5755_v24 = vadd.f32 %v5449_v30, %v642_v58  ;;  %v2490_v56 = vmax.f32 %v2488_v11, %v5740_v27  ;;  %v646_v30 = vperm.slane %v5708_v57, 5 }
 0x3ee   : > { %7384 = vst [vmem:[#allocation80_spill] sm:$0xff] %v5701_v28  ;;  %v2556_v46 = vmax.f32 %v2554_v39, %v5743_v40  ;;  %v2557_v62 = vmax.f32 %v2555_v63, %v5761_v61  ;;  %v5780_v18 = vadd.f32 %v5471_v44, %v645_v29  ;;  %v5783_v39 = vadd.f32 %v5427_v42, %v639_v35  ;;  %v7421_v28 = vld [vmem:[#allocation18_spill] sm:$0xff] }
 0x3ef   : > { %7385 = vst [vmem:[#allocation81_spill] sm:$0xff] %v5705_v52  ;;  %v2489_v55 = vmax.f32 %v2487_v4, %v5751_v38  ;;  %v5787_v11 = vadd.f32 %v5455_v45, %v641_v20  ;;  %v2492_v44 = vmax.f32 %v2490_v56, %v5776_v9  ;;  %v5801_v42 = vadd.f32 %v5473_v51, %v646_v30 }
 0x3f0   : > { %7386 = vst [vmem:[#allocation82_spill] sm:$0xff] %v5711_v15  ;;  %v5731_v25 = vpop.f32.mrf.mxu3  ;;  %v5733_v21 = vpop.f32.mrf.mxu2  ;;  %v2559_v4 = vmax.f32 %v2557_v62, %v5765_v32  ;;  %v5805_v45 = vadd.f32 %v5429_v43, %v640_v53  ;;  %v5809_v62 = vadd.f32 %v5457_v50, %v642_v58 }
 0x3f1   : > { %7387 = vst [vmem:[#allocation83_spill] sm:$0xff] %v5715_v13  ;;  %v2491_v47 = vmax.f32 %v2489_v55, %v5755_v24  ;;  %v5797_v55 = vadd.f32 %v5437_v5, %v644_v12  ;;  %v2494_v5 = vmax.f32 %v2492_v44, %v5780_v18  ;;  %v7484_v13 = vld [vmem:[#allocation46_spill] sm:$0xff] }
 0x3f2   : > { %7388 = vst [vmem:[#allocation84_spill] sm:$0xff] %v5719_v23  ;;  %v2561_v43 = vmax.f32 %v2559_v4, %v5805_v45 }
 0x3f3   : > { %7389 = vst [vmem:[#allocation85_spill] sm:$0xff] %v5723_v16  ;;  %v5758_v3 = vpop.f32.mrf.mxu0  ;;  %v5771_v36 = vpop.f32.mrf.mxu1  ;;  %v2558_v16 = vmax.f32 %v2556_v46, %v5747_v6  ;;  %v647_v46 = vperm.slane %v5708_v57, 6 }
 0x3f4   : > { %7390 = vst [vmem:[#allocation86_spill] sm:$0xff] %v5736_v22  ;;  %v2563_v58 = vmax.f32 %v2561_v43, %v5809_v62  ;;  %v7416_v43 = vld [vmem:[#allocation21_spill] sm:$0xff] }
 0x3f5   : > { %7391 = vst [vmem:[#allocation87_spill] sm:$0xff] %v5740_v27  ;;  %v2560_v20 = vmax.f32 %v2558_v16, %v5783_v39  ;;  %v5820_v53 = vadd.f32 %v5459_v7, %v647_v46 }
 0x3f6   : > { %7392 = vst [vmem:[#allocation88_spill] sm:$0xff] %v5743_v40 }
 0x3f7   : > { %7393 = vst [vmem:[#allocation89_spill] sm:$0xff] %v5747_v6  ;;  %v5790_v6 = vld [vmem:[#allocation8 + $0x18] sm:$0xff]  ;;  %v2562_v40 = vmax.f32 %v2560_v20, %v5787_v11  ;;  %v2496_v7 = vmax.f32 %v2494_v5, %v5820_v53 }
 0x3f8   : > { %7394 = vst [vmem:[#allocation90_spill] sm:$0xff] %v5751_v38  ;;  %v5792_v63 = vpop.f32.mrf.mxu3  ;;  %v5794_v2 = vpop.f32.mrf.mxu2  ;;  %v649_v35 = vperm.slane %v5790_v6, 0  ;;  %v650_v56 = vperm.slane %v5790_v6, 1  ;;  %v651_v20 = vperm.slane %v5790_v6, 2  ;;  %v652_v5 = vperm.slane %v5790_v6, 3 }
 0x3f9   : > { %7395 = vst [vmem:[#allocation91_spill] sm:$0xff] %v5755_v24  ;;  %v654_v52 = vperm.slane %v5790_v6, 5 }
 0x3fa   : > { %7396 = vst [vmem:[#allocation92_spill] sm:$0xff] %v5761_v61  ;;  %v2493_v61 = vmax.f32 %v2491_v47, %v5797_v55  ;;  %v5824_v16 = vadd.f32 %v5495_v14, %v649_v35  ;;  %v7409_v47 = vld [vmem:[#allocation20_spill] sm:$0xff]  ;;  %v653_v14 = vperm.slane %v5790_v6, 4 }
 0x3fb   : > { %7397 = vst [vmem:[#allocation93_spill] sm:$0xff] %v5765_v32  ;;  %v648_v32 = vperm.slane %v5708_v57, 7  ;;  %v5815_v51 = vpop.f32.mrf.mxu0  ;;  %v5827_v57 = vadd.f32 %v5451_v37, %v643_v48  ;;  %v5831_v44 = vadd.f32 %v7409_v47, %v645_v29  ;;  %v7414_v37 = vld [vmem:[#allocation16_spill] sm:$0xff]  ;;  %v5849_v47 = vadd.f32 %v7416_v43, %v646_v30 }
 0x3fc   : > { %7398 = vst [vmem:[#allocation94_spill] sm:$0xff] %v5776_v9  ;;  %v2495_v50 = vmax.f32 %v2493_v61, %v5801_v42  ;;  %v5839_v61 = vadd.f32 %v5497_v19, %v650_v56  ;;  %v5845_v48 = vadd.f32 %v7414_v37, %v644_v12  ;;  %v2498_v19 = vmax.f32 %v2496_v7, %v5824_v16 }
 0x3fd   : > { %7399 = vst [vmem:[#allocation95_spill] sm:$0xff] %v5780_v18  ;;  %v2564_v29 = vmax.f32 %v2562_v40, %v5827_v57  ;;  %v7418_v40 = vld [vmem:[#allocation22_spill] sm:$0xff]  ;;  %v5866_v43 = vadd.f32 %v5519_v41, %v653_v14  ;;  %v5871_v7 = vadd.f32 %v7421_v28, %v647_v46  ;;  %v7428_v46 = vld [vmem:[#allocation19_spill] sm:$0xff] }
 0x3fe   : > { %7400 = vst [vmem:[#allocation96_spill] sm:$0xff] %v5783_v39  ;;  %v2565_v37 = vmax.f32 %v2563_v58, %v5845_v48  ;;  %v655_v58 = vperm.slane %v5790_v6, 6 }
 0x3ff   : > { %7401 = vst [vmem:[#allocation97_spill] sm:$0xff] %v5787_v11  ;;  %v7411_v11 = vld [vmem:[#allocation17_spill] sm:$0xff]  ;;  %v2566_v12 = vmax.f32 %v2564_v29, %v5831_v44  ;;  %v5878_v29 = vld [vmem:[#allocation8 + $0x20] sm:$0xff] }
 0x400   : > { %7402 = vst [vmem:[#allocation98_spill] sm:$0xff] %v5797_v55  ;;  %v5835_v4 = vadd.f32 %v7411_v11, %v648_v32  ;;  %v5853_v11 = vpop.f32.mrf.mxu2  ;;  %v657_v28 = vperm.slane %v5878_v29, 0  ;;  %v7448_v55 = vld [vmem:[#allocation34_spill] sm:$0xff]  ;;  %v664_v9 = vperm.slane %v5878_v29, 7 }
 0x401   : > { %7403 = vst [vmem:[#allocation99_spill] sm:$0xff] %v5801_v42 }
 0x402   : > { %7404 = vst [vmem:[#allocation100_spill] sm:$0xff] %v5805_v45  ;;  %v5842_v45 = vpop.f32.mrf.mxu1  ;;  %v2497_v39 = vmax.f32 %v2495_v50, %v5835_v4  ;;  %v2567_v50 = vmax.f32 %v2565_v37, %v5849_v47 }
 0x403   : > { %7405 = vst [vmem:[#allocation101_spill] sm:$0xff] %v5809_v62  ;;  %v5851_v62 = vpop.f32.mrf.mxu3  ;;  %v5868_v23 = vpop.f32.mrf.mxu0 }
 0x404   : > { %7406 = vst [vmem:[#allocation102_spill] sm:$0xff] %v5820_v53  ;;  %v2499_v30 = vmax.f32 %v2497_v39, %v5839_v61  ;;  %v7426_v39 = vld [vmem:[#allocation29_spill] sm:$0xff] }
 0x405   : > { %7407 = vst [vmem:[#allocation103_spill] sm:$0xff] %v5824_v16  ;;  %v5875_v16 = vadd.f32 %v5503_v34, %v649_v35  ;;  %v2568_v34 = vmax.f32 %v2566_v12, %v5871_v7  ;;  %v7430_v35 = vld [vmem:[#allocation26_spill] sm:$0xff]  ;;  %v7432_v12 = vld [vmem:[#allocation27_spill] sm:$0xff] }
 0x406   : > { %7408 = vst [vmem:[#allocation104_spill] sm:$0xff] %v5827_v57  ;;  %v5862_v57 = vadd.f32 %v7418_v40, %v651_v20  ;;  %v7424_v40 = vld [vmem:[#allocation23_spill] sm:$0xff]  ;;  %v5893_v37 = vadd.f32 %v7430_v35, %v650_v56 }
 0x407   : > { %7410 = vst [vmem:[#allocation20_spill] sm:$0xff] %v5831_v44  ;;  %v5881_v44 = vadd.f32 %v7424_v40, %v652_v5 }
 0x408   : > { %7412 = vst [vmem:[#allocation17_spill] sm:$0xff] %v5835_v4  ;;  %v2500_v41 = vmax.f32 %v2498_v19, %v5862_v57  ;;  %v658_v19 = vperm.slane %v5878_v29, 1 }
 0x409   : > { %7413 = vst [vmem:[#allocation105_spill] sm:$0xff] %v5839_v61  ;;  %v5889_v61 = vadd.f32 %v7428_v46, %v648_v32  ;;  %v2501_v4 = vmax.f32 %v2499_v30, %v5881_v44  ;;  %v5903_v32 = vpop.f32.mrf.mxu2  ;;  %v5906_v46 = vadd.f32 %v7432_v12, %v655_v58  ;;  %v7436_v30 = vld [vmem:[#allocation24_spill] sm:$0xff] }
 0x40a   : > { %7415 = vst [vmem:[#allocation16_spill] sm:$0xff] %v5845_v48  ;;  %v5885_v48 = vadd.f32 %v7426_v39, %v654_v52  ;;  %v2502_v40 = vmax.f32 %v2500_v41, %v5866_v43  ;;  %v2570_v39 = vmax.f32 %v2568_v34, %v5875_v16  ;;  %v5912_v41 = vpop.f32.mrf.mxu1 }
 0x40b   : > { %7417 = vst [vmem:[#allocation21_spill] sm:$0xff] %v5849_v47  ;;  %v656_v47 = vperm.slane %v5790_v6, 7  ;;  %v5901_v53 = vpop.f32.mrf.mxu3  ;;  %v7434_v6 = vld [vmem:[#allocation36_spill] sm:$0xff]  ;;  %v5930_v42 = vpop.f32.mrf.mxu0 }
 0x40c   : > { %7419 = vst [vmem:[#allocation22_spill] sm:$0xff] %v5862_v57  ;;  %v2569_v57 = vmax.f32 %v2567_v50, %v5889_v61  ;;  %v2503_v56 = vmax.f32 %v2501_v4, %v5885_v48  ;;  %v5910_v35 = vadd.f32 %v7434_v6, %v657_v28  ;;  %v7438_v50 = vld [vmem:[#allocation32_spill] sm:$0xff]  ;;  %v2504_v4 = vmax.f32 %v2502_v40, %v5906_v46 }
 0x40d   : > { %7420 = vst [vmem:[#allocation106_spill] sm:$0xff] %v5866_v43  ;;  %v7440_v43 = vld [vmem:[#allocation28_spill] sm:$0xff] }
 0x40e   : > { %7422 = vst [vmem:[#allocation18_spill] sm:$0xff] %v5871_v7  ;;  %v5915_v7 = vadd.f32 %v7436_v30, %v651_v20  ;;  %v2571_v34 = vmax.f32 %v2569_v57, %v5893_v37  ;;  %v5923_v12 = vadd.f32 %v7440_v43, %v656_v47  ;;  %v7444_v20 = vld [vmem:[#allocation25_spill] sm:$0xff]  ;;  %v660_v43 = vperm.slane %v5878_v29, 3 }
 0x40f   : > { %7423 = vst [vmem:[#allocation107_spill] sm:$0xff] %v5875_v16  ;;  %v5919_v16 = vadd.f32 %v7438_v50, %v653_v14  ;;  %v5933_v30 = vadd.f32 %v7444_v20, %v652_v5  ;;  %v7446_v14 = vld [vmem:[#allocation33_spill] sm:$0xff]  ;;  %v7450_v20 = vld [vmem:[#allocation44_spill] sm:$0xff] }
 0x410   : > { %7425 = vst [vmem:[#allocation23_spill] sm:$0xff] %v5881_v44  ;;  %v661_v44 = vperm.slane %v5878_v29, 4  ;;  %v2572_v57 = vmax.f32 %v2570_v39, %v5915_v7  ;;  %v5937_v50 = vadd.f32 %v7446_v14, %v654_v52  ;;  %v2505_v40 = vmax.f32 %v2503_v56, %v5923_v12  ;;  %v7452_v14 = vld [vmem:[#allocation30_spill] sm:$0xff]  ;;  %v7454_v56 = vld [vmem:[#allocation40_spill] sm:$0xff] }
 0x411   : > { %7427 = vst [vmem:[#allocation29_spill] sm:$0xff] %v5885_v48  ;;  %v7442_v48 = vld [vmem:[#allocation37_spill] sm:$0xff]  ;;  %v2573_v18 = vmax.f32 %v2571_v34, %v5933_v30 }
 0x412   : > { %7429 = vst [vmem:[#allocation19_spill] sm:$0xff] %v5889_v61  ;;  %v659_v61 = vperm.slane %v5878_v29, 2  ;;  %v5927_v6 = vadd.f32 %v7442_v48, %v658_v19  ;;  %v662_v48 = vperm.slane %v5878_v29, 5  ;;  %v5950_v52 = vadd.f32 %v7450_v20, %v661_v44 }
 0x413   : > { %7431 = vst [vmem:[#allocation26_spill] sm:$0xff] %v5893_v37  ;;  %v2506_v37 = vmax.f32 %v2504_v4, %v5910_v35  ;;  %v2575_v4 = vmax.f32 %v2573_v18, %v5937_v50  ;;  %v5962_v34 = vpop.f32.mrf.mxu3 }
 0x414   : > { %7433 = vst [vmem:[#allocation27_spill] sm:$0xff] %v5906_v46  ;;  %v2574_v46 = vmax.f32 %v2572_v57, %v5919_v16  ;;  %v5946_v5 = vadd.f32 %v7448_v55, %v659_v61  ;;  %v2507_v39 = vmax.f32 %v2505_v40, %v5927_v6  ;;  %v663_v57 = vperm.slane %v5878_v29, 6  ;;  %v5964_v55 = vpop.f32.mrf.mxu2  ;;  %v7456_v40 = vld [vmem:[#allocation35_spill] sm:$0xff]  ;;  %v7466_v29 = vld [vmem:[#allocation52_spill] sm:$0xff] }
 0x415   : > { %7435 = vst [vmem:[#allocation36_spill] sm:$0xff] %v5910_v35  ;;  %v5957_v35 = vadd.f32 %v7454_v56, %v657_v28  ;;  %v7460_v28 = vld [vmem:[#allocation31_spill] sm:$0xff] }
 0x416   : > { %7437 = vst [vmem:[#allocation24_spill] sm:$0xff] %v5915_v7  ;;  %v5953_v7 = vadd.f32 %v7452_v14, %v655_v58  ;;  %v2508_v20 = vmax.f32 %v2506_v37, %v5946_v5  ;;  %v7458_v58 = vld [vmem:[#allocation45_spill] sm:$0xff]  ;;  %v5975_v56 = vadd.f32 %v7460_v28, %v656_v47 }
 0x417   : > { %7439 = vst [vmem:[#allocation32_spill] sm:$0xff] %v5919_v16  ;;  %v5960_v16 = vld [vmem:[#allocation8 + $0x28] sm:$0xff]  ;;  %v5971_v14 = vadd.f32 %v7458_v58, %v662_v48  ;;  %v5985_v58 = vpop.f32.mrf.mxu1 }
 0x418   : > { %7441 = vst [vmem:[#allocation28_spill] sm:$0xff] %v5923_v12  ;;  %v665_v18 = vperm.slane %v5960_v16, 0  ;;  %v666_v37 = vperm.slane %v5960_v16, 1  ;;  %v2577_v28 = vmax.f32 %v2575_v4, %v5975_v56 }
 0x419   : > { %7443 = vst [vmem:[#allocation37_spill] sm:$0xff] %v5927_v6  ;;  %v7462_v6 = vld [vmem:[#allocation41_spill] sm:$0xff] }
 0x41a   : > { %7445 = vst [vmem:[#allocation25_spill] sm:$0xff] %v5933_v30  ;;  %v5967_v30 = vadd.f32 %v7456_v40, %v660_v43  ;;  %v5979_v12 = vadd.f32 %v7462_v6, %v658_v19  ;;  %v2510_v40 = vmax.f32 %v2508_v20, %v5950_v52  ;;  %v5996_v6 = vadd.f32 %v7466_v29, %v665_v18  ;;  %v7468_v20 = vld [vmem:[#allocation38_spill] sm:$0xff] }
 0x41b   : > { %7447 = vst [vmem:[#allocation33_spill] sm:$0xff] %v5937_v50  ;;  %v2576_v50 = vmax.f32 %v2574_v46, %v5953_v7  ;;  %v7464_v46 = vld [vmem:[#allocation42_spill] sm:$0xff]  ;;  %v669_v29 = vperm.slane %v5960_v16, 4 }
 0x41c   : > { %7449 = vst [vmem:[#allocation34_spill] sm:$0xff] %v5946_v5  ;;  %v2509_v24 = vmax.f32 %v2507_v39, %v5967_v30  ;;  %v5987_v5 = vpop.f32.mrf.mxu0  ;;  %v5999_v39 = vadd.f32 %v7468_v20, %v659_v61  ;;  %v7478_v20 = vld [vmem:[#allocation49_spill] sm:$0xff] }
 0x41d   : > { %7451 = vst [vmem:[#allocation44_spill] sm:$0xff] %v5950_v52  ;;  %v2578_v47 = vmax.f32 %v2576_v50, %v5957_v35  ;;  %v2579_v52 = vmax.f32 %v2577_v28, %v5979_v12  ;;  %v667_v50 = vperm.slane %v5960_v16, 2 }
 0x41e   : > { %7453 = vst [vmem:[#allocation30_spill] sm:$0xff] %v5953_v7  ;;  %v5992_v7 = vadd.f32 %v7464_v46, %v663_v57  ;;  %v2511_v19 = vmax.f32 %v2509_v24, %v5971_v14 }
 0x41f   : > { %7455 = vst [vmem:[#allocation40_spill] sm:$0xff] %v5957_v35  ;;  %v7472_v35 = vld [vmem:[#allocation43_spill] sm:$0xff]  ;;  %v2580_v28 = vmax.f32 %v2578_v47, %v5999_v39  ;;  %v7480_v47 = vld [vmem:[#allocation50_spill] sm:$0xff] }
 0x420   : > { %7457 = vst [vmem:[#allocation35_spill] sm:$0xff] %v5967_v30  ;;  %v7470_v30 = vld [vmem:[#allocation48_spill] sm:$0xff]  ;;  %v6007_v4 = vadd.f32 %v7472_v35, %v664_v9  ;;  %v2512_v46 = vmax.f32 %v2510_v40, %v5992_v7  ;;  %v668_v35 = vperm.slane %v5960_v16, 3 }
 0x421   : > { %7459 = vst [vmem:[#allocation45_spill] sm:$0xff] %v5971_v14  ;;  %v6003_v27 = vadd.f32 %v7470_v30, %v661_v44  ;;  %v7476_v14 = vld [vmem:[#allocation39_spill] sm:$0xff]  ;;  %v6019_v44 = vadd.f32 %v7478_v20, %v662_v48  ;;  %v6021_v30 = vpop.f32.mrf.mxu3  ;;  %v7482_v20 = vld [vmem:[#allocation64_spill] sm:$0xff] }
 0x422   : > { %7461 = vst [vmem:[#allocation31_spill] sm:$0xff] %v5975_v56  ;;  %v7474_v56 = vld [vmem:[#allocation53_spill] sm:$0xff]  ;;  %v6015_v61 = vadd.f32 %v7476_v14, %v660_v43  ;;  %v2514_v40 = vmax.f32 %v2512_v46, %v5996_v6  ;;  %v6036_v38 = vadd.f32 %v7482_v20, %v669_v29  ;;  %v6041_v46 = vadd.f32 %v7484_v13, %v663_v57  ;;  %v6058_v57 = vpop.f32.mrf.mxu1 }
 0x423   : > { %7463 = vst [vmem:[#allocation41_spill] sm:$0xff] %v5979_v12  ;;  %v6011_v24 = vadd.f32 %v7474_v56, %v666_v37  ;;  %v6023_v12 = vpop.f32.mrf.mxu2  ;;  %v2513_v56 = vmax.f32 %v2511_v19, %v6007_v4  ;;  %v2582_v43 = vmax.f32 %v2580_v28, %v6003_v27  ;;  %v6048_v28 = vld [vmem:[#allocation8 + $0x30] sm:$0xff]  ;;  %v7490_v20 = vld [vmem:[#allocation65_spill] sm:$0xff] }
 0x424   : > { %7465 = vst [vmem:[#allocation42_spill] sm:$0xff] %v5992_v7  ;;  %v670_v7 = vperm.slane %v5960_v16, 5  ;;  %v2581_v14 = vmax.f32 %v2579_v52, %v6015_v61  ;;  %v6038_v22 = vpop.f32.mrf.mxu0  ;;  %v671_v52 = vperm.slane %v5960_v16, 6  ;;  %v673_v13 = vperm.slane %v6048_v28, 0 }
 0x425   : > { %7467 = vst [vmem:[#allocation52_spill] sm:$0xff] %v5996_v6  ;;  %v2515_v48 = vmax.f32 %v2513_v56, %v6011_v24  ;;  %v7486_v6 = vld [vmem:[#allocation56_spill] sm:$0xff] }
 0x426   : > { %7469 = vst [vmem:[#allocation38_spill] sm:$0xff] %v5999_v39  ;;  %v6032_v39 = vadd.f32 %v7480_v47, %v667_v50  ;;  %v2583_v19 = vmax.f32 %v2581_v14, %v6019_v44  ;;  %v7488_v47 = vld [vmem:[#allocation51_spill] sm:$0xff] }
 0x427   : > { %7471 = vst [vmem:[#allocation48_spill] sm:$0xff] %v6003_v27  ;;  %v6051_v27 = vadd.f32 %v7488_v47, %v668_v35  ;;  %v7492_v14 = vld [vmem:[#allocation47_spill] sm:$0xff]  ;;  %v672_v47 = vperm.slane %v5960_v16, 7  ;;  %v6082_v16 = vadd.f32 %v5731_v25, %v673_v13  ;;  %v677_v25 = vperm.slane %v6048_v28, 4 }
 0x428   : > { %7473 = vst [vmem:[#allocation43_spill] sm:$0xff] %v6007_v4  ;;  %v6045_v4 = vadd.f32 %v7486_v6, %v665_v18  ;;  %v2516_v56 = vmax.f32 %v2514_v40, %v6032_v39  ;;  %v2584_v18 = vmax.f32 %v2582_v43, %v6041_v46  ;;  %v7494_v6 = vld [vmem:[#allocation57_spill] sm:$0xff]  ;;  %v7496_v43 = vld [vmem:[#allocation58_spill] sm:$0xff] }
 0x429   : > { %7475 = vst [vmem:[#allocation53_spill] sm:$0xff] %v6011_v24  ;;  %v6065_v24 = vadd.f32 %v7494_v6, %v666_v37  ;;  %v2517_v40 = vmax.f32 %v2515_v48, %v6051_v27  ;;  %v6073_v8 = vpop.f32.mrf.mxu3 }
 0x42a   : > { %7477 = vst [vmem:[#allocation39_spill] sm:$0xff] %v6015_v61  ;;  %v6055_v61 = vadd.f32 %v7490_v20, %v670_v7  ;;  %v2518_v59 = vmax.f32 %v2516_v56, %v6036_v38  ;;  %v674_v20 = vperm.slane %v6048_v28, 1  ;;  %v7498_v56 = vld [vmem:[#allocation54_spill] sm:$0xff] }
 0x42b   : > { %7479 = vst [vmem:[#allocation49_spill] sm:$0xff] %v6019_v44  ;;  %v6061_v44 = vadd.f32 %v7492_v14, %v664_v9  ;;  %v6075_v9 = vpop.f32.mrf.mxu2  ;;  %v6078_v14 = vadd.f32 %v7496_v43, %v671_v52  ;;  %v6085_v48 = vadd.f32 %v7498_v56, %v667_v50  ;;  %v7503_v50 = vld [vmem:[#allocation55_spill] sm:$0xff] }
 0x42c   : > { %7481 = vst [vmem:[#allocation50_spill] sm:$0xff] %v6032_v39  ;;  %v2586_v39 = vmax.f32 %v2584_v18, %v6045_v4  ;;  %v2519_v37 = vmax.f32 %v2517_v40, %v6055_v61  ;;  %v6089_v18 = vadd.f32 %v5678_v10, %v669_v29  ;;  %v6097_v40 = vadd.f32 %v5733_v21, %v674_v20 }
 0x42d   : > { %7483 = vst [vmem:[#allocation64_spill] sm:$0xff] %v6036_v38  ;;  %v2585_v15 = vmax.f32 %v2583_v19, %v6061_v44  ;;  %v675_v19 = vperm.slane %v6048_v28, 2  ;;  %v2520_v43 = vmax.f32 %v2518_v59, %v6078_v14  ;;  %v6103_v56 = vadd.f32 %v7503_v50, %v668_v35 }
 0x42e   : > { %7485 = vst [vmem:[#allocation46_spill] sm:$0xff] %v6041_v46  ;;  %v6100_v46 = vpop.f32.mrf.mxu0  ;;  %v2588_v10 = vmax.f32 %v2586_v39, %v6085_v48  ;;  %v678_v21 = vperm.slane %v6048_v28, 5  ;;  %v6129_v50 = vadd.f32 %v5792_v63, %v673_v13  ;;  %v6147_v63 = vadd.f32 %v5640_v33, %v672_v47 }
 0x42f   : > { %7487 = vst [vmem:[#allocation56_spill] sm:$0xff] %v6045_v4  ;;  %v2587_v6 = vmax.f32 %v2585_v15, %v6065_v24  ;;  %v7501_v4 = vld [vmem:[#allocation59_spill] sm:$0xff]  ;;  %v6107_v15 = vadd.f32 %v5680_v1, %v670_v7  ;;  %v2522_v29 = vmax.f32 %v2520_v43, %v6082_v16  ;;  %v6116_v35 = vadd.f32 %v5696_v26, %v675_v19  ;;  %v6122_v7 = vpop.f32.mrf.mxu1 }
 0x430   : > { %7489 = vst [vmem:[#allocation51_spill] sm:$0xff] %v6051_v27  ;;  %v6120_v1 = vadd.f32 %v5851_v62, %v677_v25  ;;  %v6125_v43 = vadd.f32 %v5638_v54, %v671_v52  ;;  %v6143_v54 = vadd.f32 %v5853_v11, %v678_v21 }
 0x431   : > { %7491 = vst [vmem:[#allocation65_spill] sm:$0xff] %v6055_v61  ;;  %v6134_v26 = vpop.f32.mrf.mxu3 }
 0x432   : > { %7493 = vst [vmem:[#allocation47_spill] sm:$0xff] %v6061_v44  ;;  %v6093_v44 = vadd.f32 %v7501_v4, %v672_v47  ;;  %v676_v4 = vperm.slane %v6048_v28, 3 }
 0x433   : > { %7495 = vst [vmem:[#allocation57_spill] sm:$0xff] %v6065_v24  ;;  %v2590_v24 = vmax.f32 %v2588_v10, %v6089_v18  ;;  %v6132_v10 = vld [vmem:[#allocation8 + $0x38] sm:$0xff] }
 0x434   : > { %7497 = vst [vmem:[#allocation58_spill] sm:$0xff] %v6078_v14  ;;  %v2521_v59 = vmax.f32 %v2519_v37, %v6093_v44  ;;  %v2589_v14 = vmax.f32 %v2587_v6, %v6103_v56  ;;  %v679_v6 = vperm.slane %v6048_v28, 6  ;;  %v6139_v62 = vadd.f32 %v5698_v0, %v676_v4 }
 0x435   : > { %7499 = vst [vmem:[#allocation54_spill] sm:$0xff] %v6085_v48  ;;  %v681_v52 = vperm.slane %v6132_v10, 0  ;;  %v2592_v13 = vmax.f32 %v2590_v24, %v6125_v43 }
 0x436   : > { %7500 = vst [vmem:[#allocation108_spill] sm:$0xff] %v6089_v18  ;;  %v2523_v39 = vmax.f32 %v2521_v59, %v6097_v40  ;;  %v2591_v37 = vmax.f32 %v2589_v14, %v6107_v15  ;;  %v6136_v59 = vpop.f32.mrf.mxu2  ;;  %v2524_v18 = vmax.f32 %v2522_v29, %v6116_v35  ;;  %v6151_v14 = vadd.f32 %v5794_v2, %v674_v20  ;;  %v6157_v11 = vpop.f32.mrf.mxu0 }
 0x437   : > { %7502 = vst [vmem:[#allocation59_spill] sm:$0xff] %v6093_v44  ;;  %v682_v29 = vperm.slane %v6132_v10, 1  ;;  %v2594_v48 = vmax.f32 %v2592_v13, %v6129_v50  ;;  %v6162_v47 = vadd.f32 %v5815_v51, %v679_v6  ;;  %v6166_v24 = vadd.f32 %v5962_v34, %v681_v52 }
 0x438   : > { %7504 = vst [vmem:[#allocation55_spill] sm:$0xff] %v6103_v56  ;;  %v2526_v0 = vmax.f32 %v2524_v18, %v6120_v1  ;;  %v2525_v56 = vmax.f32 %v2523_v39, %v6139_v62  ;;  %v2593_v33 = vmax.f32 %v2591_v37, %v6147_v63  ;;  %v6173_v18 = vadd.f32 %v5901_v53, %v677_v25 }
 0x439   : > { %7505 = vst [vmem:[#allocation109_spill] sm:$0xff] %v6107_v15  ;;  %v680_v15 = vperm.slane %v6048_v28, 7  ;;  %v6169_v28 = vadd.f32 %v5758_v3, %v675_v19  ;;  %v683_v39 = vperm.slane %v6132_v10, 2  ;;  %v685_v34 = vperm.slane %v6132_v10, 4  ;;  %v2387_v25 = vpop.f32.mrf.mxu3 }
 0x43a   : > { %7506 = vst [vmem:[#allocation110_spill] sm:$0xff] %v6125_v43  ;;  %v2527_v2 = vmax.f32 %v2525_v56, %v6143_v54  ;;  %v2595_v20 = vmax.f32 %v2593_v33, %v6151_v14  ;;  %v2528_v51 = vmax.f32 %v2526_v0, %v6162_v47  ;;  %v6181_v56 = vadd.f32 %v5964_v55, %v682_v29 }
 0x43b   : > { %7507 = vst [vmem:[#allocation111_spill] sm:$0xff] %v6129_v50  ;;  %v6177_v37 = vadd.f32 %v5842_v45, %v680_v15  ;;  %v6185_v3 = vadd.f32 %v5771_v36, %v676_v4  ;;  %v2596_v19 = vmax.f32 %v2594_v48, %v6169_v28  ;;  %v6189_v53 = vadd.f32 %v5903_v32, %v678_v21  ;;  %v2375_v4 = vpop.f32.mrf.mxu1 }
 0x43c   : > { %7508 = vst [vmem:[#allocation112_spill] sm:$0xff] %v6147_v63  ;;  %v684_v45 = vperm.slane %v6132_v10, 3  ;;  %v2530_v33 = vmax.f32 %v2528_v51, %v6166_v24  ;;  %v686_v55 = vperm.slane %v6132_v10, 5  ;;  %v6198_v48 = vadd.f32 %v5930_v42, %v683_v39 }
 0x43d   : > { %7509 = vst [vmem:[#allocation113_spill] sm:$0xff] %v6151_v14  ;;  %v2529_v0 = vmax.f32 %v2527_v2, %v6177_v37  ;;  %v2598_v14 = vmax.f32 %v2596_v19, %v6173_v18  ;;  %v2597_v36 = vmax.f32 %v2595_v20, %v6185_v3  ;;  %v6202_v21 = vadd.f32 %v6073_v8, %v685_v34 }
 0x43e   : > { %7510 = vst [vmem:[#allocation114_spill] sm:$0xff] %v6169_v28  ;;  %v2401_v13 = vpop.f32.mrf.mxu2  ;;  %v6204_v28 = vpop.f32.mrf.mxu0  ;;  %v6207_v51 = vadd.f32 %v5868_v23, %v679_v6  ;;  %v6211_v19 = vadd.f32 %v6021_v30, %v681_v52  ;;  %v687_v20 = vperm.slane %v6132_v10, 6  ;;  %v6217_v42 = vadd.f32 %v5985_v58, %v684_v45 }
 0x43f   : > { %7511 = vst [vmem:[#allocation115_spill] sm:$0xff] %v6173_v18  ;;  %v2531_v32 = vmax.f32 %v2529_v0, %v6181_v56  ;;  %v2599_v2 = vmax.f32 %v2597_v36, %v6189_v53  ;;  %v6214_v18 = vld [vmem:[#allocation8 + $0x40] sm:$0xff]  ;;  %v2532_v8 = vmax.f32 %v2530_v33, %v6198_v48  ;;  %v6221_v0 = vadd.f32 %v6075_v9, %v686_v55 }
 0x440   : > { %7512 = vst [vmem:[#allocation116_spill] sm:$0xff] %v6185_v3  ;;  %v689_v23 = vperm.slane %v6214_v18, 0  ;;  %v6225_v6 = vadd.f32 %v5912_v41, %v680_v15  ;;  %v2600_v30 = vmax.f32 %v2598_v14, %v6207_v51  ;;  %v6229_v52 = vadd.f32 %v6023_v12, %v682_v29 }
 0x441   : > { %7513 = vst [vmem:[#allocation117_spill] sm:$0xff] %v6189_v53  ;;  %v688_v36 = vperm.slane %v6132_v10, 7  ;;  %v2534_v58 = vmax.f32 %v2532_v8, %v6202_v21  ;;  %v2533_v53 = vmax.f32 %v2531_v32, %v6217_v42  ;;  %v690_v33 = vperm.slane %v6214_v18, 1  ;;  %v2389_v50 = vpop.f32.mrf.mxu3 }
 0x442   : > { %7514 = vst [vmem:[#allocation118_spill] sm:$0xff] %v6207_v51  ;;  %v2602_v9 = vmax.f32 %v2600_v30, %v6211_v19  ;;  %v2601_v3 = vmax.f32 %v2599_v2, %v6225_v6  ;;  %v6238_v15 = vadd.f32 %v6038_v22, %v687_v20  ;;  %v6241_v14 = vadd.f32 %v2387_v25, %v689_v23 }
 0x443   : > { %7515 = vst [vmem:[#allocation119_spill] sm:$0xff] %v6211_v19  ;;  %v2535_v12 = vmax.f32 %v2533_v53, %v6221_v0  ;;  %v6244_v10 = vadd.f32 %v5987_v5, %v683_v39  ;;  %v6248_v32 = vadd.f32 %v6134_v26, %v685_v34  ;;  %v6251_v8 = vadd.f32 %v6122_v7, %v688_v36  ;;  %v2429_v34 = vpop.f32.mrf.mxu1 }
 0x444   : > { %7516 = vst [vmem:[#allocation120_spill] sm:$0xff] %v6225_v6  ;;  %v2603_v29 = vmax.f32 %v2601_v3, %v6229_v52  ;;  %v691_v2 = vperm.slane %v6214_v18, 2  ;;  %v2536_v22 = vmax.f32 %v2534_v58, %v6238_v15  ;;  %v6255_v30 = vadd.f32 %v2401_v13, %v690_v33 }
 0x445   : > { %7517 = vst [vmem:[#allocation121_spill] sm:$0xff] %v6229_v52  ;;  %v6258_v53 = vadd.f32 %v6058_v57, %v684_v45  ;;  %v2604_v5 = vmax.f32 %v2602_v9, %v6244_v10  ;;  %v6262_v39 = vadd.f32 %v6136_v59, %v686_v55  ;;  %v692_v26 = vperm.slane %v6214_v18, 3 }
 0x446   : > { %v2403_v41 = vpop.f32.mrf.mxu2  ;;  %7518 = vst [vmem:[#allocation122_spill] sm:$0xff] %v6244_v10  ;;  %v2538_v7 = vmax.f32 %v2536_v22, %v6241_v14  ;;  %v2537_v3 = vmax.f32 %v2535_v12, %v6251_v8  ;;  %v2471_v25 = vpop.f32.mrf.mxu0  ;;  %v693_v58 = vperm.slane %v6214_v18, 4  ;;  %v694_v13 = vperm.slane %v6214_v18, 5 }
 0x447   : > { %v2606_v57 = vmax.f32 %v2604_v5, %v6248_v32  ;;  %v2605_v45 = vmax.f32 %v2603_v29, %v6258_v53  ;;  %v6272_v9 = vadd.f32 %v6157_v11, %v691_v2  ;;  %v695_v55 = vperm.slane %v6214_v18, 6 }
 0x448   : > { %v2539_v59 = vmax.f32 %v2537_v3, %v6255_v30  ;;  %v6277_v22 = vadd.f32 %v6100_v46, %v687_v20  ;;  %v6280_v10 = vadd.f32 %v2429_v34, %v692_v26  ;;  %v6282_v6 = vadd.f32 %v2389_v50, %v689_v23 }
 0x449   : > { %v2607_v12 = vmax.f32 %v2605_v45, %v6262_v39  ;;  %v2443_v52 = vpop.f32.mrf.mxu3  ;;  %v2540_v11 = vmax.f32 %v2538_v7, %v6272_v9  ;;  %v6289_v3 = vadd.f32 %v2375_v4, %v688_v36  ;;  %v6292_v46 = vadd.f32 %v2403_v41, %v690_v33 }
 0x44a   : > { %7519 = vst [vmem:[#allocation123_spill] sm:$0xff] %v6282_v6  ;;  %v6284_v5 = vadd.f32 %v2443_v52, %v693_v58  ;;  %v2608_v18 = vmax.f32 %v2606_v57, %v6277_v22  ;;  %v6294_v20 = vadd.f32 %v2471_v25, %v695_v55  ;;  %v2541_v45 = vmax.f32 %v2539_v59, %v6280_v10 }
 0x44b   : > { %7521 = vst [vmem:[#allocation125_spill] sm:$0xff] %v6292_v46  ;;  %v2609_v23 = vmax.f32 %v2607_v12, %v6289_v3  ;;  %v2431_v4 = vpop.f32.mrf.mxu1  ;;  %v6303_v36 = vadd.f32 %v6204_v28, %v691_v2 }
 0x44c   : > { %v2542_v34 = vmax.f32 %v2540_v11, %v6284_v5  ;;  %v2610_v50 = vmax.f32 %v2608_v18, %v6282_v6  ;;  %v6306_v11 = vadd.f32 %v2431_v4, %v692_v26 }
 0x44d   : > { %7522 = vst [vmem:[#allocation126_spill] sm:$0xff] %v6303_v36  ;;  %v2611_v33 = vmax.f32 %v2609_v23, %v6292_v46 }
 0x44e   : > { %v2457_v19 = vpop.f32.mrf.mxu2  ;;  %v2473_v41 = vpop.f32.mrf.mxu0  ;;  %7523 = vst [vmem:[#allocation127_spill] sm:$0xff] %v6306_v11  ;;  %v2612_v12 = vmax.f32 %v2610_v50, %v6303_v36 }
 0x44f   : > { %v6287_v29 = vadd.f32 %v2457_v19, %v694_v13  ;;  %v2544_v19 = vmax.f32 %v2542_v34, %v6294_v20  ;;  %v6313_v34 = vadd.f32 %v2473_v41, %v695_v55  ;;  %v2613_v2 = vmax.f32 %v2611_v33, %v6306_v11  ;;  %v7529_v33 = vld [vmem:[#allocation66_spill] sm:$0xff] }
 0x451   : > { %7520 = vst [vmem:[#allocation124_spill] sm:$0xff] %v6287_v29  ;;  %v2543_v52 = vmax.f32 %v2541_v45, %v6287_v29  ;;  %v2445_v25 = vpop.f32.mrf.mxu3 }
 0x452   : > { %v6308_v59 = vadd.f32 %v2445_v25, %v693_v58  ;;  %7526 = vst [vmem:[#allocation130_spill] sm:$0xff] %v6313_v34  ;;  %v7527_v58 = vld [vmem:[#allocation60_spill] sm:$0xff]  ;;  %v7530_v25 = vld [vmem:[#allocation63_spill] sm:$0xff] }
 0x453   : > { %v2545_v7 = vmax.f32 %v2544_v19, %v2543_v52  ;;  %v7528_v19 = vld [vmem:[#allocation61_spill] sm:$0xff] }
 0x454   : > { %7524 = vst [vmem:[#allocation128_spill] sm:$0xff] %v6308_v59  ;;  %v2614_v28 = vmax.f32 %v2612_v12, %v6308_v59  ;;  %v7568_v59 = vld [vmem:[#allocation50_spill] sm:$0xff] }
 0x455   : > { %2546 = vmax.xlane.f32.xlu2 %v2545_v7 }
 0x456   : > { %v2459_v57 = vpop.f32.mrf.mxu2  ;;  %v2616_v23 = vmax.f32 %v2614_v28, %v6313_v34  ;;  %v7565_v34 = vld [vmem:[#allocation52_spill] sm:$0xff] }
 0x457   : > { %v6311_v18 = vadd.f32 %v2459_v57, %v694_v13 }
 0x459   : > { %7525 = vst [vmem:[#allocation129_spill] sm:$0xff] %v6311_v18  ;;  %v2615_v45 = vmax.f32 %v2613_v2, %v6311_v18 }
 0x45b   : > { %v2617_v52 = vmax.f32 %v2616_v23, %v2615_v45 }
 0x45d   : > { %2618 = vmax.xlane.f32.xlu0 %v2617_v52 }
 0x4c8   : > { %v6319_v26 = vpop.xlane.xlu2 %2546 }
 0x4c9   : > { %v2620_v50 = vsub.f32 %v7527_v58, %v6319_v26  ;;  %v2621_v13 = vsub.f32 %v5612_v60, %v6319_v26  ;;  %v2622_v4 = vsub.f32 %v7528_v19, %v6319_v26  ;;  %v2623_v7 = vsub.f32 %v7529_v33, %v6319_v26  ;;  %v7533_v60 = vld [vmem:[#allocation78_spill] sm:$0xff] }
 0x4ca   : > { %v2624_v57 = vsub.f32 %v7530_v25, %v6319_v26  ;;  %v2625_v28 = vsub.f32 %v5630_v49, %v6319_v26  ;;  %v2626_v45 = vsub.f32 %v5646_v17, %v6319_v26  ;;  %v7531_v25 = vld [vmem:[#allocation70_spill] sm:$0xff]  ;;  %v2630_v58 = vsub.f32 %v7533_v60, %v6319_v26  ;;  %v7536_v60 = vld [vmem:[#allocation83_spill] sm:$0xff] }
 0x4cb   : > { %v2762_v55 = vmul.f32 1.442695, %v2620_v50  ;;  %v2764_v41 = vmul.f32 1.442695, %v2621_v13  ;;  %v2766_v12 = vmul.f32 1.442695, %v2622_v4  ;;  %v2627_v13 = vsub.f32 %v5663_v31, %v6319_v26 }
 0x4cc   : > { %v2768_v2 = vmul.f32 1.442695, %v2623_v7  ;;  %v2770_v23 = vmul.f32 1.442695, %v2624_v57  ;;  %v2774_v4 = vmul.f32 1.442695, %v2626_v45  ;;  %v2662_v11 = vsub.f32 %v7568_v59, %v6319_v26 }
 0x4cd   : > { %4573 = vpow2.f32 %v2762_v55  ;;  %v2772_v55 = vmul.f32 1.442695, %v2625_v28  ;;  %v7532_v7 = vld [vmem:[#allocation75_spill] sm:$0xff] }
 0x4ce   : > { %4575 = vpow2.f32 %v2764_v41  ;;  %v2628_v41 = vsub.f32 %v7531_v25, %v6319_v26  ;;  %v2629_v19 = vsub.f32 %v7532_v7, %v6319_v26  ;;  %v7534_v25 = vld [vmem:[#allocation82_spill] sm:$0xff]  ;;  %v7535_v7 = vld [vmem:[#allocation79_spill] sm:$0xff] }
 0x4cf   : > { %4577 = vpow2.f32 %v2766_v12  ;;  %v2776_v12 = vmul.f32 1.442695, %v2627_v13 }
 0x4d0   : > { %4579 = vpow2.f32 %v2768_v2  ;;  %v2778_v2 = vmul.f32 1.442695, %v2628_v41  ;;  %v2780_v45 = vmul.f32 1.442695, %v2629_v19 }
 0x4d1   : > { %4581 = vpow2.f32 %v2770_v23  ;;  %v2631_v23 = vsub.f32 %v7534_v25, %v6319_v26  ;;  %v7537_v25 = vld [vmem:[#allocation86_spill] sm:$0xff] }
 0x4d2   : > { %4583 = vpow2.f32 %v2772_v55  ;;  %v2632_v55 = vsub.f32 %v7535_v7, %v6319_v26  ;;  %v7538_v7 = vld [vmem:[#allocation90_spill] sm:$0xff] }
 0x4d3   : > { %v4574_v52 = vpop.eup %4573  ;;  %4585 = vpow2.f32 %v2774_v4  ;;  %v2633_v4 = vsub.f32 %v7536_v60, %v6319_v26  ;;  %v7539_v60 = vld [vmem:[#allocation87_spill] sm:$0xff] }
 0x4d4   : > { %v4576_v50 = vpop.eup %4575  ;;  %4587 = vpow2.f32 %v2776_v12  ;;  %v2634_v12 = vsub.f32 %v7537_v25, %v6319_v26  ;;  %v7540_v25 = vld [vmem:[#allocation91_spill] sm:$0xff] }
 0x4d5   : > { %v3046_v33 = vadd.f32 %v4576_v50, %v4574_v52  ;;  %v4578_v49 = vpop.eup %4577  ;;  %4589 = vpow2.f32 %v2778_v2  ;;  %v2635_v2 = vsub.f32 %v7538_v7, %v6319_v26  ;;  %v7541_v7 = vld [vmem:[#allocation94_spill] sm:$0xff] }
 0x4d6   : > { %v4580_v17 = vpop.eup %4579  ;;  %4591 = vpow2.f32 %v2780_v45  ;;  %v2636_v45 = vsub.f32 %v7539_v60, %v6319_v26  ;;  %v7542_v60 = vld [vmem:[#allocation98_spill] sm:$0xff] }
 0x4d7   : > { %v3047_v57 = vadd.f32 %v4578_v49, %v3046_v33  ;;  %v4582_v31 = vpop.eup %4581  ;;  %v2782_v49 = vmul.f32 1.442695, %v2630_v58  ;;  %v2788_v58 = vmul.f32 1.442695, %v2633_v4 }
 0x4d8   : > { %v4584_v50 = vpop.eup %4583  ;;  %v2794_v4 = vmul.f32 1.442695, %v2636_v45 }
 0x4d9   : > { %v3048_v28 = vadd.f32 %v4580_v17, %v3047_v57  ;;  %v4586_v13 = vpop.eup %4585  ;;  %v2784_v17 = vmul.f32 1.442695, %v2631_v23  ;;  %4593 = vpow2.f32 %v2782_v49  ;;  %v2790_v23 = vmul.f32 1.442695, %v2634_v12 }
 0x4da   : > { %v4588_v57 = vpop.eup %4587  ;;  %v2637_v49 = vsub.f32 %v7540_v25, %v6319_v26  ;;  %v7543_v25 = vld [vmem:[#allocation95_spill] sm:$0xff] }
 0x4db   : > { %v3049_v52 = vadd.f32 %v4582_v31, %v3048_v28  ;;  %v2786_v31 = vmul.f32 1.442695, %v2632_v55  ;;  %v4590_v28 = vpop.eup %4589  ;;  %4595 = vpow2.f32 %v2784_v17  ;;  %v2792_v55 = vmul.f32 1.442695, %v2635_v2 }
 0x4dc   : > { %v2638_v17 = vsub.f32 %v7541_v7, %v6319_v26  ;;  %v2796_v12 = vmul.f32 1.442695, %v2637_v49  ;;  %v7544_v7 = vld [vmem:[#allocation99_spill] sm:$0xff] }
 0x4dd   : > { %v3050_v33 = vadd.f32 %v4584_v50, %v3049_v52  ;;  %v4592_v50 = vpop.eup %4591  ;;  %4597 = vpow2.f32 %v2786_v31  ;;  %v2639_v31 = vsub.f32 %v7542_v60, %v6319_v26  ;;  %v7545_v60 = vld [vmem:[#allocation102_spill] sm:$0xff] }
 0x4de   : > { %4599 = vpow2.f32 %v2788_v58  ;;  %v2640_v58 = vsub.f32 %v7543_v25, %v6319_v26  ;;  %v2798_v2 = vmul.f32 1.442695, %v2638_v17  ;;  %v7546_v25 = vld [vmem:[#allocation17_spill] sm:$0xff] }
 0x4df   : > { %v3051_v41 = vadd.f32 %v4586_v13, %v3050_v33  ;;  %v4594_v13 = vpop.eup %4593  ;;  %4601 = vpow2.f32 %v2790_v23  ;;  %v2641_v23 = vsub.f32 %v7544_v7, %v6319_v26  ;;  %v2800_v45 = vmul.f32 1.442695, %v2639_v31  ;;  %v7547_v7 = vld [vmem:[#allocation103_spill] sm:$0xff] }
 0x4e0   : > { %4603 = vpow2.f32 %v2792_v55  ;;  %v2642_v55 = vsub.f32 %v7545_v60, %v6319_v26  ;;  %v2802_v49 = vmul.f32 1.442695, %v2640_v58  ;;  %v7548_v60 = vld [vmem:[#allocation105_spill] sm:$0xff] }
 0x4e1   : > { %v3052_v19 = vadd.f32 %v4588_v57, %v3051_v41  ;;  %v4596_v57 = vpop.eup %4595  ;;  %4605 = vpow2.f32 %v2794_v4  ;;  %v2643_v4 = vsub.f32 %v7546_v25, %v6319_v26  ;;  %v2804_v17 = vmul.f32 1.442695, %v2641_v23  ;;  %v7549_v25 = vld [vmem:[#allocation22_spill] sm:$0xff] }
 0x4e2   : > { %4607 = vpow2.f32 %v2796_v12  ;;  %v2644_v12 = vsub.f32 %v7547_v7, %v6319_v26  ;;  %v2806_v31 = vmul.f32 1.442695, %v2642_v55  ;;  %v7550_v7 = vld [vmem:[#allocation23_spill] sm:$0xff] }
 0x4e3   : > { %v3053_v52 = vadd.f32 %v4590_v28, %v3052_v19  ;;  %v4598_v28 = vpop.eup %4597  ;;  %4609 = vpow2.f32 %v2798_v2  ;;  %v2645_v2 = vsub.f32 %v7548_v60, %v6319_v26  ;;  %v2808_v58 = vmul.f32 1.442695, %v2643_v4  ;;  %v7551_v60 = vld [vmem:[#allocation106_spill] sm:$0xff] }
 0x4e4   : > { %4611 = vpow2.f32 %v2800_v45  ;;  %v2646_v45 = vsub.f32 %v7549_v25, %v6319_v26  ;;  %v2810_v23 = vmul.f32 1.442695, %v2644_v12  ;;  %v7552_v25 = vld [vmem:[#allocation29_spill] sm:$0xff] }
 0x4e5   : > { %v3054_v33 = vadd.f32 %v4592_v50, %v3053_v52  ;;  %v4600_v50 = vpop.eup %4599  ;;  %4613 = vpow2.f32 %v2802_v49  ;;  %v2647_v49 = vsub.f32 %v7550_v7, %v6319_v26  ;;  %v2812_v55 = vmul.f32 1.442695, %v2645_v2  ;;  %v7553_v7 = vld [vmem:[#allocation27_spill] sm:$0xff] }
 0x4e6   : > { %4615 = vpow2.f32 %v2804_v17  ;;  %v2648_v17 = vsub.f32 %v7551_v60, %v6319_v26  ;;  %v2814_v4 = vmul.f32 1.442695, %v2646_v45  ;;  %v7554_v60 = vld [vmem:[#allocation28_spill] sm:$0xff] }
 0x4e7   : > { %v3055_v41 = vadd.f32 %v4594_v13, %v3054_v33  ;;  %v4602_v13 = vpop.eup %4601  ;;  %4617 = vpow2.f32 %v2806_v31  ;;  %v2649_v31 = vsub.f32 %v7552_v25, %v6319_v26  ;;  %v2816_v12 = vmul.f32 1.442695, %v2647_v49  ;;  %v7555_v25 = vld [vmem:[#allocation36_spill] sm:$0xff] }
 0x4e8   : > { %4619 = vpow2.f32 %v2808_v58  ;;  %v2650_v58 = vsub.f32 %v7553_v7, %v6319_v26  ;;  %v2818_v2 = vmul.f32 1.442695, %v2648_v17  ;;  %v7556_v7 = vld [vmem:[#allocation37_spill] sm:$0xff] }
 0x4e9   : > { %v3056_v19 = vadd.f32 %v4596_v57, %v3055_v41  ;;  %v4604_v57 = vpop.eup %4603  ;;  %4621 = vpow2.f32 %v2810_v23  ;;  %v2651_v23 = vsub.f32 %v7554_v60, %v6319_v26  ;;  %v2820_v45 = vmul.f32 1.442695, %v2649_v31  ;;  %v7557_v60 = vld [vmem:[#allocation34_spill] sm:$0xff] }
 0x4ea   : > { %4623 = vpow2.f32 %v2812_v55  ;;  %v2652_v55 = vsub.f32 %v7555_v25, %v6319_v26  ;;  %v2822_v49 = vmul.f32 1.442695, %v2650_v58  ;;  %v7558_v25 = vld [vmem:[#allocation35_spill] sm:$0xff] }
 0x4eb   : > { %v3057_v52 = vadd.f32 %v4598_v28, %v3056_v19  ;;  %v4606_v28 = vpop.eup %4605  ;;  %4625 = vpow2.f32 %v2814_v4  ;;  %v2653_v4 = vsub.f32 %v7556_v7, %v6319_v26  ;;  %v2824_v17 = vmul.f32 1.442695, %v2651_v23  ;;  %v7559_v7 = vld [vmem:[#allocation44_spill] sm:$0xff] }
 0x4ec   : > { %4627 = vpow2.f32 %v2816_v12  ;;  %v2654_v12 = vsub.f32 %v7557_v60, %v6319_v26  ;;  %v2826_v31 = vmul.f32 1.442695, %v2652_v55  ;;  %v7560_v60 = vld [vmem:[#allocation45_spill] sm:$0xff] }
 0x4ed   : > { %v3058_v33 = vadd.f32 %v4600_v50, %v3057_v52  ;;  %v4608_v50 = vpop.eup %4607  ;;  %4629 = vpow2.f32 %v2818_v2  ;;  %v2655_v2 = vsub.f32 %v7558_v25, %v6319_v26  ;;  %v2828_v58 = vmul.f32 1.442695, %v2653_v4  ;;  %v7561_v4 = vld [vmem:[#allocation42_spill] sm:$0xff] }
 0x4ee   : > { %4631 = vpow2.f32 %v2820_v45  ;;  %v2656_v45 = vsub.f32 %v7559_v7, %v6319_v26  ;;  %v2830_v23 = vmul.f32 1.442695, %v2654_v12  ;;  %v7564_v7 = vld [vmem:[#allocation72_spill] sm:$0xff] }
 0x4ef   : > { %v3059_v41 = vadd.f32 %v4602_v13, %v3058_v33  ;;  %v4610_v13 = vpop.eup %4609  ;;  %4633 = vpow2.f32 %v2822_v49  ;;  %v2657_v49 = vsub.f32 %v7560_v60, %v6319_v26  ;;  %v2832_v55 = vmul.f32 1.442695, %v2655_v2  ;;  %v7563_v60 = vld [vmem:[#allocation68_spill] sm:$0xff] }
 0x4f0   : > { %4635 = vpow2.f32 %v2824_v17  ;;  %v2658_v17 = vsub.f32 %v7561_v4, %v6319_v26  ;;  %v2660_v4 = vsub.f32 %v7565_v34, %v6319_v26 }
 0x4f1   : > { %v3060_v19 = vadd.f32 %v4604_v57, %v3059_v41  ;;  %v4612_v57 = vpop.eup %4611  ;;  %4637 = vpow2.f32 %v2826_v31 }
 0x4f2   : > { %4639 = vpow2.f32 %v2828_v58 }
 0x4f3   : > { %v3061_v52 = vadd.f32 %v4606_v28, %v3060_v19  ;;  %v4614_v28 = vpop.eup %4613  ;;  %4641 = vpow2.f32 %v2830_v23 }
 0x4f4   : > { %4643 = vpow2.f32 %v2832_v55 }
 0x4f5   : > { %v3062_v33 = vadd.f32 %v4608_v50, %v3061_v52  ;;  %v4616_v50 = vpop.eup %4615 }
 0x4f7   : > { %v3063_v41 = vadd.f32 %v4610_v13, %v3062_v33  ;;  %v4618_v13 = vpop.eup %4617 }
 0x4f9   : > { %v3064_v19 = vadd.f32 %v4612_v57, %v3063_v41  ;;  %v4620_v57 = vpop.eup %4619 }
 0x4fb   : > { %v3065_v52 = vadd.f32 %v4614_v28, %v3064_v19  ;;  %v4622_v28 = vpop.eup %4621 }
 0x4fd   : > { %v3066_v33 = vadd.f32 %v4616_v50, %v3065_v52  ;;  %v4624_v50 = vpop.eup %4623 }
 0x4ff   : > { %v3067_v41 = vadd.f32 %v4618_v13, %v3066_v33  ;;  %v4626_v13 = vpop.eup %4625 }
 0x501   : > { %v3068_v19 = vadd.f32 %v4620_v57, %v3067_v41  ;;  %v4628_v57 = vpop.eup %4627 }
 0x503   : > { %v3069_v52 = vadd.f32 %v4622_v28, %v3068_v19  ;;  %v4630_v28 = vpop.eup %4629 }
 0x505   : > { %v3070_v33 = vadd.f32 %v4624_v50, %v3069_v52  ;;  %v4632_v50 = vpop.eup %4631 }
 0x507   : > { %v3071_v41 = vadd.f32 %v4626_v13, %v3070_v33  ;;  %v4634_v13 = vpop.eup %4633 }
 0x508   : > { %v4636_v25 = vpop.eup %4635 }
 0x509   : > { %v3072_v19 = vadd.f32 %v4628_v57, %v3071_v41  ;;  %v6397_v41 = vpop.xlane.xlu0 %2618 }
 0x50a   : > { %v2691_v58 = vsub.f32 %v7563_v60, %v6397_v41 }
 0x50b   : > { %v3073_v52 = vadd.f32 %v4630_v28, %v3072_v19  ;;  %v2834_v19 = vmul.f32 1.442695, %v2656_v45  ;;  %v7562_v28 = vld [vmem:[#allocation43_spill] sm:$0xff]  ;;  %v2838_v45 = vmul.f32 1.442695, %v2658_v17 }
 0x50c   : > { %v2659_v31 = vsub.f32 %v7562_v28, %v6319_v26 }
 0x50d   : > { %v3074_v33 = vadd.f32 %v4632_v50, %v3073_v52  ;;  %v4638_v52 = vpop.eup %4637  ;;  %v2836_v50 = vmul.f32 1.442695, %v2657_v49  ;;  %4645 = vpow2.f32 %v2834_v19  ;;  %v2904_v49 = vmul.f32 1.442695, %v2691_v58  ;;  %v7570_v58 = vld [vmem:[#allocation73_spill] sm:$0xff] }
 0x50e   : > { %v2840_v23 = vmul.f32 1.442695, %v2659_v31  ;;  %v2842_v19 = vmul.f32 1.442695, %v2660_v4  ;;  %v7569_v31 = vld [vmem:[#allocation76_spill] sm:$0xff]  ;;  %v2664_v4 = vsub.f32 %v6036_v38, %v6319_v26 }
 0x50f   : > { %v3075_v57 = vadd.f32 %v4634_v13, %v3074_v33  ;;  %v2692_v33 = vsub.f32 %v7564_v7, %v6397_v41  ;;  %v4640_v13 = vpop.eup %4639  ;;  %4647 = vpow2.f32 %v2836_v50  ;;  %v2663_v50 = vsub.f32 %v6051_v27, %v6319_v26  ;;  %v7574_v38 = vld [vmem:[#allocation84_spill] sm:$0xff] }
 0x510   : > { %v4642_v28 = vpop.eup %4641  ;;  %4649 = vpow2.f32 %v2838_v45 }
 0x511   : > { %v3076_v12 = vadd.f32 %v4636_v25, %v3075_v57  ;;  %v7566_v25 = vld [vmem:[#allocation53_spill] sm:$0xff]  ;;  %v2906_v60 = vmul.f32 1.442695, %v2692_v33  ;;  %v4644_v7 = vpop.eup %4643  ;;  %4651 = vpow2.f32 %v2840_v23  ;;  %v2695_v33 = vsub.f32 %v7570_v58, %v6397_v41 }
 0x512   : > { %v2661_v55 = vsub.f32 %v7566_v25, %v6319_v26  ;;  %4653 = vpow2.f32 %v2904_v49  ;;  %v7571_v23 = vld [vmem:[#allocation77_spill] sm:$0xff]  ;;  %v2848_v49 = vmul.f32 1.442695, %v2663_v50 }
 0x513   : > { %v3077_v2 = vadd.f32 %v4638_v52, %v3076_v12  ;;  %v7567_v12 = vld [vmem:[#allocation71_spill] sm:$0xff]  ;;  %4655 = vpow2.f32 %v2906_v60  ;;  %v2912_v58 = vmul.f32 1.442695, %v2695_v33 }
 0x514   : > { %v2693_v52 = vsub.f32 %v7567_v12, %v6397_v41  ;;  %4657 = vpow2.f32 %v2842_v19 }
 0x515   : > { %v3078_v18 = vadd.f32 %v4640_v13, %v3077_v2  ;;  %v2694_v2 = vsub.f32 %v7569_v31, %v6397_v41  ;;  %v4646_v13 = vpop.eup %4645 }
 0x516   : > { %v2908_v12 = vmul.f32 1.442695, %v2693_v52  ;;  %v4648_v59 = vpop.eup %4647  ;;  %v7572_v52 = vld [vmem:[#allocation80_spill] sm:$0xff] }
 0x517   : > { %v3079_v57 = vadd.f32 %v4642_v28, %v3078_v18  ;;  %v2844_v18 = vmul.f32 1.442695, %v2661_v55  ;;  %v2910_v31 = vmul.f32 1.442695, %v2694_v2  ;;  %v4650_v27 = vpop.eup %4649  ;;  %v2665_v55 = vsub.f32 %v6055_v61, %v6319_v26 }
 0x518   : > { %v2698_v61 = vsub.f32 %v7574_v38, %v6397_v41 }
 0x519   : > { %v3080_v17 = vadd.f32 %v4644_v7, %v3079_v57  ;;  %v2846_v7 = vmul.f32 1.442695, %v2662_v11  ;;  %v2696_v57 = vsub.f32 %v7571_v23, %v6397_v41  ;;  %4659 = vpow2.f32 %v2844_v18  ;;  %v7573_v11 = vld [vmem:[#allocation58_spill] sm:$0xff] }
 0x51a   : > { %4661 = vpow2.f32 %v2908_v12  ;;  %v2852_v12 = vmul.f32 1.442695, %v2665_v55  ;;  %v2918_v55 = vmul.f32 1.442695, %v2698_v61 }
 0x51b   : > { %v3081_v28 = vadd.f32 %v4646_v13, %v3080_v17  ;;  %v4652_v17 = vpop.eup %4651  ;;  %v2697_v13 = vsub.f32 %v7572_v52, %v6397_v41  ;;  %4663 = vpow2.f32 %v2846_v7  ;;  %v2914_v50 = vmul.f32 1.442695, %v2696_v57 }
 0x51c   : > { %v4654_v19 = vpop.eup %4653  ;;  %4665 = vpow2.f32 %v2910_v31 }
 0x51d   : > { %v3082_v45 = vadd.f32 %v4648_v59, %v3081_v28  ;;  %v2666_v59 = vsub.f32 %v7573_v11, %v6319_v26  ;;  %v2850_v28 = vmul.f32 1.442695, %v2664_v4  ;;  %v4656_v2 = vpop.eup %4655  ;;  %4667 = vpow2.f32 %v2848_v49  ;;  %v7576_v11 = vld [vmem:[#allocation85_spill] sm:$0xff] }
 0x51e   : > { %v4658_v18 = vpop.eup %4657  ;;  %4669 = vpow2.f32 %v2912_v58  ;;  %v2916_v7 = vmul.f32 1.442695, %v2697_v13  ;;  %v3118_v31 = vadd.f32 %v4656_v2, %v4654_v19  ;;  %v2669_v49 = vsub.f32 %v6097_v40, %v6319_v26 }
 0x51f   : > { %v3083_v60 = vadd.f32 %v4650_v27, %v3082_v45  ;;  %v2667_v27 = vsub.f32 %v6093_v44, %v6319_v26  ;;  %v7575_v45 = vld [vmem:[#allocation81_spill] sm:$0xff]  ;;  %v4660_v4 = vpop.eup %4659  ;;  %4671 = vpow2.f32 %v2850_v28  ;;  %v2700_v44 = vsub.f32 %v7576_v11, %v6397_v41  ;;  %v7577_v28 = vld [vmem:[#allocation88_spill] sm:$0xff] }
 0x520   : > { %v2699_v52 = vsub.f32 %v7575_v45, %v6397_v41  ;;  %v4662_v57 = vpop.eup %4661  ;;  %4673 = vpow2.f32 %v2914_v50 }
 0x521   : > { %v3084_v23 = vadd.f32 %v4652_v17, %v3083_v60  ;;  %v2668_v17 = vsub.f32 %v6082_v16, %v6319_v26  ;;  %v2854_v60 = vmul.f32 1.442695, %v2666_v59  ;;  %4675 = vpow2.f32 %v2852_v12  ;;  %v7578_v12 = vld [vmem:[#allocation92_spill] sm:$0xff] }
 0x522   : > { %v2856_v58 = vmul.f32 1.442695, %v2667_v27  ;;  %v3119_v13 = vadd.f32 %v4662_v57, %v3118_v31  ;;  %v2701_v59 = vsub.f32 %v7577_v28, %v6397_v41  ;;  %4677 = vpow2.f32 %v2916_v7 }
 0x523   : > { %v3085_v33 = vadd.f32 %v4658_v18, %v3084_v23  ;;  %v4664_v23 = vpop.eup %4663  ;;  %v2920_v19 = vmul.f32 1.442695, %v2699_v52  ;;  %4679 = vpow2.f32 %v2854_v60  ;;  %v2858_v61 = vmul.f32 1.442695, %v2668_v17  ;;  %v7579_v60 = vld [vmem:[#allocation89_spill] sm:$0xff] }
 0x524   : > { %v4666_v18 = vpop.eup %4665  ;;  %v2702_v27 = vsub.f32 %v7578_v12, %v6397_v41  ;;  %4681 = vpow2.f32 %v2918_v55  ;;  %v2922_v31 = vmul.f32 1.442695, %v2700_v44  ;;  %v2671_v57 = vsub.f32 %v6139_v62, %v6319_v26 }
 0x525   : > { %v3086_v38 = vadd.f32 %v4660_v4, %v3085_v33  ;;  %v4668_v2 = vpop.eup %4667  ;;  %v2670_v33 = vsub.f32 %v6116_v35, %v6319_v26  ;;  %v3120_v50 = vadd.f32 %v4666_v18, %v3119_v13  ;;  %4683 = vpow2.f32 %v2856_v58  ;;  %v7580_v58 = vld [vmem:[#allocation93_spill] sm:$0xff] }
 0x526   : > { %v4670_v4 = vpop.eup %4669  ;;  %v2860_v52 = vmul.f32 1.442695, %v2669_v49  ;;  %v2703_v17 = vsub.f32 %v7579_v60, %v6397_v41  ;;  %4685 = vpow2.f32 %v2920_v19  ;;  %v2924_v13 = vmul.f32 1.442695, %v2701_v59 }
 0x527   : > { %v3087_v45 = vadd.f32 %v4664_v23, %v3086_v38  ;;  %v4672_v38 = vpop.eup %4671  ;;  %v3121_v7 = vadd.f32 %v4670_v4, %v3120_v50  ;;  %v2672_v18 = vsub.f32 %v6120_v1, %v6319_v26  ;;  %4687 = vpow2.f32 %v2858_v61  ;;  %v7581_v61 = vld [vmem:[#allocation96_spill] sm:$0xff] }
 0x528   : > { %v4674_v23 = vpop.eup %4673  ;;  %v2862_v44 = vmul.f32 1.442695, %v2670_v33  ;;  %v2704_v49 = vsub.f32 %v7580_v58, %v6397_v41  ;;  %4689 = vpow2.f32 %v2922_v31  ;;  %v2926_v50 = vmul.f32 1.442695, %v2702_v27 }
 0x529   : > { %v3088_v11 = vadd.f32 %v4668_v2, %v3087_v45  ;;  %v4676_v45 = vpop.eup %4675  ;;  %v3122_v55 = vadd.f32 %v4674_v23, %v3121_v7  ;;  %v2673_v4 = vsub.f32 %v6143_v54, %v6319_v26  ;;  %4691 = vpow2.f32 %v2860_v52  ;;  %v7582_v52 = vld [vmem:[#allocation100_spill] sm:$0xff] }
 0x52a   : > { %v4678_v2 = vpop.eup %4677  ;;  %v2864_v59 = vmul.f32 1.442695, %v2671_v57  ;;  %v2705_v33 = vsub.f32 %v7581_v61, %v6397_v41  ;;  %4693 = vpow2.f32 %v2924_v13  ;;  %v2928_v7 = vmul.f32 1.442695, %v2703_v17 }
 0x52b   : > { %v3089_v28 = vadd.f32 %v4672_v38, %v3088_v11  ;;  %v4680_v11 = vpop.eup %4679  ;;  %v3123_v19 = vadd.f32 %v4678_v2, %v3122_v55  ;;  %v2674_v23 = vsub.f32 %v6162_v47, %v6319_v26  ;;  %4695 = vpow2.f32 %v2862_v44  ;;  %v7583_v44 = vld [vmem:[#allocation97_spill] sm:$0xff] }
 0x52c   : > { %v4682_v38 = vpop.eup %4681  ;;  %v2866_v27 = vmul.f32 1.442695, %v2672_v18  ;;  %v2706_v57 = vsub.f32 %v7582_v52, %v6397_v41  ;;  %4697 = vpow2.f32 %v2926_v50  ;;  %v2930_v55 = vmul.f32 1.442695, %v2704_v49 }
 0x52d   : > { %v3090_v12 = vadd.f32 %v4676_v45, %v3089_v28  ;;  %v4684_v28 = vpop.eup %4683  ;;  %v3124_v31 = vadd.f32 %v4682_v38, %v3123_v19  ;;  %v2675_v2 = vsub.f32 %v6177_v37, %v6319_v26  ;;  %4699 = vpow2.f32 %v2864_v59  ;;  %v7584_v59 = vld [vmem:[#allocation101_spill] sm:$0xff] }
 0x52e   : > { %v4686_v45 = vpop.eup %4685  ;;  %v2868_v17 = vmul.f32 1.442695, %v2673_v4  ;;  %v2707_v18 = vsub.f32 %v7583_v44, %v6397_v41  ;;  %4701 = vpow2.f32 %v2928_v7  ;;  %v2932_v19 = vmul.f32 1.442695, %v2705_v33 }
 0x52f   : > { %v3091_v60 = vadd.f32 %v4680_v11, %v3090_v12  ;;  %v4688_v12 = vpop.eup %4687  ;;  %v3125_v13 = vadd.f32 %v4686_v45, %v3124_v31  ;;  %v2676_v38 = vsub.f32 %v6166_v24, %v6319_v26  ;;  %4703 = vpow2.f32 %v2866_v27  ;;  %v7585_v27 = vld [vmem:[#allocation104_spill] sm:$0xff] }
 0x530   : > { %v4690_v11 = vpop.eup %4689  ;;  %v2870_v49 = vmul.f32 1.442695, %v2674_v23  ;;  %v2708_v4 = vsub.f32 %v7584_v59, %v6397_v41  ;;  %4705 = vpow2.f32 %v2930_v55  ;;  %v2934_v31 = vmul.f32 1.442695, %v2706_v57 }
 0x531   : > { %v3092_v58 = vadd.f32 %v4684_v28, %v3091_v60  ;;  %v4692_v60 = vpop.eup %4691  ;;  %v3126_v50 = vadd.f32 %v4690_v11, %v3125_v13  ;;  %v2677_v45 = vsub.f32 %v6181_v56, %v6319_v26  ;;  %4707 = vpow2.f32 %v2868_v17  ;;  %v7586_v17 = vld [vmem:[#allocation16_spill] sm:$0xff] }
 0x532   : > { %v4694_v28 = vpop.eup %4693  ;;  %v2872_v33 = vmul.f32 1.442695, %v2675_v2  ;;  %v2709_v23 = vsub.f32 %v7585_v27, %v6397_v41  ;;  %4709 = vpow2.f32 %v2932_v19  ;;  %v2936_v13 = vmul.f32 1.442695, %v2707_v18 }
 0x533   : > { %v3093_v61 = vadd.f32 %v4688_v12, %v3092_v58  ;;  %v4696_v58 = vpop.eup %4695  ;;  %v3127_v7 = vadd.f32 %v4694_v28, %v3126_v50  ;;  %v2678_v11 = vsub.f32 %v6198_v48, %v6319_v26  ;;  %4711 = vpow2.f32 %v2870_v49  ;;  %v7587_v49 = vld [vmem:[#allocation20_spill] sm:$0xff] }
 0x534   : > { %v4698_v12 = vpop.eup %4697  ;;  %v2874_v57 = vmul.f32 1.442695, %v2676_v38  ;;  %v2710_v2 = vsub.f32 %v7586_v17, %v6397_v41  ;;  %4713 = vpow2.f32 %v2934_v31  ;;  %v2938_v50 = vmul.f32 1.442695, %v2708_v4 }
 0x535   : > { %v3094_v52 = vadd.f32 %v4692_v60, %v3093_v61  ;;  %v4700_v61 = vpop.eup %4699  ;;  %v3128_v55 = vadd.f32 %v4698_v12, %v3127_v7  ;;  %v2679_v28 = vsub.f32 %v6217_v42, %v6319_v26  ;;  %4715 = vpow2.f32 %v2872_v33  ;;  %v7588_v33 = vld [vmem:[#allocation21_spill] sm:$0xff] }
 0x536   : > { %v4702_v60 = vpop.eup %4701  ;;  %v2876_v18 = vmul.f32 1.442695, %v2677_v45  ;;  %v2711_v38 = vsub.f32 %v7587_v49, %v6397_v41  ;;  %4717 = vpow2.f32 %v2936_v13  ;;  %v2940_v7 = vmul.f32 1.442695, %v2709_v23 }
 0x537   : > { %v3095_v44 = vadd.f32 %v4696_v58, %v3094_v52  ;;  %v4704_v52 = vpop.eup %4703  ;;  %v3129_v19 = vadd.f32 %v4702_v60, %v3128_v55  ;;  %v2680_v12 = vsub.f32 %v6202_v21, %v6319_v26  ;;  %4719 = vpow2.f32 %v2874_v57  ;;  %v7589_v57 = vld [vmem:[#allocation18_spill] sm:$0xff] }
 0x538   : > { %v4706_v58 = vpop.eup %4705  ;;  %v2878_v4 = vmul.f32 1.442695, %v2678_v11  ;;  %v2712_v45 = vsub.f32 %v7588_v33, %v6397_v41  ;;  %4721 = vpow2.f32 %v2938_v50  ;;  %v2942_v55 = vmul.f32 1.442695, %v2710_v2 }
 0x539   : > { %v3096_v59 = vadd.f32 %v4700_v61, %v3095_v44  ;;  %v4708_v44 = vpop.eup %4707  ;;  %v3130_v31 = vadd.f32 %v4706_v58, %v3129_v19  ;;  %v2681_v60 = vsub.f32 %v6221_v0, %v6319_v26  ;;  %4723 = vpow2.f32 %v2876_v18  ;;  %v7590_v18 = vld [vmem:[#allocation19_spill] sm:$0xff] }
 0x53a   : > { %v4710_v61 = vpop.eup %4709  ;;  %v2880_v23 = vmul.f32 1.442695, %v2679_v28  ;;  %v2713_v11 = vsub.f32 %v7589_v57, %v6397_v41  ;;  %4725 = vpow2.f32 %v2940_v7  ;;  %v2944_v19 = vmul.f32 1.442695, %v2711_v38 }
 0x53b   : > { %v3097_v27 = vadd.f32 %v4704_v52, %v3096_v59  ;;  %v4712_v59 = vpop.eup %4711  ;;  %v3131_v13 = vadd.f32 %v4710_v61, %v3130_v31  ;;  %v2682_v58 = vsub.f32 %v6238_v15, %v6319_v26  ;;  %4727 = vpow2.f32 %v2878_v4  ;;  %v7591_v4 = vld [vmem:[#allocation107_spill] sm:$0xff] }
 0x53c   : > { %v4714_v52 = vpop.eup %4713  ;;  %v2882_v2 = vmul.f32 1.442695, %v2680_v12  ;;  %v2714_v28 = vsub.f32 %v7590_v18, %v6397_v41  ;;  %4729 = vpow2.f32 %v2942_v55  ;;  %v2946_v31 = vmul.f32 1.442695, %v2712_v45 }
 0x53d   : > { %v3098_v17 = vadd.f32 %v4708_v44, %v3097_v27  ;;  %v4716_v27 = vpop.eup %4715  ;;  %v3132_v50 = vadd.f32 %v4714_v52, %v3131_v13  ;;  %v2683_v61 = vsub.f32 %v6251_v8, %v6319_v26  ;;  %4731 = vpow2.f32 %v2880_v23  ;;  %v7592_v23 = vld [vmem:[#allocation26_spill] sm:$0xff] }
 0x53e   : > { %v4718_v44 = vpop.eup %4717  ;;  %v2884_v38 = vmul.f32 1.442695, %v2681_v60  ;;  %v2715_v12 = vsub.f32 %v7591_v4, %v6397_v41  ;;  %4733 = vpow2.f32 %v2944_v19  ;;  %v2948_v13 = vmul.f32 1.442695, %v2713_v11 }
 0x53f   : > { %v3099_v49 = vadd.f32 %v4712_v59, %v3098_v17  ;;  %v4720_v17 = vpop.eup %4719  ;;  %v3133_v7 = vadd.f32 %v4718_v44, %v3132_v50  ;;  %v2684_v52 = vsub.f32 %v6241_v14, %v6319_v26  ;;  %4735 = vpow2.f32 %v2882_v2  ;;  %v7593_v2 = vld [vmem:[#allocation24_spill] sm:$0xff] }
 0x540   : > { %v4722_v59 = vpop.eup %4721  ;;  %v2886_v45 = vmul.f32 1.442695, %v2682_v58  ;;  %v2716_v60 = vsub.f32 %v7592_v23, %v6397_v41  ;;  %4737 = vpow2.f32 %v2946_v31  ;;  %v2950_v50 = vmul.f32 1.442695, %v2714_v28 }
 0x541   : > { %v3100_v33 = vadd.f32 %v4716_v27, %v3099_v49  ;;  %v4724_v49 = vpop.eup %4723  ;;  %v3134_v55 = vadd.f32 %v4722_v59, %v3133_v7  ;;  %v2685_v44 = vsub.f32 %v6255_v30, %v6319_v26  ;;  %4739 = vpow2.f32 %v2884_v38  ;;  %v7594_v38 = vld [vmem:[#allocation25_spill] sm:$0xff] }
 0x542   : > { %v4726_v27 = vpop.eup %4725  ;;  %v2888_v11 = vmul.f32 1.442695, %v2683_v61  ;;  %v2717_v58 = vsub.f32 %v7593_v2, %v6397_v41  ;;  %4741 = vpow2.f32 %v2948_v13  ;;  %v2952_v7 = vmul.f32 1.442695, %v2715_v12 }
 0x543   : > { %v3101_v57 = vadd.f32 %v4720_v17, %v3100_v33  ;;  %v4728_v33 = vpop.eup %4727  ;;  %v3135_v19 = vadd.f32 %v4726_v27, %v3134_v55  ;;  %v2686_v59 = vsub.f32 %v6272_v9, %v6319_v26  ;;  %4743 = vpow2.f32 %v2886_v45  ;;  %v7595_v45 = vld [vmem:[#allocation32_spill] sm:$0xff] }
 0x544   : > { %v4730_v17 = vpop.eup %4729  ;;  %v2890_v28 = vmul.f32 1.442695, %v2684_v52  ;;  %v2718_v61 = vsub.f32 %v7594_v38, %v6397_v41  ;;  %4745 = vpow2.f32 %v2950_v50  ;;  %v2954_v55 = vmul.f32 1.442695, %v2716_v60 }
 0x545   : > { %v3102_v18 = vadd.f32 %v4724_v49, %v3101_v57  ;;  %v4732_v57 = vpop.eup %4731  ;;  %v3136_v31 = vadd.f32 %v4730_v17, %v3135_v19  ;;  %v2687_v27 = vsub.f32 %v6280_v10, %v6319_v26  ;;  %4747 = vpow2.f32 %v2888_v11  ;;  %v7596_v11 = vld [vmem:[#allocation33_spill] sm:$0xff] }
 0x546   : > { %v4734_v49 = vpop.eup %4733  ;;  %v2892_v12 = vmul.f32 1.442695, %v2685_v44  ;;  %v2719_v52 = vsub.f32 %v7595_v45, %v6397_v41  ;;  %4749 = vpow2.f32 %v2952_v7  ;;  %v2956_v19 = vmul.f32 1.442695, %v2717_v58 }
 0x547   : > { %v3103_v4 = vadd.f32 %v4728_v33, %v3102_v18  ;;  %v4736_v18 = vpop.eup %4735  ;;  %v3137_v13 = vadd.f32 %v4734_v49, %v3136_v31  ;;  %v2688_v17 = vsub.f32 %v6284_v5, %v6319_v26  ;;  %4751 = vpow2.f32 %v2890_v28  ;;  %v7597_v28 = vld [vmem:[#allocation30_spill] sm:$0xff] }
 0x548   : > { %v4738_v33 = vpop.eup %4737  ;;  %v2894_v60 = vmul.f32 1.442695, %v2686_v59  ;;  %v2720_v44 = vsub.f32 %v7596_v11, %v6397_v41  ;;  %4753 = vpow2.f32 %v2954_v55  ;;  %v2958_v31 = vmul.f32 1.442695, %v2718_v61 }
 0x549   : > { %v3104_v23 = vadd.f32 %v4732_v57, %v3103_v4  ;;  %v4740_v4 = vpop.eup %4739  ;;  %v3138_v50 = vadd.f32 %v4738_v33, %v3137_v13  ;;  %v2689_v49 = vsub.f32 %v6287_v29, %v6319_v26  ;;  %4755 = vpow2.f32 %v2892_v12  ;;  %v7598_v12 = vld [vmem:[#allocation31_spill] sm:$0xff] }
 0x54a   : > { %v4742_v57 = vpop.eup %4741  ;;  %v2896_v58 = vmul.f32 1.442695, %v2687_v27  ;;  %v2721_v59 = vsub.f32 %v7597_v28, %v6397_v41  ;;  %4757 = vpow2.f32 %v2956_v19  ;;  %v2960_v13 = vmul.f32 1.442695, %v2719_v52  ;;  %v7599_v28 = vld [vmem:[#allocation40_spill] sm:$0xff] }
 0x54b   : > { %v3105_v2 = vadd.f32 %v4736_v18, %v3104_v23  ;;  %v4744_v23 = vpop.eup %4743  ;;  %v3139_v7 = vadd.f32 %v4742_v57, %v3138_v50  ;;  %v2690_v33 = vsub.f32 %v6294_v20, %v6319_v26  ;;  %4759 = vpow2.f32 %v2894_v60 }
 0x54c   : > { %v4746_v18 = vpop.eup %4745  ;;  %v2898_v61 = vmul.f32 1.442695, %v2688_v17  ;;  %v2722_v27 = vsub.f32 %v7598_v12, %v6397_v41  ;;  %4761 = vpow2.f32 %v2958_v31  ;;  %v2962_v50 = vmul.f32 1.442695, %v2720_v44  ;;  %v7600_v31 = vld [vmem:[#allocation41_spill] sm:$0xff] }
 0x54d   : > { %v3106_v38 = vadd.f32 %v4740_v4, %v3105_v2  ;;  %v4748_v2 = vpop.eup %4747  ;;  %v3140_v55 = vadd.f32 %v4746_v18, %v3139_v7  ;;  %4763 = vpow2.f32 %v2896_v58  ;;  %v2900_v57 = vmul.f32 1.442695, %v2689_v49 }
 0x54e   : > { %v4750_v4 = vpop.eup %4749  ;;  %v2723_v29 = vsub.f32 %v7599_v28, %v6397_v41  ;;  %4765 = vpow2.f32 %v2960_v13  ;;  %v2964_v60 = vmul.f32 1.442695, %v2721_v59  ;;  %v2902_v7 = vmul.f32 1.442695, %v2690_v33 }
 0x54f   : > { %v3107_v45 = vadd.f32 %v4744_v23, %v3106_v38  ;;  %v4752_v38 = vpop.eup %4751  ;;  %v3141_v23 = vadd.f32 %v4750_v4, %v3140_v55  ;;  %4767 = vpow2.f32 %v2898_v61  ;;  %v2724_v44 = vsub.f32 %v7600_v31, %v6397_v41 }
 0x550   : > { %v4754_v19 = vpop.eup %4753  ;;  %4769 = vpow2.f32 %v2962_v50  ;;  %v2966_v58 = vmul.f32 1.442695, %v2722_v27  ;;  %v2968_v59 = vmul.f32 1.442695, %v2723_v29 }
 0x551   : > { %v3108_v11 = vadd.f32 %v4748_v2, %v3107_v45  ;;  %v4756_v17 = vpop.eup %4755  ;;  %v3142_v45 = vadd.f32 %v4754_v19, %v3141_v23  ;;  %4771 = vpow2.f32 %v2900_v57  ;;  %v2970_v27 = vmul.f32 1.442695, %v2724_v44 }
 0x552   : > { %v4758_v18 = vpop.eup %4757  ;;  %4773 = vpow2.f32 %v2964_v60 }
 0x553   : > { %v3109_v52 = vadd.f32 %v4752_v38, %v3108_v11  ;;  %v4760_v49 = vpop.eup %4759  ;;  %v3143_v55 = vadd.f32 %v4758_v18, %v3142_v45  ;;  %v7601_v38 = vld [vmem:[#allocation38_spill] sm:$0xff]  ;;  %4775 = vpow2.f32 %v2902_v7 }
 0x554   : > { %v4762_v11 = vpop.eup %4761  ;;  %v2725_v13 = vsub.f32 %v7601_v38, %v6397_v41  ;;  %4777 = vpow2.f32 %v2966_v58 }
 0x555   : > { %v3110_v2 = vadd.f32 %v4756_v17, %v3109_v52  ;;  %v4764_v61 = vpop.eup %4763  ;;  %v3144_v33 = vadd.f32 %v4762_v11, %v3143_v55  ;;  %v7602_v52 = vld [vmem:[#allocation39_spill] sm:$0xff]  ;;  %4779 = vpow2.f32 %v2968_v59  ;;  %v7604_v11 = vld [vmem:[#allocation49_spill] sm:$0xff] }
 0x556   : > { %v4766_v23 = vpop.eup %4765  ;;  %v2726_v17 = vsub.f32 %v7602_v52, %v6397_v41  ;;  %v2972_v60 = vmul.f32 1.442695, %v2725_v13  ;;  %4781 = vpow2.f32 %v2970_v27 }
 0x557   : > { %v3111_v4 = vadd.f32 %v4760_v49, %v3110_v2  ;;  %v4768_v50 = vpop.eup %4767  ;;  %v3145_v57 = vadd.f32 %v4766_v23, %v3144_v33  ;;  %v7603_v2 = vld [vmem:[#allocation48_spill] sm:$0xff]  ;;  %v7605_v23 = vld [vmem:[#allocation46_spill] sm:$0xff] }
 0x558   : > { %v4770_v45 = vpop.eup %4769  ;;  %v2727_v49 = vsub.f32 %v7603_v2, %v6397_v41  ;;  %4783 = vpow2.f32 %v2972_v60  ;;  %v7608_v60 = vld [vmem:[#allocation57_spill] sm:$0xff] }
 0x559   : > { %v3112_v19 = vadd.f32 %v4764_v61, %v3111_v4  ;;  %v4772_v29 = vpop.eup %4771  ;;  %v3146_v38 = vadd.f32 %v4770_v45, %v3145_v57  ;;  %v2728_v4 = vsub.f32 %v7604_v11, %v6397_v41  ;;  %v2974_v61 = vmul.f32 1.442695, %v2726_v17  ;;  %v7606_v57 = vld [vmem:[#allocation47_spill] sm:$0xff]  ;;  %v7607_v17 = vld [vmem:[#allocation56_spill] sm:$0xff] }
 0x55a   : > { %v4774_v7 = vpop.eup %4773  ;;  %v2730_v45 = vsub.f32 %v7606_v57, %v6397_v41  ;;  %v7609_v57 = vld [vmem:[#allocation54_spill] sm:$0xff] }
 0x55b   : > { %v3113_v18 = vadd.f32 %v4768_v50, %v3112_v19  ;;  %v4776_v58 = vpop.eup %4775  ;;  %v3147_v44 = vadd.f32 %v4774_v7, %v3146_v38  ;;  %v2729_v19 = vsub.f32 %v7605_v23, %v6397_v41  ;;  %v2976_v50 = vmul.f32 1.442695, %v2727_v49 }
 0x55c   : > { %v4778_v52 = vpop.eup %4777  ;;  %4785 = vpow2.f32 %v2974_v61  ;;  %v2731_v38 = vsub.f32 %v7607_v17, %v6397_v41  ;;  %v2732_v49 = vsub.f32 %v7608_v60, %v6397_v41  ;;  %v2733_v61 = vsub.f32 %v7609_v57, %v6397_v41  ;;  %v7610_v17 = vld [vmem:[#allocation55_spill] sm:$0xff]  ;;  %v7611_v60 = vld [vmem:[#allocation108_spill] sm:$0xff]  ;;  %v7612_v57 = vld [vmem:[#allocation109_spill] sm:$0xff] }
 0x55d   : > { %v3114_v55 = vadd.f32 %v4772_v29, %v3113_v18  ;;  %v3148_v59 = vadd.f32 %v4778_v52, %v3147_v44  ;;  %v4780_v13 = vpop.eup %4779  ;;  %v2978_v18 = vmul.f32 1.442695, %v2728_v4  ;;  %4787 = vpow2.f32 %v2976_v50 }
 0x55e   : > { %v4782_v27 = vpop.eup %4781  ;;  %v2980_v7 = vmul.f32 1.442695, %v2729_v19  ;;  %v2982_v52 = vmul.f32 1.442695, %v2730_v45  ;;  %v2984_v4 = vmul.f32 1.442695, %v2731_v38  ;;  %v2734_v50 = vsub.f32 %v7610_v17, %v6397_v41 }
 0x55f   : > { %v3115_v33 = vadd.f32 %v4776_v58, %v3114_v55  ;;  %v3149_v29 = vadd.f32 %v4780_v13, %v3148_v59  ;;  %v4784_v58 = vpop.eup %4783  ;;  %4789 = vpow2.f32 %v2978_v18  ;;  %v2986_v19 = vmul.f32 1.442695, %v2732_v49 }
 0x560   : > { %4791 = vpow2.f32 %v2980_v7  ;;  %v2735_v18 = vsub.f32 %v7611_v60, %v6397_v41  ;;  %v2988_v45 = vmul.f32 1.442695, %v2733_v61  ;;  %v2736_v7 = vsub.f32 %v7612_v57, %v6397_v41  ;;  %v7613_v57 = vld [vmem:[#allocation111_spill] sm:$0xff] }
 0x561   : > { %3116 = vadd.xlane.f32.xlu1 %v3115_v33  ;;  %v3150_v55 = vadd.f32 %v4782_v27, %v3149_v29  ;;  %4793 = vpow2.f32 %v2982_v52  ;;  %v2990_v38 = vmul.f32 1.442695, %v2734_v50  ;;  %v2737_v52 = vsub.f32 %v6125_v43, %v6397_v41  ;;  %v7614_v43 = vld [vmem:[#allocation113_spill] sm:$0xff] }
 0x562   : > { %v4786_v33 = vpop.eup %4785  ;;  %4795 = vpow2.f32 %v2984_v4  ;;  %v2992_v49 = vmul.f32 1.442695, %v2735_v18  ;;  %v2738_v4 = vsub.f32 %v6147_v63, %v6397_v41  ;;  %v2994_v61 = vmul.f32 1.442695, %v2736_v7  ;;  %v7615_v63 = vld [vmem:[#allocation114_spill] sm:$0xff] }
 0x563   : > { %v3151_v44 = vadd.f32 %v4784_v58, %v3150_v55  ;;  %v4788_v13 = vpop.eup %4787  ;;  %4797 = vpow2.f32 %v2986_v19  ;;  %v2739_v19 = vsub.f32 %v7613_v57, %v6397_v41  ;;  %v2996_v50 = vmul.f32 1.442695, %v2737_v52  ;;  %v7616_v57 = vld [vmem:[#allocation116_spill] sm:$0xff] }
 0x564   : > { %4799 = vpow2.f32 %v2988_v45  ;;  %v2740_v45 = vsub.f32 %v7614_v43, %v6397_v41  ;;  %v2998_v18 = vmul.f32 1.442695, %v2738_v4  ;;  %v7617_v43 = vld [vmem:[#allocation115_spill] sm:$0xff] }
 0x565   : > { %v3152_v59 = vadd.f32 %v4786_v33, %v3151_v44  ;;  %v4790_v27 = vpop.eup %4789  ;;  %4801 = vpow2.f32 %v2990_v38  ;;  %v2741_v38 = vsub.f32 %v7615_v63, %v6397_v41  ;;  %v3000_v7 = vmul.f32 1.442695, %v2739_v19  ;;  %v7618_v63 = vld [vmem:[#allocation117_spill] sm:$0xff] }
 0x566   : > { %v4792_v58 = vpop.eup %4791  ;;  %4803 = vpow2.f32 %v2992_v49  ;;  %v2742_v49 = vsub.f32 %v7616_v57, %v6397_v41  ;;  %v3002_v52 = vmul.f32 1.442695, %v2740_v45 }
 0x567   : > { %v3153_v29 = vadd.f32 %v4788_v13, %v3152_v59  ;;  %v4794_v33 = vpop.eup %4793  ;;  %4805 = vpow2.f32 %v2994_v61  ;;  %v2743_v61 = vsub.f32 %v7617_v43, %v6397_v41  ;;  %v3004_v4 = vmul.f32 1.442695, %v2741_v38  ;;  %v7619_v43 = vld [vmem:[#allocation120_spill] sm:$0xff] }
 0x568   : > { %v4796_v13 = vpop.eup %4795  ;;  %4807 = vpow2.f32 %v2996_v50  ;;  %v2744_v50 = vsub.f32 %v7618_v63, %v6397_v41  ;;  %v3006_v19 = vmul.f32 1.442695, %v2742_v49  ;;  %v7620_v63 = vld [vmem:[#allocation119_spill] sm:$0xff] }
 0x569   : > { %v3154_v55 = vadd.f32 %v4790_v27, %v3153_v29  ;;  %v4798_v27 = vpop.eup %4797  ;;  %4809 = vpow2.f32 %v2998_v18  ;;  %v2745_v18 = vsub.f32 %v6207_v51, %v6397_v41  ;;  %v3008_v45 = vmul.f32 1.442695, %v2743_v61  ;;  %v7621_v51 = vld [vmem:[#allocation121_spill] sm:$0xff] }
 0x56a   : > { %4811 = vpow2.f32 %v3000_v7  ;;  %v2746_v7 = vsub.f32 %v7619_v43, %v6397_v41  ;;  %v3010_v38 = vmul.f32 1.442695, %v2744_v50  ;;  %v7622_v43 = vld [vmem:[#allocation122_spill] sm:$0xff] }
 0x56b   : > { %v3155_v44 = vadd.f32 %v4792_v58, %v3154_v55  ;;  %v4800_v58 = vpop.eup %4799  ;;  %4813 = vpow2.f32 %v3002_v52  ;;  %v2747_v52 = vsub.f32 %v7620_v63, %v6397_v41  ;;  %v3012_v49 = vmul.f32 1.442695, %v2745_v18 }
 0x56c   : > { %4815 = vpow2.f32 %v3004_v4  ;;  %v2748_v4 = vsub.f32 %v7621_v51, %v6397_v41  ;;  %v3014_v61 = vmul.f32 1.442695, %v2746_v7 }
 0x56d   : > { %v3156_v59 = vadd.f32 %v4794_v33, %v3155_v44  ;;  %v4802_v33 = vpop.eup %4801  ;;  %4817 = vpow2.f32 %v3006_v19  ;;  %v2749_v19 = vsub.f32 %v7622_v43, %v6397_v41  ;;  %v3016_v50 = vmul.f32 1.442695, %v2747_v52 }
 0x56e   : > { %4819 = vpow2.f32 %v3008_v45  ;;  %v2750_v45 = vsub.f32 %v6258_v53, %v6397_v41  ;;  %v3018_v18 = vmul.f32 1.442695, %v2748_v4 }
 0x56f   : > { %v3157_v29 = vadd.f32 %v4796_v13, %v3156_v59  ;;  %v4804_v13 = vpop.eup %4803  ;;  %4821 = vpow2.f32 %v3010_v38  ;;  %v2751_v38 = vsub.f32 %v6248_v32, %v6397_v41  ;;  %v3020_v7 = vmul.f32 1.442695, %v2749_v19 }
 0x570   : > { %4823 = vpow2.f32 %v3012_v49  ;;  %v2752_v49 = vsub.f32 %v6262_v39, %v6397_v41  ;;  %v3022_v52 = vmul.f32 1.442695, %v2750_v45 }
 0x571   : > { %v3158_v55 = vadd.f32 %v4798_v27, %v3157_v29  ;;  %v4806_v27 = vpop.eup %4805  ;;  %4825 = vpow2.f32 %v3014_v61  ;;  %v2753_v61 = vsub.f32 %v6277_v22, %v6397_v41  ;;  %v3024_v4 = vmul.f32 1.442695, %v2751_v38 }
 0x572   : > { %4827 = vpow2.f32 %v3016_v50  ;;  %v2754_v50 = vsub.f32 %v6289_v3, %v6397_v41  ;;  %v3026_v19 = vmul.f32 1.442695, %v2752_v49 }
 0x573   : > { %v3159_v44 = vadd.f32 %v4800_v58, %v3158_v55  ;;  %v4808_v58 = vpop.eup %4807  ;;  %4829 = vpow2.f32 %v3018_v18  ;;  %v2755_v18 = vsub.f32 %v6282_v6, %v6397_v41  ;;  %v3028_v45 = vmul.f32 1.442695, %v2753_v61  ;;  %v7623_v6 = vld [vmem:[#allocation127_spill] sm:$0xff] }
 0x574   : > { %4831 = vpow2.f32 %v3020_v7  ;;  %v2756_v7 = vsub.f32 %v6292_v46, %v6397_v41  ;;  %v3030_v38 = vmul.f32 1.442695, %v2754_v50  ;;  %v7624_v46 = vld [vmem:[#allocation128_spill] sm:$0xff] }
 0x575   : > { %v3160_v59 = vadd.f32 %v4802_v33, %v3159_v44  ;;  %v4810_v33 = vpop.eup %4809  ;;  %4833 = vpow2.f32 %v3022_v52  ;;  %v2757_v52 = vsub.f32 %v6303_v36, %v6397_v41  ;;  %v3032_v49 = vmul.f32 1.442695, %v2755_v18  ;;  %v7625_v36 = vld [vmem:[#allocation129_spill] sm:$0xff] }
 0x576   : > { %4835 = vpow2.f32 %v3024_v4  ;;  %v2758_v4 = vsub.f32 %v7623_v6, %v6397_v41  ;;  %v3034_v61 = vmul.f32 1.442695, %v2756_v7  ;;  %v7626_v6 = vld [vmem:[#allocation130_spill] sm:$0xff] }
 0x577   : > { %v3161_v29 = vadd.f32 %v4804_v13, %v3160_v59  ;;  %v4812_v13 = vpop.eup %4811  ;;  %4837 = vpow2.f32 %v3026_v19  ;;  %v2759_v19 = vsub.f32 %v7624_v46, %v6397_v41  ;;  %v3036_v50 = vmul.f32 1.442695, %v2757_v52 }
 0x578   : > { %4839 = vpow2.f32 %v3028_v45  ;;  %v2760_v45 = vsub.f32 %v7625_v36, %v6397_v41  ;;  %v3038_v18 = vmul.f32 1.442695, %v2758_v4 }
 0x579   : > { %v3162_v55 = vadd.f32 %v4806_v27, %v3161_v29  ;;  %v4814_v27 = vpop.eup %4813  ;;  %4841 = vpow2.f32 %v3030_v38  ;;  %v2761_v38 = vsub.f32 %v7626_v6, %v6397_v41  ;;  %v3040_v7 = vmul.f32 1.442695, %v2759_v19 }
 0x57a   : > { %4843 = vpow2.f32 %v3032_v49  ;;  %v3042_v46 = vmul.f32 1.442695, %v2760_v45 }
 0x57b   : > { %v3163_v44 = vadd.f32 %v4808_v58, %v3162_v55  ;;  %v4816_v58 = vpop.eup %4815  ;;  %4845 = vpow2.f32 %v3034_v61 }
 0x57c   : > { %4847 = vpow2.f32 %v3036_v50 }
 0x57d   : > { %v3164_v59 = vadd.f32 %v4810_v33, %v3163_v44  ;;  %v4818_v33 = vpop.eup %4817  ;;  %4849 = vpow2.f32 %v3038_v18 }
 0x57f   : > { %v3165_v29 = vadd.f32 %v4812_v13, %v3164_v59  ;;  %v4820_v13 = vpop.eup %4819  ;;  %4851 = vpow2.f32 %v3040_v7  ;;  %v7627_v7 = vld [vmem:[#allocation60_spill] sm:$0xff] }
 0x581   : > { %v3166_v55 = vadd.f32 %v4814_v27, %v3165_v29  ;;  %v4822_v27 = vpop.eup %4821  ;;  %4853 = vpow2.f32 %v3042_v46 }
 0x583   : > { %v3167_v44 = vadd.f32 %v4816_v58, %v3166_v55  ;;  %v4824_v58 = vpop.eup %4823 }
 0x585   : > { %v3168_v59 = vadd.f32 %v4818_v33, %v3167_v44  ;;  %v4826_v33 = vpop.eup %4825 }
 0x587   : > { %v3169_v29 = vadd.f32 %v4820_v13, %v3168_v59  ;;  %v4828_v13 = vpop.eup %4827 }
 0x589   : > { %v3170_v55 = vadd.f32 %v4822_v27, %v3169_v29  ;;  %v4830_v27 = vpop.eup %4829 }
 0x58b   : > { %v3171_v44 = vadd.f32 %v4824_v58, %v3170_v55  ;;  %v4832_v58 = vpop.eup %4831 }
 0x58d   : > { %v3172_v59 = vadd.f32 %v4826_v33, %v3171_v44  ;;  %v4834_v33 = vpop.eup %4833 }
 0x58f   : > { %v3173_v29 = vadd.f32 %v4828_v13, %v3172_v59  ;;  %v4836_v13 = vpop.eup %4835 }
 0x591   : > { %v3174_v55 = vadd.f32 %v4830_v27, %v3173_v29  ;;  %v4838_v27 = vpop.eup %4837 }
 0x593   : > { %v3175_v44 = vadd.f32 %v4832_v58, %v3174_v55  ;;  %v4840_v58 = vpop.eup %4839 }
 0x595   : > { %v3176_v59 = vadd.f32 %v4834_v33, %v3175_v44  ;;  %v4842_v33 = vpop.eup %4841 }
 0x597   : > { %v3177_v29 = vadd.f32 %v4836_v13, %v3176_v59  ;;  %v4844_v13 = vpop.eup %4843 }
 0x598   : > { %v4846_v52 = vpop.eup %4845 }
 0x599   : > { %v3178_v55 = vadd.f32 %v4838_v27, %v3177_v29  ;;  %v3044_v29 = vmul.f32 1.442695, %v2761_v38  ;;  %v4848_v36 = vpop.eup %4847 }
 0x59a   : > { %v4850_v61 = vpop.eup %4849 }
 0x59b   : > { %v3179_v44 = vadd.f32 %v4840_v58, %v3178_v55  ;;  %4855 = vpow2.f32 %v3044_v29  ;;  %v4852_v50 = vpop.eup %4851 }
 0x59c   : > { %v4854_v58 = vpop.eup %4853 }
 0x59d   : > { %v3180_v59 = vadd.f32 %v4842_v33, %v3179_v44 }
 0x59f   : > { %v3181_v49 = vadd.f32 %v4844_v13, %v3180_v59  ;;  %v7628_v13 = vld [vmem:[#allocation62_spill] sm:$0xff] }
 0x5a1   : > { %v3182_v27 = vadd.f32 %v4846_v52, %v3181_v49  ;;  %v4856_v18 = vpop.eup %4855  ;;  %v7629_v52 = vld [vmem:[#allocation61_spill] sm:$0xff] }
 0x5a3   : > { %v3183_v4 = vadd.f32 %v4848_v36, %v3182_v27  ;;  %v7630_v27 = vld [vmem:[#allocation66_spill] sm:$0xff] }
 0x5a5   : > { %v3184_v55 = vadd.f32 %v4850_v61, %v3183_v4  ;;  %v7631_v61 = vld [vmem:[#allocation63_spill] sm:$0xff] }
 0x5a7   : > { %v3185_v19 = vadd.f32 %v4852_v50, %v3184_v55 }
 0x5a9   : > { %v3186_v44 = vadd.f32 %v4854_v58, %v3185_v19  ;;  %v7633_v19 = vld [vmem:[#allocation69_spill] sm:$0xff] }
 0x5ab   : > { %v3187_v45 = vadd.f32 %v4856_v18, %v3186_v44  ;;  %v7634_v44 = vld [vmem:[#allocation74_spill] sm:$0xff] }
 0x5ad   : > { %3188 = vadd.xlane.f32.xlu2 %v3187_v45  ;;  %v7635_v45 = vld [vmem:[#allocation70_spill] sm:$0xff] }
 0x5d4   : > { %v3117_v33 = vpop.xlane.xlu1 %3116 }
 0x5d5   : > { %4857 = vlog2.f32 %v3117_v33 }
 0x5db   : > { %v4858_v38 = vpop.eup %4857 }
 0x5dc   : > { %v3191_v46 = vmul.f32 0.6931472, %v4858_v38  ;;  %v7636_v38 = vld [vmem:[#allocation75_spill] sm:$0xff] }
 0x5de   : > { %v6616_v36 = vadd.f32 %v3191_v46, %v6319_v26  ;;  %v7632_v26 = vld [vmem:[#allocation67_spill] sm:$0xff] }
 0x5e0   : > { %v3196_v59 = vsub.f32 %v7627_v7, %v6616_v36  ;;  %v3197_v49 = vsub.f32 %v7628_v13, %v6616_v36  ;;  %v3198_v29 = vsub.f32 %v7629_v52, %v6616_v36  ;;  %3481 = vst.msk [vmem:[%s6613_s30] sm:$0xff] %vm3480_vm4, %v6616_v36  ;;  %v3199_v4 = vsub.f32 %v7630_v27, %v6616_v36  ;;  %v7637_v7 = vld [vmem:[#allocation78_spill] sm:$0xff]  ;;  %v7639_v52 = vld [vmem:[#allocation79_spill] sm:$0xff] }
 0x5e1   : > { %v3200_v55 = vsub.f32 %v7631_v61, %v6616_v36  ;;  %v3201_v50 = vsub.f32 %v7632_v26, %v6616_v36  ;;  %v3202_v58 = vsub.f32 %v7633_v19, %v6616_v36  ;;  %v3203_v18 = vsub.f32 %v7634_v44, %v6616_v36  ;;  %v7638_v13 = vld [vmem:[#allocation82_spill] sm:$0xff]  ;;  %v7640_v27 = vld [vmem:[#allocation83_spill] sm:$0xff] }
 0x5e2   : > { %3338 = vst [vmem:[%s6631_s8] sm:$0xff] %v3196_v59  ;;  %v3204_v33 = vsub.f32 %v7635_v45, %v6616_v36  ;;  %v3205_v46 = vsub.f32 %v7636_v38, %v6616_v36  ;;  %v3206_v59 = vsub.f32 %v7637_v7, %v6616_v36  ;;  %v7641_v61 = vld [vmem:[#allocation86_spill] sm:$0xff]  ;;  %v7643_v19 = vld [vmem:[#allocation87_spill] sm:$0xff] }
 0x5e3   : > { %3339 = vst [vmem:[%s6631_s8 + $0x8] sm:$0xff] %v3197_v49  ;;  %v3207_v49 = vsub.f32 %v7638_v13, %v6616_v36  ;;  %v7642_v26 = vld [vmem:[#allocation90_spill] sm:$0xff]  ;;  %v7644_v44 = vld [vmem:[#allocation91_spill] sm:$0xff] }
 0x5e4   : > { %3340 = vst [vmem:[%s6631_s8 + $0x10] sm:$0xff] %v3198_v29  ;;  %v3208_v29 = vsub.f32 %v7639_v52, %v6616_v36  ;;  %v7645_v45 = vld [vmem:[#allocation94_spill] sm:$0xff]  ;;  %v7647_v7 = vld [vmem:[#allocation95_spill] sm:$0xff] }
 0x5e5   : > { %3341 = vst [vmem:[%s6631_s8 + $0x18] sm:$0xff] %v3199_v4  ;;  %v3209_v4 = vsub.f32 %v7640_v27, %v6616_v36  ;;  %v7646_v38 = vld [vmem:[#allocation98_spill] sm:$0xff]  ;;  %v7648_v13 = vld [vmem:[#allocation99_spill] sm:$0xff]  ;;  %v7650_v27 = vld [vmem:[#allocation17_spill] sm:$0xff] }
 0x5e6   : > { %3342 = vst [vmem:[%s6631_s8 + $0x20] sm:$0xff] %v3200_v55  ;;  %v3210_v55 = vsub.f32 %v7641_v61, %v6616_v36  ;;  %v7649_v52 = vld [vmem:[#allocation102_spill] sm:$0xff]  ;;  %v7651_v61 = vld [vmem:[#allocation103_spill] sm:$0xff] }
 0x5e7   : > { %3343 = vst [vmem:[%s6631_s8 + $0x28] sm:$0xff] %v3201_v50  ;;  %v3211_v50 = vsub.f32 %v7642_v26, %v6616_v36  ;;  %v7652_v26 = vld [vmem:[#allocation105_spill] sm:$0xff] }
 0x5e8   : > { %3344 = vst [vmem:[%s6631_s8 + $0x30] sm:$0xff] %v3202_v58  ;;  %v3212_v58 = vsub.f32 %v7643_v19, %v6616_v36  ;;  %v7653_v19 = vld [vmem:[#allocation22_spill] sm:$0xff] }
 0x5e9   : > { %3345 = vst [vmem:[%s6631_s8 + $0x38] sm:$0xff] %v3203_v18  ;;  %v3213_v18 = vsub.f32 %v7644_v44, %v6616_v36  ;;  %v7654_v44 = vld [vmem:[#allocation23_spill] sm:$0xff] }
 0x5ea   : > { %3346 = vst [vmem:[%s6631_s8 + $0x40] sm:$0xff] %v3204_v33  ;;  %v3214_v33 = vsub.f32 %v7645_v45, %v6616_v36  ;;  %v7655_v45 = vld [vmem:[#allocation106_spill] sm:$0xff] }
 0x5eb   : > { %3347 = vst [vmem:[%s6631_s8 + $0x48] sm:$0xff] %v3205_v46  ;;  %v3215_v46 = vsub.f32 %v7646_v38, %v6616_v36  ;;  %v7656_v38 = vld [vmem:[#allocation29_spill] sm:$0xff] }
 0x5ec   : > { %3348 = vst [vmem:[%s6631_s8 + $0x50] sm:$0xff] %v3206_v59  ;;  %v3216_v59 = vsub.f32 %v7647_v7, %v6616_v36  ;;  %v7657_v7 = vld [vmem:[#allocation27_spill] sm:$0xff] }
 0x5ed   : > { %3349 = vst [vmem:[%s6631_s8 + $0x58] sm:$0xff] %v3207_v49  ;;  %v3217_v49 = vsub.f32 %v7648_v13, %v6616_v36  ;;  %v7658_v13 = vld [vmem:[#allocation28_spill] sm:$0xff] }
 0x5ee   : > { %3350 = vst [vmem:[%s6631_s8 + $0x60] sm:$0xff] %v3208_v29  ;;  %v3218_v29 = vsub.f32 %v7649_v52, %v6616_v36  ;;  %v7659_v52 = vld [vmem:[#allocation36_spill] sm:$0xff] }
 0x5ef   : > { %3351 = vst [vmem:[%s6631_s8 + $0x68] sm:$0xff] %v3209_v4  ;;  %v3219_v4 = vsub.f32 %v7650_v27, %v6616_v36  ;;  %v7660_v27 = vld [vmem:[#allocation37_spill] sm:$0xff] }
 0x5f0   : > { %3352 = vst [vmem:[%s6631_s8 + $0x70] sm:$0xff] %v3210_v55  ;;  %v3220_v55 = vsub.f32 %v7651_v61, %v6616_v36  ;;  %v7661_v61 = vld [vmem:[#allocation34_spill] sm:$0xff] }
 0x5f1   : > { %3353 = vst [vmem:[%s6631_s8 + $0x78] sm:$0xff] %v3211_v50  ;;  %v3221_v50 = vsub.f32 %v7652_v26, %v6616_v36  ;;  %v7662_v26 = vld [vmem:[#allocation35_spill] sm:$0xff] }
 0x5f2   : > { %3354 = vst [vmem:[%s6631_s8 + $0x80] sm:$0xff] %v3212_v58  ;;  %v3222_v58 = vsub.f32 %v7653_v19, %v6616_v36  ;;  %v7663_v19 = vld [vmem:[#allocation44_spill] sm:$0xff] }
 0x5f3   : > { %3355 = vst [vmem:[%s6631_s8 + $0x88] sm:$0xff] %v3213_v18  ;;  %v3223_v18 = vsub.f32 %v7654_v44, %v6616_v36  ;;  %v7664_v44 = vld [vmem:[#allocation45_spill] sm:$0xff] }
 0x5f4   : > { %3356 = vst [vmem:[%s6631_s8 + $0x90] sm:$0xff] %v3214_v33  ;;  %v3224_v33 = vsub.f32 %v7655_v45, %v6616_v36  ;;  %v7665_v45 = vld [vmem:[#allocation42_spill] sm:$0xff] }
 0x5f5   : > { %3357 = vst [vmem:[%s6631_s8 + $0x98] sm:$0xff] %v3215_v46  ;;  %v3225_v46 = vsub.f32 %v7656_v38, %v6616_v36  ;;  %v7666_v38 = vld [vmem:[#allocation43_spill] sm:$0xff] }
 0x5f6   : > { %3358 = vst [vmem:[%s6631_s8 + $0xa0] sm:$0xff] %v3216_v59  ;;  %v3226_v59 = vsub.f32 %v7657_v7, %v6616_v36  ;;  %v3236_v7 = vsub.f32 %v7565_v34, %v6616_v36 }
 0x5f7   : > { %3359 = vst [vmem:[%s6631_s8 + $0xa8] sm:$0xff] %v3217_v49  ;;  %v3227_v49 = vsub.f32 %v7658_v13, %v6616_v36  ;;  %v7667_v13 = vld [vmem:[#allocation50_spill] sm:$0xff] }
 0x5f8   : > { %3360 = vst [vmem:[%s6631_s8 + $0xb0] sm:$0xff] %v3218_v29  ;;  %v3228_v29 = vsub.f32 %v7659_v52, %v6616_v36  ;;  %v7668_v52 = vld [vmem:[#allocation51_spill] sm:$0xff] }
 0x5f9   : > { %3361 = vst [vmem:[%s6631_s8 + $0xb8] sm:$0xff] %v3219_v4  ;;  %v3229_v4 = vsub.f32 %v7660_v27, %v6616_v36  ;;  %v7669_v27 = vld [vmem:[#allocation64_spill] sm:$0xff] }
 0x5fa   : > { %3362 = vst [vmem:[%s6631_s8 + $0xc0] sm:$0xff] %v3220_v55  ;;  %v3230_v55 = vsub.f32 %v7661_v61, %v6616_v36  ;;  %v3240_v34 = vsub.f32 %v7669_v27, %v6616_v36  ;;  %v7671_v61 = vld [vmem:[#allocation58_spill] sm:$0xff]  ;;  %v7679_v27 = vld [vmem:[#allocation77_spill] sm:$0xff] }
 0x5fb   : > { %3363 = vst [vmem:[%s6631_s8 + $0xc8] sm:$0xff] %v3221_v50  ;;  %v3231_v50 = vsub.f32 %v7662_v26, %v6616_v36  ;;  %v7672_v26 = vld [vmem:[#allocation59_spill] sm:$0xff] }
 0x5fc   : > { %3364 = vst [vmem:[%s6631_s8 + $0xd0] sm:$0xff] %v3222_v58  ;;  %v3232_v58 = vsub.f32 %v7663_v19, %v6616_v36  ;;  %v3244_v19 = vsub.f32 %v6082_v16, %v6616_v36  ;;  %v3248_v16 = vsub.f32 %v6120_v1, %v6616_v36  ;;  %v3252_v1 = vsub.f32 %v6166_v24, %v6616_v36 }
 0x5fd   : > { %3365 = vst [vmem:[%s6631_s8 + $0xd8] sm:$0xff] %v3223_v18  ;;  %v3233_v18 = vsub.f32 %v7664_v44, %v6616_v36  ;;  %v3246_v44 = vsub.f32 %v6116_v35, %v6616_v36  ;;  %v3250_v35 = vsub.f32 %v6162_v47, %v6616_v36  ;;  %v3254_v47 = vsub.f32 %v6198_v48, %v6616_v36 }
 0x5fe   : > { %3366 = vst [vmem:[%s6631_s8 + $0xe0] sm:$0xff] %v3224_v33  ;;  %v3234_v33 = vsub.f32 %v7665_v45, %v6616_v36  ;;  %v3256_v24 = vsub.f32 %v6202_v21, %v6616_v36  ;;  %v3258_v45 = vsub.f32 %v6238_v15, %v6616_v36  ;;  %v3259_v48 = vsub.f32 %v6251_v8, %v6616_v36  ;;  %v7673_v8 = vld [vmem:[#allocation124_spill] sm:$0xff] }
 0x5ff   : > { %3367 = vst [vmem:[%s6631_s8 + $0xe8] sm:$0xff] %v3225_v46  ;;  %v3235_v46 = vsub.f32 %v7666_v38, %v6616_v36  ;;  %v3261_v21 = vsub.f32 %v6255_v30, %v6616_v36  ;;  %v3263_v15 = vsub.f32 %v6280_v10, %v6616_v36  ;;  %v3266_v38 = vsub.f32 %v6294_v20, %v6616_v36  ;;  %v7675_v20 = vld [vmem:[#allocation72_spill] sm:$0xff] }
 0x600   : > { %3368 = vst [vmem:[%s6631_s8 + $0xf0] sm:$0xff] %v3226_v59  ;;  %v3237_v59 = vsub.f32 %v7566_v25, %v6616_v36 }
 0x601   : > { %3369 = vst [vmem:[%s6631_s8 + $0xf8] sm:$0xff] %v3227_v49  ;;  %v3238_v49 = vsub.f32 %v7667_v13, %v6616_v36 }
 0x602   : > { %3370 = vst [vmem:[%s6631_s8 + $0x100] sm:$0xff] %v3228_v29  ;;  %v3239_v29 = vsub.f32 %v7668_v52, %v6616_v36 }
 0x603   : > { %3371 = vst [vmem:[%s6631_s8 + $0x108] sm:$0xff] %v3229_v4  ;;  %v7670_v4 = vld [vmem:[#allocation65_spill] sm:$0xff] }
 0x604   : > { %3372 = vst [vmem:[%s6631_s8 + $0x110] sm:$0xff] %v3230_v55  ;;  %v3241_v25 = vsub.f32 %v7670_v4, %v6616_v36  ;;  %v3242_v55 = vsub.f32 %v7671_v61, %v6616_v36  ;;  %v7680_v4 = vld [vmem:[#allocation80_spill] sm:$0xff] }
 0x605   : > { %3373 = vst [vmem:[%s6631_s8 + $0x118] sm:$0xff] %v3231_v50  ;;  %v3243_v50 = vsub.f32 %v7672_v26, %v6616_v36  ;;  %v7681_v61 = vld [vmem:[#allocation84_spill] sm:$0xff]  ;;  %v7682_v26 = vld [vmem:[#allocation81_spill] sm:$0xff] }
 0x606   : > { %3374 = vst [vmem:[%s6631_s8 + $0x120] sm:$0xff] %v3232_v58  ;;  %v3245_v58 = vsub.f32 %v6097_v40, %v6616_v36  ;;  %v3249_v40 = vsub.f32 %v6143_v54, %v6616_v36  ;;  %v3253_v54 = vsub.f32 %v6181_v56, %v6616_v36  ;;  %v3257_v56 = vsub.f32 %v6221_v0, %v6616_v36 }
 0x607   : > { %3375 = vst [vmem:[%s6631_s8 + $0x128] sm:$0xff] %v3233_v18  ;;  %v3247_v18 = vsub.f32 %v6139_v62, %v6616_v36  ;;  %v3251_v62 = vsub.f32 %v6177_v37, %v6616_v36  ;;  %v3255_v37 = vsub.f32 %v6217_v42, %v6616_v36  ;;  %v3260_v42 = vsub.f32 %v6241_v14, %v6616_v36 }
 0x608   : > { %3376 = vst [vmem:[%s6631_s8 + $0x130] sm:$0xff] %v3234_v33  ;;  %v3262_v0 = vsub.f32 %v6272_v9, %v6616_v36  ;;  %v3264_v14 = vsub.f32 %v6284_v5, %v6616_v36  ;;  %v3265_v33 = vsub.f32 %v7673_v8, %v6616_v36 }
 0x609   : > { %3377 = vst [vmem:[%s6631_s8 + $0x138] sm:$0xff] %v3235_v46  ;;  %v7674_v46 = vld [vmem:[#allocation68_spill] sm:$0xff] }
 0x60a   : > { %3378 = vst [vmem:[%s6631_s8 + $0x140] sm:$0xff] %v3236_v7 }
 0x60b   : > { %3379 = vst [vmem:[%s6631_s8 + $0x148] sm:$0xff] %v3237_v59  ;;  %v7676_v59 = vld [vmem:[#allocation71_spill] sm:$0xff] }
 0x60c   : > { %3380 = vst [vmem:[%s6631_s8 + $0x150] sm:$0xff] %v3238_v49  ;;  %v7677_v49 = vld [vmem:[#allocation76_spill] sm:$0xff] }
 0x60d   : > { %3381 = vst [vmem:[%s6631_s8 + $0x158] sm:$0xff] %v3239_v29 }
 0x60e   : > { %3382 = vst [vmem:[%s6631_s8 + $0x160] sm:$0xff] %v3240_v34 }
 0x60f   : > { %3383 = vst [vmem:[%s6631_s8 + $0x168] sm:$0xff] %v3241_v25 }
 0x610   : > { %3384 = vst [vmem:[%s6631_s8 + $0x170] sm:$0xff] %v3242_v55 }
 0x611   : > { %3385 = vst [vmem:[%s6631_s8 + $0x178] sm:$0xff] %v3243_v50 }
 0x612   : > { %3386 = vst [vmem:[%s6631_s8 + $0x180] sm:$0xff] %v3244_v19  ;;  %v7683_v19 = vld [vmem:[#allocation85_spill] sm:$0xff] }
 0x613   : > { %3387 = vst [vmem:[%s6631_s8 + $0x188] sm:$0xff] %v3245_v58 }
 0x614   : > { %3388 = vst [vmem:[%s6631_s8 + $0x190] sm:$0xff] %v3246_v44  ;;  %v7684_v44 = vld [vmem:[#allocation88_spill] sm:$0xff] }
 0x615   : > { %3389 = vst [vmem:[%s6631_s8 + $0x198] sm:$0xff] %v3247_v18 }
 0x616   : > { %3390 = vst [vmem:[%s6631_s8 + $0x1a0] sm:$0xff] %v3248_v16  ;;  %v7685_v16 = vld [vmem:[#allocation92_spill] sm:$0xff] }
 0x617   : > { %3391 = vst [vmem:[%s6631_s8 + $0x1a8] sm:$0xff] %v3249_v40 }
 0x618   : > { %3392 = vst [vmem:[%s6631_s8 + $0x1b0] sm:$0xff] %v3250_v35  ;;  %v7686_v35 = vld [vmem:[#allocation89_spill] sm:$0xff] }
 0x619   : > { %3393 = vst [vmem:[%s6631_s8 + $0x1b8] sm:$0xff] %v3251_v62 }
 0x61a   : > { %3394 = vst [vmem:[%s6631_s8 + $0x1c0] sm:$0xff] %v3252_v1  ;;  %v7687_v1 = vld [vmem:[#allocation93_spill] sm:$0xff] }
 0x61b   : > { %3395 = vst [vmem:[%s6631_s8 + $0x1c8] sm:$0xff] %v3253_v54 }
 0x61c   : > { %3396 = vst [vmem:[%s6631_s8 + $0x1d0] sm:$0xff] %v3254_v47  ;;  %v7688_v47 = vld [vmem:[#allocation96_spill] sm:$0xff] }
 0x61d   : > { %3397 = vst [vmem:[%s6631_s8 + $0x1d8] sm:$0xff] %v3255_v37 }
 0x61e   : > { %3398 = vst [vmem:[%s6631_s8 + $0x1e0] sm:$0xff] %v3256_v24  ;;  %v7689_v24 = vld [vmem:[#allocation100_spill] sm:$0xff] }
 0x61f   : > { %3399 = vst [vmem:[%s6631_s8 + $0x1e8] sm:$0xff] %v3257_v56 }
 0x620   : > { %3400 = vst [vmem:[%s6631_s8 + $0x1f0] sm:$0xff] %v3258_v45  ;;  %v3189_v30 = vpop.xlane.xlu2 %3188  ;;  %v7690_v45 = vld [vmem:[#allocation97_spill] sm:$0xff] }
 0x621   : > { %3401 = vst [vmem:[%s6631_s8 + $0x1f8] sm:$0xff] %v3259_v48  ;;  %4859 = vlog2.f32 %v3189_v30 }
 0x622   : > { %3402 = vst [vmem:[%s6631_s8 + $0x200] sm:$0xff] %v3260_v42  ;;  %v7691_v42 = vld [vmem:[#allocation101_spill] sm:$0xff] }
 0x623   : > { %3403 = vst [vmem:[%s6631_s8 + $0x208] sm:$0xff] %v3261_v21 }
 0x624   : > { %3404 = vst [vmem:[%s6631_s8 + $0x210] sm:$0xff] %v3262_v0  ;;  %v7692_v0 = vld [vmem:[#allocation104_spill] sm:$0xff] }
 0x625   : > { %3405 = vst [vmem:[%s6631_s8 + $0x218] sm:$0xff] %v3263_v15 }
 0x626   : > { %3406 = vst [vmem:[%s6631_s8 + $0x220] sm:$0xff] %v3264_v14  ;;  %v7693_v14 = vld [vmem:[#allocation16_spill] sm:$0xff] }
 0x627   : > { %3407 = vst [vmem:[%s6631_s8 + $0x228] sm:$0xff] %v3265_v33  ;;  %v4860_v10 = vpop.eup %4859  ;;  %v7694_v33 = vld [vmem:[#allocation20_spill] sm:$0xff] }
 0x628   : > { %3408 = vst [vmem:[%s6631_s8 + $0x230] sm:$0xff] %v3266_v38  ;;  %v3193_v9 = vmul.f32 0.6931472, %v4860_v10  ;;  %v7695_v38 = vld [vmem:[#allocation21_spill] sm:$0xff] }
 0x62a   : > { %v6837_v5 = vadd.f32 %v3193_v9, %v6397_v41  ;;  %v7678_v41 = vld [vmem:[#allocation73_spill] sm:$0xff]  ;;  %v7696_v9 = vld [vmem:[#allocation18_spill] sm:$0xff] }
 0x62c   : > { %v3267_v7 = vsub.f32 %v7674_v46, %v6837_v5  ;;  %v3268_v36 = vsub.f32 %v7675_v20, %v6837_v5  ;;  %v3269_v13 = vsub.f32 %v7676_v59, %v6837_v5  ;;  %3482 = vst.msk [vmem:[%s6613_s30 + $0x8] sm:$0xff] %vm3480_vm4, %v6837_v5  ;;  %v3270_v52 = vsub.f32 %v7677_v49, %v6837_v5 }
 0x62d   : > { %v3271_v29 = vsub.f32 %v7678_v41, %v6837_v5  ;;  %v3272_v34 = vsub.f32 %v7679_v27, %v6837_v5  ;;  %v3273_v25 = vsub.f32 %v7680_v4, %v6837_v5  ;;  %v3274_v55 = vsub.f32 %v7681_v61, %v6837_v5 }
 0x62e   : > { %3409 = vst [vmem:[%s6631_s8 + $0x238] sm:$0xff] %v3267_v7  ;;  %v3275_v50 = vsub.f32 %v7682_v26, %v6837_v5  ;;  %v3276_v58 = vsub.f32 %v7683_v19, %v6837_v5  ;;  %v3277_v18 = vsub.f32 %v7684_v44, %v6837_v5  ;;  %v3278_v40 = vsub.f32 %v7685_v16, %v6837_v5  ;;  %v7697_v7 = vld [vmem:[#allocation19_spill] sm:$0xff]  ;;  %v7705_v44 = vld [vmem:[#allocation38_spill] sm:$0xff] }
 0x62f   : > { %3410 = vst [vmem:[%s6631_s8 + $0x240] sm:$0xff] %v3268_v36  ;;  %v3279_v62 = vsub.f32 %v7686_v35, %v6837_v5  ;;  %v3280_v54 = vsub.f32 %v7687_v1, %v6837_v5  ;;  %v3281_v37 = vsub.f32 %v7688_v47, %v6837_v5  ;;  %v3282_v56 = vsub.f32 %v7689_v24, %v6837_v5  ;;  %v7698_v36 = vld [vmem:[#allocation107_spill] sm:$0xff]  ;;  %v7708_v1 = vld [vmem:[#allocation56_spill] sm:$0xff]  ;;  %v7710_v47 = vld [vmem:[#allocation54_spill] sm:$0xff] }
 0x630   : > { %3411 = vst [vmem:[%s6631_s8 + $0x248] sm:$0xff] %v3269_v13  ;;  %v3283_v48 = vsub.f32 %v7690_v45, %v6837_v5  ;;  %v3284_v21 = vsub.f32 %v7691_v42, %v6837_v5  ;;  %v3285_v15 = vsub.f32 %v7692_v0, %v6837_v5  ;;  %v3286_v8 = vsub.f32 %v7693_v14, %v6837_v5  ;;  %v7699_v13 = vld [vmem:[#allocation26_spill] sm:$0xff]  ;;  %v7706_v16 = vld [vmem:[#allocation39_spill] sm:$0xff] }
 0x631   : > { %3412 = vst [vmem:[%s6631_s8 + $0x250] sm:$0xff] %v3270_v52  ;;  %v3287_v30 = vsub.f32 %v7694_v33, %v6837_v5  ;;  %v3288_v10 = vsub.f32 %v7695_v38, %v6837_v5  ;;  %v3289_v46 = vsub.f32 %v7696_v9, %v6837_v5  ;;  %v3290_v20 = vsub.f32 %v7697_v7, %v6837_v5  ;;  %v7700_v52 = vld [vmem:[#allocation24_spill] sm:$0xff]  ;;  %v7707_v35 = vld [vmem:[#allocation47_spill] sm:$0xff]  ;;  %v7718_v9 = vld [vmem:[#allocation117_spill] sm:$0xff] }
 0x632   : > { %3413 = vst [vmem:[%s6631_s8 + $0x258] sm:$0xff] %v3271_v29  ;;  %v3291_v59 = vsub.f32 %v7698_v36, %v6837_v5  ;;  %v3292_v49 = vsub.f32 %v7699_v13, %v6837_v5  ;;  %v3293_v41 = vsub.f32 %v7700_v52, %v6837_v5  ;;  %v7701_v29 = vld [vmem:[#allocation25_spill] sm:$0xff]  ;;  %v3299_v19 = vsub.f32 %v7599_v28, %v6837_v5  ;;  %v7714_v0 = vld [vmem:[#allocation111_spill] sm:$0xff]  ;;  %v7719_v7 = vld [vmem:[#allocation118_spill] sm:$0xff] }
 0x633   : > { %3414 = vst [vmem:[%s6631_s8 + $0x260] sm:$0xff] %v3272_v34  ;;  %v3294_v27 = vsub.f32 %v7701_v29, %v6837_v5  ;;  %v7702_v34 = vld [vmem:[#allocation32_spill] sm:$0xff]  ;;  %v3303_v28 = vsub.f32 %v7603_v2, %v6837_v5  ;;  %v3307_v2 = vsub.f32 %v7708_v1, %v6837_v5  ;;  %v3311_v24 = vsub.f32 %v7611_v60, %v6837_v5  ;;  %v7717_v38 = vld [vmem:[#allocation115_spill] sm:$0xff] }
 0x634   : > { %3415 = vst [vmem:[%s6631_s8 + $0x268] sm:$0xff] %v3273_v25  ;;  %v3295_v4 = vsub.f32 %v7702_v34, %v6837_v5  ;;  %v7703_v25 = vld [vmem:[#allocation33_spill] sm:$0xff]  ;;  %v3315_v60 = vsub.f32 %v7714_v0, %v6837_v5  ;;  %v7720_v36 = vld [vmem:[#allocation120_spill] sm:$0xff]  ;;  %v3324_v13 = vsub.f32 %v7621_v51, %v6837_v5  ;;  %v3326_v52 = vsub.f32 %v6258_v53, %v6837_v5 }
 0x635   : > { %3416 = vst [vmem:[%s6631_s8 + $0x270] sm:$0xff] %v3274_v55  ;;  %v3296_v61 = vsub.f32 %v7703_v25, %v6837_v5  ;;  %v7704_v55 = vld [vmem:[#allocation30_spill] sm:$0xff]  ;;  %v3328_v51 = vsub.f32 %v6262_v39, %v6837_v5  ;;  %v3330_v53 = vsub.f32 %v6289_v3, %v6837_v5  ;;  %v7722_v39 = vld [vmem:[#allocation125_spill] sm:$0xff] }
 0x636   : > { %3417 = vst [vmem:[%s6631_s8 + $0x278] sm:$0xff] %v3275_v50  ;;  %v3297_v26 = vsub.f32 %v7704_v55, %v6837_v5  ;;  %v3298_v50 = vsub.f32 %v7598_v12, %v6837_v5  ;;  %v3302_v12 = vsub.f32 %v7706_v16, %v6837_v5  ;;  %v3332_v29 = vsub.f32 %v7722_v39, %v6837_v5 }
 0x637   : > { %3418 = vst [vmem:[%s6631_s8 + $0x280] sm:$0xff] %v3276_v58  ;;  %v3300_v58 = vsub.f32 %v7600_v31, %v6837_v5  ;;  %v3304_v31 = vsub.f32 %v7604_v11, %v6837_v5 }
 0x638   : > { %3419 = vst [vmem:[%s6631_s8 + $0x288] sm:$0xff] %v3277_v18  ;;  %v3301_v18 = vsub.f32 %v7705_v44, %v6837_v5 }
 0x639   : > { %3420 = vst [vmem:[%s6631_s8 + $0x290] sm:$0xff] %v3278_v40  ;;  %v3305_v40 = vsub.f32 %v7605_v23, %v6837_v5  ;;  %v3309_v23 = vsub.f32 %v7710_v47, %v6837_v5 }
 0x63a   : > { %3421 = vst [vmem:[%s6631_s8 + $0x298] sm:$0xff] %v3279_v62  ;;  %v3306_v62 = vsub.f32 %v7707_v35, %v6837_v5 }
 0x63b   : > { %3422 = vst [vmem:[%s6631_s8 + $0x2a0] sm:$0xff] %v3280_v54  ;;  %v7709_v54 = vld [vmem:[#allocation57_spill] sm:$0xff] }
 0x63c   : > { %3423 = vst [vmem:[%s6631_s8 + $0x2a8] sm:$0xff] %v3281_v37  ;;  %v3308_v11 = vsub.f32 %v7709_v54, %v6837_v5  ;;  %v3310_v37 = vsub.f32 %v7610_v17, %v6837_v5 }
 0x63d   : > { %3424 = vst [vmem:[%s6631_s8 + $0x2b0] sm:$0xff] %v3282_v56  ;;  %v7711_v56 = vld [vmem:[#allocation109_spill] sm:$0xff] }
 0x63e   : > { %3425 = vst [vmem:[%s6631_s8 + $0x2b8] sm:$0xff] %v3283_v48  ;;  %v3312_v45 = vsub.f32 %v7711_v56, %v6837_v5  ;;  %v7712_v48 = vld [vmem:[#allocation110_spill] sm:$0xff] }
 0x63f   : > { %3426 = vst [vmem:[%s6631_s8 + $0x2c0] sm:$0xff] %v3284_v21  ;;  %v3313_v42 = vsub.f32 %v7712_v48, %v6837_v5  ;;  %v7713_v21 = vld [vmem:[#allocation112_spill] sm:$0xff] }
 0x640   : > { %3427 = vst [vmem:[%s6631_s8 + $0x2c8] sm:$0xff] %v3285_v15  ;;  %v3314_v17 = vsub.f32 %v7713_v21, %v6837_v5  ;;  %v7715_v15 = vld [vmem:[#allocation113_spill] sm:$0xff] }
 0x641   : > { %3428 = vst [vmem:[%s6631_s8 + $0x2d0] sm:$0xff] %v3286_v8  ;;  %v3316_v14 = vsub.f32 %v7715_v15, %v6837_v5  ;;  %v7716_v8 = vld [vmem:[#allocation114_spill] sm:$0xff] }
 0x642   : > { %3429 = vst [vmem:[%s6631_s8 + $0x2d8] sm:$0xff] %v3287_v30  ;;  %v3317_v33 = vsub.f32 %v7716_v8, %v6837_v5  ;;  %v3318_v30 = vsub.f32 %v7616_v57, %v6837_v5  ;;  %v3322_v57 = vsub.f32 %v7720_v36, %v6837_v5 }
 0x643   : > { %3430 = vst [vmem:[%s6631_s8 + $0x2e0] sm:$0xff] %v3288_v10  ;;  %v3319_v10 = vsub.f32 %v7717_v38, %v6837_v5 }
 0x644   : > { %3431 = vst [vmem:[%s6631_s8 + $0x2e8] sm:$0xff] %v3289_v46  ;;  %v3320_v46 = vsub.f32 %v7718_v9, %v6837_v5 }
 0x645   : > { %3432 = vst [vmem:[%s6631_s8 + $0x2f0] sm:$0xff] %v3290_v20  ;;  %v3321_v20 = vsub.f32 %v7719_v7, %v6837_v5 }
 0x646   : > { %3433 = vst [vmem:[%s6631_s8 + $0x2f8] sm:$0xff] %v3291_v59  ;;  %v3323_v59 = vsub.f32 %v7620_v63, %v6837_v5  ;;  %v3327_v63 = vsub.f32 %v6248_v32, %v6837_v5  ;;  %v7721_v32 = vld [vmem:[#allocation123_spill] sm:$0xff] }
 0x647   : > { %3434 = vst [vmem:[%s6631_s8 + $0x300] sm:$0xff] %v3292_v49  ;;  %v3325_v49 = vsub.f32 %v7622_v43, %v6837_v5  ;;  %v3329_v43 = vsub.f32 %v6277_v22, %v6837_v5  ;;  %v7723_v22 = vld [vmem:[#allocation126_spill] sm:$0xff] }
 0x648   : > { %3435 = vst [vmem:[%s6631_s8 + $0x308] sm:$0xff] %v3293_v41  ;;  %v3331_v41 = vsub.f32 %v7721_v32, %v6837_v5  ;;  %v3333_v3 = vsub.f32 %v7723_v22, %v6837_v5 }
 0x649   : > { %3436 = vst [vmem:[%s6631_s8 + $0x310] sm:$0xff] %v3294_v27  ;;  %v7724_v27 = vld [vmem:[#allocation127_spill] sm:$0xff] }
 0x64a   : > { %3437 = vst [vmem:[%s6631_s8 + $0x318] sm:$0xff] %v3295_v4  ;;  %v3334_v34 = vsub.f32 %v7724_v27, %v6837_v5  ;;  %v7725_v4 = vld [vmem:[#allocation128_spill] sm:$0xff] }
 0x64b   : > { %3438 = vst [vmem:[%s6631_s8 + $0x320] sm:$0xff] %v3296_v61  ;;  %v3335_v25 = vsub.f32 %v7725_v4, %v6837_v5  ;;  %v7726_v61 = vld [vmem:[#allocation129_spill] sm:$0xff] }
 0x64c   : > { %3439 = vst [vmem:[%s6631_s8 + $0x328] sm:$0xff] %v3297_v26  ;;  %v3336_v55 = vsub.f32 %v7726_v61, %v6837_v5  ;;  %v3337_v26 = vsub.f32 %v7626_v6, %v6837_v5 }
 0x64d   : > { %3440 = vst [vmem:[%s6631_s8 + $0x330] sm:$0xff] %v3298_v50 }
 0x64e   : > { %3441 = vst [vmem:[%s6631_s8 + $0x338] sm:$0xff] %v3299_v19 }
 0x64f   : > { %3442 = vst [vmem:[%s6631_s8 + $0x340] sm:$0xff] %v3300_v58 }
 0x650   : > { %3443 = vst [vmem:[%s6631_s8 + $0x348] sm:$0xff] %v3301_v18 }
 0x651   : > { %3444 = vst [vmem:[%s6631_s8 + $0x350] sm:$0xff] %v3302_v12 }
 0x652   : > { %3445 = vst [vmem:[%s6631_s8 + $0x358] sm:$0xff] %v3303_v28 }
 0x653   : > { %3446 = vst [vmem:[%s6631_s8 + $0x360] sm:$0xff] %v3304_v31 }
 0x654   : > { %3447 = vst [vmem:[%s6631_s8 + $0x368] sm:$0xff] %v3305_v40 }
 0x655   : > { %3448 = vst [vmem:[%s6631_s8 + $0x370] sm:$0xff] %v3306_v62 }
 0x656   : > { %3449 = vst [vmem:[%s6631_s8 + $0x378] sm:$0xff] %v3307_v2 }
 0x657   : > { %3450 = vst [vmem:[%s6631_s8 + $0x380] sm:$0xff] %v3308_v11 }
 0x658   : > { %3451 = vst [vmem:[%s6631_s8 + $0x388] sm:$0xff] %v3309_v23 }
 0x659   : > { %3452 = vst [vmem:[%s6631_s8 + $0x390] sm:$0xff] %v3310_v37 }
 0x65a   : > { %3453 = vst [vmem:[%s6631_s8 + $0x398] sm:$0xff] %v3311_v24 }
 0x65b   : > { %3454 = vst [vmem:[%s6631_s8 + $0x3a0] sm:$0xff] %v3312_v45 }
 0x65c   : > { %3455 = vst [vmem:[%s6631_s8 + $0x3a8] sm:$0xff] %v3313_v42 }
 0x65d   : > { %3456 = vst [vmem:[%s6631_s8 + $0x3b0] sm:$0xff] %v3314_v17 }
 0x65e   : > { %3457 = vst [vmem:[%s6631_s8 + $0x3b8] sm:$0xff] %v3315_v60 }
 0x65f   : > { %3458 = vst [vmem:[%s6631_s8 + $0x3c0] sm:$0xff] %v3316_v14 }
 0x660   : > { %3459 = vst [vmem:[%s6631_s8 + $0x3c8] sm:$0xff] %v3317_v33 }
 0x661   : > { %3460 = vst [vmem:[%s6631_s8 + $0x3d0] sm:$0xff] %v3318_v30 }
 0x662   : > { %3461 = vst [vmem:[%s6631_s8 + $0x3d8] sm:$0xff] %v3319_v10 }
 0x663   : > { %3462 = vst [vmem:[%s6631_s8 + $0x3e0] sm:$0xff] %v3320_v46 }
 0x664   : > { %3463 = vst [vmem:[%s6631_s8 + $0x3e8] sm:$0xff] %v3321_v20 }
 0x665   : > { %3464 = vst [vmem:[%s6631_s8 + $0x3f0] sm:$0xff] %v3322_v57 }
 0x666   : > { %3465 = vst [vmem:[%s6631_s8 + $0x3f8] sm:$0xff] %v3323_v59 }
 0x667   : > { %3466 = vst [vmem:[%s6631_s8 + $0x400] sm:$0xff] %v3324_v13 }
 0x668   : > { %3467 = vst [vmem:[%s6631_s8 + $0x408] sm:$0xff] %v3325_v49 }
 0x669   : > { %3468 = vst [vmem:[%s6631_s8 + $0x410] sm:$0xff] %v3326_v52 }
 0x66a   : > { %3469 = vst [vmem:[%s6631_s8 + $0x418] sm:$0xff] %v3327_v63 }
 0x66b   : > { %3470 = vst [vmem:[%s6631_s8 + $0x420] sm:$0xff] %v3328_v51 }
 0x66c   : > { %3471 = vst [vmem:[%s6631_s8 + $0x428] sm:$0xff] %v3329_v43 }
 0x66d   : > { %3472 = vst [vmem:[%s6631_s8 + $0x430] sm:$0xff] %v3330_v53 }
 0x66e   : > { %3473 = vst [vmem:[%s6631_s8 + $0x438] sm:$0xff] %v3331_v41 }
 0x66f   : > { %3474 = vst [vmem:[%s6631_s8 + $0x440] sm:$0xff] %v3332_v29 }
 0x670   : > { %3475 = vst [vmem:[%s6631_s8 + $0x448] sm:$0xff] %v3333_v3 }
 0x671   : > { %3476 = vst [vmem:[%s6631_s8 + $0x450] sm:$0xff] %v3334_v34 }
 0x672   : > { %3477 = vst [vmem:[%s6631_s8 + $0x458] sm:$0xff] %v3335_v25 }
 0x673   : > { %3478 = vst [vmem:[%s6631_s8 + $0x460] sm:$0xff] %v3336_v55 }
 0x674   : > { %3479 = vst [vmem:[%s6631_s8 + $0x468] sm:$0xff] %v3337_v26 }
 0x675   : > { %5038 = shalt.err (!%p5035_p10)
}
 0x676   : > { %s5100_s19 = smov 9088   ;;  %s5101_s30 = smov 568  }
 0x677   : > { %4493 = dma.vmem_to_hbm [thread:$0]  (%p5224_p4), %s3502_s9, 18176, %s3504_s26, %s3484_s1, %s5100_s19, %s5100_s19, %s5101_s30  }
 0x678 PF: > { %s3521_s8 = sand.u32 1, %s5073_s21   ;;  %p7727_p13 = scmp.ge.s32.totalorder %s5085_s24, 2 }
 0x679   : > { %s3522_s27 = scalar_lea.sflag [#allocation4], %s3521_s8 }
 0x67a   : > { %p4513_p11 = pnand %p7727_p13, %p5228_p6 }
 0x67c   : > { %p4514_p0 = pneg %p4513_p11 }
 0x67e   : > { %5068 = dma.done.wait (%p4514_p0), %s3522_s27, 18176  }
 0x67f   : > { %5070 = vsyncadd (%p4514_p0), %s3522_s27, 4294949120  ;;  %p22_p2 = scmp.ge.s32.totalorder %s5198_s15, 4   ;;  %s7728_s21 = smov %s5077_s22 }
 0x680   : > { %s7729_s22 = smov %s5081_s23  ;;  %s7730_s23 = smov %s5209_s17 }
 0x681   : > { %s7731_s24 = smov %s5198_s15  ;;  %24 = sbr.rel (!%p22_p2) target bundleno = 9 (0x9), region = 113 }
 0x686   :  { %3536 = vsyncpa [#allocation3], 1 }
 0x687   :  { %3538 = vsyncpa [#allocation3 + $0x1], 1 }
 0x688   :  { %3539 = vsyncpa [#allocation6], 1 }
 0x689   :  { %3540 = vsyncpa [#allocation9], 1 }
 0x68a   :  { %3541 = vsyncpa [#allocation4], 1 }
 0x68b   :  { %3543 = vsyncpa [#allocation4 + $0x1], 1 }

</bundles_post_ra>
